<compile_context>
chip_gen: v7x
topology: tpu7x:2x2x1
jax: 0.10.0
libtpu: 0.0.40
codegen_flags: <defaults>
</compile_context>

<pallas_src>
import functools

import jax
import jax.numpy as jnp
import numpy as np
from jax import lax
from jax.experimental import pallas as pl
from jax.experimental.pallas import tpu as pltpu

# ----------------------------------------------------------------------------
# Network geometry (static)
# ----------------------------------------------------------------------------
IN_C, IN_H, IN_W = 3, 48, 48
C1_OC, C1_WO, C1_HP, C1_WP = 6, 47, 23, 23      # conv1 out / pooled sizes
C2_OC, C2_WO, C2_HP, C2_WP = 16, 22, 11, 11     # conv2 out / pooled sizes
FC1_OUT, FC2_OUT, FC3_OUT = 400, 100, 5
FC_PAD = 128                                    # lane-dense padded fc2/fc3 width


# ----------------------------------------------------------------------------
# Host-side (glue) constructors for the structured matmul operands
# ----------------------------------------------------------------------------
def _banded_conv_matrices(w, w_in):
    """2x2 valid conv along the lane axis as two banded matmul operands.

    Returns m with shape (2, C*w_in, OC*(w_in-1)) where
        m[di, c*w_in + j + dj, oc*(w_in-1) + j] = w[oc, c, di, dj]
    so that, for activations A[row, c*w_in + w],
        sum_di  A[di:, :] @ m[di]
    is the convolution laid out as [row, oc*(w_in-1) + j].
    """
    oc, c, _, _ = w.shape
    wo = w_in - 1
    oc_i, c_i, dj_i, j_i = np.meshgrid(
        np.arange(oc), np.arange(c), np.arange(2), np.arange(wo), indexing="ij")
    rows = (c_i * w_in + j_i + dj_i).ravel()
    cols = (oc_i * wo + j_i).ravel()
    m = jnp.zeros((2, c * w_in, oc * wo), jnp.float32)
    for di in range(2):
        vals = w[oc_i, c_i, di, dj_i].astype(jnp.float32).reshape(-1)
        m = m.at[di, rows, cols].set(vals)
    return m


def _row_select(n_batch, period, hp):
    """R[n*hp + i, n*period + 2*i] = 1 : pick even rows inside each sample block."""
    r = np.zeros((n_batch * hp, n_batch * period - 2), np.float32)
    for n in range(n_batch):
        for i in range(hp):
            r[n * hp + i, n * period + 2 * i] = 1.0
    return jnp.asarray(r)


def _col_select(oc, wo, wp):
    """C[oc*wo + 2*j, oc*wp + j] = 1 : pick even cols inside each channel block."""
    c = np.zeros((oc * wo - 1, oc * wp), np.float32)
    for o in range(oc):
        for j in range(wp):
            c[o * wo + 2 * j, o * wp + j] = 1.0
    return jnp.asarray(c)


# ----------------------------------------------------------------------------
# Single fused kernel: conv1+pool -> conv2+pool -> fc1 -> fc2 -> fc3
# ----------------------------------------------------------------------------
def fused_net_kernel(x_ref, m1_ref, b1_ref, r1_ref, c1_ref,
                     m2_ref, b2_ref, r2_ref, c2_ref,
                     w1_ref, fb1_ref, w2_ref, fb2_ref, w3_ref, fb3_ref,
                     out_ref, *, n_batch):
    f32 = jnp.float32
    bf16 = jnp.bfloat16

    def conv_relu_pool(act, m_ref, b_ref, r_ref, c_ref):
        # act: (rows, C*W) with rows = n*period + h, cols = c*W + w.
        rows_out = act.shape[0] - 1
        y = (jnp.dot(act[0:rows_out, :], m_ref[0], preferred_element_type=f32)
             + jnp.dot(act[1:rows_out + 1, :], m_ref[1], preferred_element_type=f32)
             + b_ref[...])
        y = jnp.maximum(y, 0.0)                              # (rows_out, OC*Wo)
        hr, wc = rows_out - 1, y.shape[1] - 1
        wm = jnp.maximum(
            jnp.maximum(y[0:hr, 0:wc], y[0:hr, 1:wc + 1]),
            jnp.maximum(y[1:hr + 1, 0:wc], y[1:hr + 1, 1:wc + 1]))
        # stride-2 subsampling via 0/1 selection matmuls; rows/cols that
        # straddle a sample or channel boundary are never selected.
        return jnp.dot(r_ref[...],
                       jnp.dot(wm, c_ref[...], preferred_element_type=f32),
                       preferred_element_type=f32)

    # conv1 + ReLU + maxpool : (N*48, 3*48) -> (N*23, 6*23)
    p1 = conv_relu_pool(x_ref[...], m1_ref, b1_ref, r1_ref, c1_ref)
    # conv2 + ReLU + maxpool : (N*23, 6*23) -> (N*11, 16*11)
    p2 = conv_relu_pool(p1, m2_ref, b2_ref, r2_ref, c2_ref)

    # fc1: one bf16 MXU matmul against block-rearranged weights; the per-sample
    # block-diagonal gather below realizes torch's NCHW flatten ordering.
    hp2 = p2.shape[0] // n_batch                             # 11
    nf1 = fb1_ref.shape[1]                                   # 400
    t = jnp.dot(p2.astype(bf16), w1_ref[...],
                preferred_element_type=f32)                  # (N*11, 11*400)
    rows = []
    for n in range(n_batch):
        acc = fb1_ref[...]                                   # (1, 400)
        for i in range(hp2):
            acc = acc + t[n * hp2 + i:n * hp2 + i + 1, i * nf1:(i + 1) * nf1]
        rows.append(jnp.maximum(acc, 0.0))
    h1 = jnp.concatenate(rows, axis=0)                       # (N, 400)

    # fc2 (+ReLU) and fc3, both padded to 128 lane-dense output columns.
    h2 = jnp.dot(h1.astype(bf16), w2_ref[...], preferred_element_type=f32) + fb2_ref[...]
    h2 = jnp.maximum(h2, 0.0)                                # (N, 128)
    out_ref[...] = (jnp.dot(h2.astype(bf16), w3_ref[...], preferred_element_type=f32)
                    + fb3_ref[...])                          # (N, 128)


def net_forward(params, x):
    n, c, h, w = x.shape
    assert (c, h, w) == (IN_C, IN_H, IN_W)

    # -------- host-side (glue) rearrangements of input / weights ------------
    x0 = x.astype(jnp.float32).transpose(0, 2, 1, 3).reshape(n * IN_H, IN_C * IN_W)
    m1 = _banded_conv_matrices(params["conv1_w"], IN_W)                 # (2,144,282)
    b1 = jnp.repeat(params["conv1_b"].astype(jnp.float32), C1_WO)[None, :]
    m2 = _banded_conv_matrices(params["conv2_w"], C1_WP)                # (2,138,352)
    b2 = jnp.repeat(params["conv2_b"].astype(jnp.float32), C2_WO)[None, :]
    r1 = _row_select(n, IN_H, C1_HP)                                    # (46, 94)
    c1 = _col_select(C1_OC, C1_WO, C1_WP)                               # (281,138)
    r2 = _row_select(n, C1_HP, C2_HP)                                   # (22, 44)
    c2 = _col_select(C2_OC, C2_WO, C2_WP)                               # (351,176)
    # fc1 weights (1936,400) -> (16*11, 11*400): row = oc*11 + j, col = i*400 + f
    w1 = (params["fc1_w"].reshape(C2_OC, C2_HP, C2_WP, FC1_OUT)
          .transpose(0, 2, 1, 3).reshape(C2_OC * C2_WP, C2_HP * FC1_OUT)
          .astype(jnp.bfloat16))
    fb1 = params["fc1_b"].astype(jnp.float32)[None, :]
    w2 = jnp.zeros((FC1_OUT, FC_PAD), jnp.bfloat16).at[:, :FC2_OUT].set(
        params["fc2_w"].astype(jnp.bfloat16))
    fb2 = jnp.zeros((1, FC_PAD), jnp.float32).at[:, :FC2_OUT].set(
        params["fc2_b"].astype(jnp.float32))
    w3 = jnp.zeros((FC_PAD, FC_PAD), jnp.bfloat16).at[:FC2_OUT, :FC3_OUT].set(
        params["fc3_w"].astype(jnp.bfloat16))
    fb3 = jnp.zeros((1, FC_PAD), jnp.float32).at[:, :FC3_OUT].set(
        params["fc3_b"].astype(jnp.float32))

    out = pl.pallas_call(
        functools.partial(fused_net_kernel, n_batch=n),
        out_shape=jax.ShapeDtypeStruct((n, FC_PAD), jnp.float32),
        in_specs=[pl.BlockSpec(memory_space=pltpu.MemorySpace.VMEM)] * 15,
        out_specs=pl.BlockSpec(memory_space=pltpu.MemorySpace.VMEM),
    )(x0, m1, b1, r1, c1, m2, b2, r2, c2, w1, fb1, w2, fb2, w3, fb3)
    return out[:, :FC3_OUT]


# ----------------------------------------------------------------------------
# Parameter init (PyTorch-style uniform) + pure-JAX f32 reference
# ----------------------------------------------------------------------------
def init_params(key):
    ks = jax.random.split(key, 10)

    def u(k, shape, fan_in):
        bound = 1.0 / np.sqrt(fan_in)
        return jax.random.uniform(k, shape, jnp.float32, -bound, bound)

    return {
        "conv1_w": u(ks[0], (6, 3, 2, 2), 3 * 2 * 2),
        "conv1_b": u(ks[1], (6,), 3 * 2 * 2),
        "conv2_w": u(ks[2], (16, 6, 2, 2), 6 * 2 * 2),
        "conv2_b": u(ks[3], (16,), 6 * 2 * 2),
        "fc1_w": u(ks[4], (1936, 400), 1936),   # stored (in, out)
        "fc1_b": u(ks[5], (400,), 1936),
        "fc2_w": u(ks[6], (400, 100), 400),
        "fc2_b": u(ks[7], (100,), 400),
        "fc3_w": u(ks[8], (100, 5), 100),
        "fc3_b": u(ks[9], (5,), 100),
    }


def reference_forward(params, x):
    def conv(xx, w, b):
        y = lax.conv_general_dilated(
            xx, w, window_strides=(1, 1), padding="VALID",
            dimension_numbers=("NCHW", "OIHW", "NCHW"))
        return y + b[None, :, None, None]

    def pool(xx):
        return lax.reduce_window(
            xx, -jnp.inf, lax.max,
            window_dimensions=(1, 1, 2, 2),
            window_strides=(1, 1, 2, 2), padding="VALID")

    hh = pool(jax.nn.relu(conv(x, params["conv1_w"], params["conv1_b"])))
    hh = pool(jax.nn.relu(conv(hh, params["conv2_w"], params["conv2_b"])))
    hh = hh.reshape(hh.shape[0], -1)
    hh = jax.nn.relu(hh @ params["fc1_w"] + params["fc1_b"])
    hh = jax.nn.relu(hh @ params["fc2_w"] + params["fc2_b"])
    return hh @ params["fc3_w"] + params["fc3_b"]


if __name__ == "__main__":
    key = jax.random.PRNGKey(0)
    kp, kx = jax.random.split(key)
    params = init_params(kp)
    # Input: batch=2, NCHW, 3x48x48 (48 is forced by fc1's 1936 input features)
    x = jax.random.normal(kx, (2, IN_C, IN_H, IN_W), jnp.float32)

    out = jax.block_until_ready(net_forward(params, x))
    assert out.shape == (2, FC3_OUT), out.shape

    ref = jax.block_until_ready(reference_forward(params, x))
    # bf16 FC weights/activations (f32 accumulation) vs f32 reference.
    np.testing.assert_allclose(np.asarray(out), np.asarray(ref),
                               rtol=2e-2, atol=2e-2)

    print("KERNEL_OK")
</pallas_src>

<mosaic_0001>
module attributes {stable_mosaic.version = 11 : i64} {
  func.func @fused_net_kernel(%arg0: memref<96x144xf32, #tpu.memory_space<vmem>>, %arg1: memref<2x144x282xf32, #tpu.memory_space<vmem>>, %arg2: memref<1x282xf32, #tpu.memory_space<vmem>>, %arg3: memref<46x94xf32, #tpu.memory_space<vmem>>, %arg4: memref<281x138xf32, #tpu.memory_space<vmem>>, %arg5: memref<2x138x352xf32, #tpu.memory_space<vmem>>, %arg6: memref<1x352xf32, #tpu.memory_space<vmem>>, %arg7: memref<22x44xf32, #tpu.memory_space<vmem>>, %arg8: memref<351x176xf32, #tpu.memory_space<vmem>>, %arg9: memref<176x4400xbf16, #tpu.memory_space<vmem>>, %arg10: memref<1x400xf32, #tpu.memory_space<vmem>>, %arg11: memref<400x128xbf16, #tpu.memory_space<vmem>>, %arg12: memref<1x128xf32, #tpu.memory_space<vmem>>, %arg13: memref<128x128xbf16, #tpu.memory_space<vmem>>, %arg14: memref<1x128xf32, #tpu.memory_space<vmem>>, %arg15: memref<2x128xf32, #tpu.memory_space<vmem>>) attributes {dimension_semantics = [], scalar_prefetch = 0 : i64, scratch_operands = 0 : i64, tpu.core_type = #tpu.core_type<tc>} {
    %c0 = arith.constant 0 : index
    %c0_0 = arith.constant 0 : index
    %0 = vector.load %arg0[%c0, %c0_0] : memref<96x144xf32, #tpu.memory_space<vmem>>, vector<96x144xf32>
    %1 = vector.extract_strided_slice %0 {offsets = [0, 0], sizes = [95, 144], strides = [1, 1]} : vector<96x144xf32> to vector<95x144xf32>
    %c0_1 = arith.constant 0 : index
    %c0_2 = arith.constant 0 : index
    %c0_3 = arith.constant 0 : index
    %2 = vector.load %arg1[%c0_1, %c0_2, %c0_3] : memref<2x144x282xf32, #tpu.memory_space<vmem>>, vector<1x144x282xf32>
    %3 = vector.shape_cast %2 : vector<1x144x282xf32> to vector<144x282xf32>
    %cst = arith.constant dense<0.000000e+00> : vector<95x282xf32>
    %4 = tpu.matmul %1, %3, %cst {dimension_numbers = #tpu.dot_dimension_numbers<[1], [0], [0], [1], [0, 0, 1, 1], [], []>} : vector<95x144xf32>, vector<144x282xf32>, vector<95x282xf32> -> vector<95x282xf32>
    %5 = vector.extract_strided_slice %0 {offsets = [1, 0], sizes = [95, 144], strides = [1, 1]} : vector<96x144xf32> to vector<95x144xf32>
    %c1 = arith.constant 1 : index
    %c0_4 = arith.constant 0 : index
    %c0_5 = arith.constant 0 : index
    %6 = vector.load %arg1[%c1, %c0_4, %c0_5] : memref<2x144x282xf32, #tpu.memory_space<vmem>>, vector<1x144x282xf32>
    %7 = vector.shape_cast %6 : vector<1x144x282xf32> to vector<144x282xf32>
    %cst_6 = arith.constant dense<0.000000e+00> : vector<95x282xf32>
    %8 = tpu.matmul %5, %7, %cst_6 {dimension_numbers = #tpu.dot_dimension_numbers<[1], [0], [0], [1], [0, 0, 1, 1], [], []>} : vector<95x144xf32>, vector<144x282xf32>, vector<95x282xf32> -> vector<95x282xf32>
    %9 = arith.addf %4, %8 : vector<95x282xf32>
    %c0_7 = arith.constant 0 : index
    %c0_8 = arith.constant 0 : index
    %10 = vector.load %arg2[%c0_7, %c0_8] : memref<1x282xf32, #tpu.memory_space<vmem>>, vector<1x282xf32>
    %11 = vector.broadcast %10 : vector<1x282xf32> to vector<95x282xf32>
    %12 = arith.addf %9, %11 : vector<95x282xf32>
    %cst_9 = arith.constant 0.000000e+00 : f32
    %13 = vector.broadcast %cst_9 : f32 to vector<95x282xf32>
    %14 = arith.maximumf %12, %13 : vector<95x282xf32>
    %15 = vector.extract_strided_slice %14 {offsets = [0, 0], sizes = [94, 281], strides = [1, 1]} : vector<95x282xf32> to vector<94x281xf32>
    %16 = vector.extract_strided_slice %14 {offsets = [0, 1], sizes = [94, 281], strides = [1, 1]} : vector<95x282xf32> to vector<94x281xf32>
    %17 = arith.maximumf %15, %16 : vector<94x281xf32>
    %18 = vector.extract_strided_slice %14 {offsets = [1, 0], sizes = [94, 281], strides = [1, 1]} : vector<95x282xf32> to vector<94x281xf32>
    %19 = vector.extract_strided_slice %14 {offsets = [1, 1], sizes = [94, 281], strides = [1, 1]} : vector<95x282xf32> to vector<94x281xf32>
    %20 = arith.maximumf %18, %19 : vector<94x281xf32>
    %21 = arith.maximumf %17, %20 : vector<94x281xf32>
    %c0_10 = arith.constant 0 : index
    %c0_11 = arith.constant 0 : index
    %22 = vector.load %arg3[%c0_10, %c0_11] : memref<46x94xf32, #tpu.memory_space<vmem>>, vector<46x94xf32>
    %c0_12 = arith.constant 0 : index
    %c0_13 = arith.constant 0 : index
    %23 = vector.load %arg4[%c0_12, %c0_13] : memref<281x138xf32, #tpu.memory_space<vmem>>, vector<281x138xf32>
    %cst_14 = arith.constant dense<0.000000e+00> : vector<94x138xf32>
    %24 = tpu.matmul %21, %23, %cst_14 {dimension_numbers = #tpu.dot_dimension_numbers<[1], [0], [0], [1], [0, 0, 1, 1], [], []>} : vector<94x281xf32>, vector<281x138xf32>, vector<94x138xf32> -> vector<94x138xf32>
    %cst_15 = arith.constant dense<0.000000e+00> : vector<46x138xf32>
    %25 = tpu.matmul %22, %24, %cst_15 {dimension_numbers = #tpu.dot_dimension_numbers<[1], [0], [0], [1], [0, 0, 1, 1], [], []>} : vector<46x94xf32>, vector<94x138xf32>, vector<46x138xf32> -> vector<46x138xf32>
    %26 = vector.extract_strided_slice %25 {offsets = [0, 0], sizes = [45, 138], strides = [1, 1]} : vector<46x138xf32> to vector<45x138xf32>
    %c0_16 = arith.constant 0 : index
    %c0_17 = arith.constant 0 : index
    %c0_18 = arith.constant 0 : index
    %27 = vector.load %arg5[%c0_16, %c0_17, %c0_18] : memref<2x138x352xf32, #tpu.memory_space<vmem>>, vector<1x138x352xf32>
    %28 = vector.shape_cast %27 : vector<1x138x352xf32> to vector<138x352xf32>
    %cst_19 = arith.constant dense<0.000000e+00> : vector<45x352xf32>
    %29 = tpu.matmul %26, %28, %cst_19 {dimension_numbers = #tpu.dot_dimension_numbers<[1], [0], [0], [1], [0, 0, 1, 1], [], []>} : vector<45x138xf32>, vector<138x352xf32>, vector<45x352xf32> -> vector<45x352xf32>
    %30 = vector.extract_strided_slice %25 {offsets = [1, 0], sizes = [45, 138], strides = [1, 1]} : vector<46x138xf32> to vector<45x138xf32>
    %c1_20 = arith.constant 1 : index
    %c0_21 = arith.constant 0 : index
    %c0_22 = arith.constant 0 : index
    %31 = vector.load %arg5[%c1_20, %c0_21, %c0_22] : memref<2x138x352xf32, #tpu.memory_space<vmem>>, vector<1x138x352xf32>
    %32 = vector.shape_cast %31 : vector<1x138x352xf32> to vector<138x352xf32>
    %cst_23 = arith.constant dense<0.000000e+00> : vector<45x352xf32>
    %33 = tpu.matmul %30, %32, %cst_23 {dimension_numbers = #tpu.dot_dimension_numbers<[1], [0], [0], [1], [0, 0, 1, 1], [], []>} : vector<45x138xf32>, vector<138x352xf32>, vector<45x352xf32> -> vector<45x352xf32>
    %34 = arith.addf %29, %33 : vector<45x352xf32>
    %c0_24 = arith.constant 0 : index
    %c0_25 = arith.constant 0 : index
    %35 = vector.load %arg6[%c0_24, %c0_25] : memref<1x352xf32, #tpu.memory_space<vmem>>, vector<1x352xf32>
    %36 = vector.broadcast %35 : vector<1x352xf32> to vector<45x352xf32>
    %37 = arith.addf %34, %36 : vector<45x352xf32>
    %cst_26 = arith.constant 0.000000e+00 : f32
    %38 = vector.broadcast %cst_26 : f32 to vector<45x352xf32>
    %39 = arith.maximumf %37, %38 : vector<45x352xf32>
    %40 = vector.extract_strided_slice %39 {offsets = [0, 0], sizes = [44, 351], strides = [1, 1]} : vector<45x352xf32> to vector<44x351xf32>
    %41 = vector.extract_strided_slice %39 {offsets = [0, 1], sizes = [44, 351], strides = [1, 1]} : vector<45x352xf32> to vector<44x351xf32>
    %42 = arith.maximumf %40, %41 : vector<44x351xf32>
    %43 = vector.extract_strided_slice %39 {offsets = [1, 0], sizes = [44, 351], strides = [1, 1]} : vector<45x352xf32> to vector<44x351xf32>
    %44 = vector.extract_strided_slice %39 {offsets = [1, 1], sizes = [44, 351], strides = [1, 1]} : vector<45x352xf32> to vector<44x351xf32>
    %45 = arith.maximumf %43, %44 : vector<44x351xf32>
    %46 = arith.maximumf %42, %45 : vector<44x351xf32>
    %c0_27 = arith.constant 0 : index
    %c0_28 = arith.constant 0 : index
    %47 = vector.load %arg7[%c0_27, %c0_28] : memref<22x44xf32, #tpu.memory_space<vmem>>, vector<22x44xf32>
    %c0_29 = arith.constant 0 : index
    %c0_30 = arith.constant 0 : index
    %48 = vector.load %arg8[%c0_29, %c0_30] : memref<351x176xf32, #tpu.memory_space<vmem>>, vector<351x176xf32>
    %cst_31 = arith.constant dense<0.000000e+00> : vector<44x176xf32>
    %49 = tpu.matmul %46, %48, %cst_31 {dimension_numbers = #tpu.dot_dimension_numbers<[1], [0], [0], [1], [0, 0, 1, 1], [], []>} : vector<44x351xf32>, vector<351x176xf32>, vector<44x176xf32> -> vector<44x176xf32>
    %cst_32 = arith.constant dense<0.000000e+00> : vector<22x176xf32>
    %50 = tpu.matmul %47, %49, %cst_32 {dimension_numbers = #tpu.dot_dimension_numbers<[1], [0], [0], [1], [0, 0, 1, 1], [], []>} : vector<22x44xf32>, vector<44x176xf32>, vector<22x176xf32> -> vector<22x176xf32>
    %51 = arith.truncf %50 : vector<22x176xf32> to vector<22x176xbf16>
    %c0_33 = arith.constant 0 : index
    %c0_34 = arith.constant 0 : index
    %52 = vector.load %arg9[%c0_33, %c0_34] : memref<176x4400xbf16, #tpu.memory_space<vmem>>, vector<176x4400xbf16>
    %cst_35 = arith.constant dense<0.000000e+00> : vector<22x4400xf32>
    %53 = tpu.matmul %51, %52, %cst_35 {dimension_numbers = #tpu.dot_dimension_numbers<[1], [0], [0], [1], [0, 0, 1, 1], [], []>} : vector<22x176xbf16>, vector<176x4400xbf16>, vector<22x4400xf32> -> vector<22x4400xf32>
    %c0_36 = arith.constant 0 : index
    %c0_37 = arith.constant 0 : index
    %54 = vector.load %arg10[%c0_36, %c0_37] : memref<1x400xf32, #tpu.memory_space<vmem>>, vector<1x400xf32>
    %55 = vector.extract_strided_slice %53 {offsets = [0, 0], sizes = [1, 400], strides = [1, 1]} : vector<22x4400xf32> to vector<1x400xf32>
    %56 = arith.addf %54, %55 : vector<1x400xf32>
    %57 = vector.extract_strided_slice %53 {offsets = [1, 400], sizes = [1, 400], strides = [1, 1]} : vector<22x4400xf32> to vector<1x400xf32>
    %58 = arith.addf %56, %57 : vector<1x400xf32>
    %59 = vector.extract_strided_slice %53 {offsets = [2, 800], sizes = [1, 400], strides = [1, 1]} : vector<22x4400xf32> to vector<1x400xf32>
    %60 = arith.addf %58, %59 : vector<1x400xf32>
    %61 = vector.extract_strided_slice %53 {offsets = [3, 1200], sizes = [1, 400], strides = [1, 1]} : vector<22x4400xf32> to vector<1x400xf32>
    %62 = arith.addf %60, %61 : vector<1x400xf32>
    %63 = vector.extract_strided_slice %53 {offsets = [4, 1600], sizes = [1, 400], strides = [1, 1]} : vector<22x4400xf32> to vector<1x400xf32>
    %64 = arith.addf %62, %63 : vector<1x400xf32>
    %65 = vector.extract_strided_slice %53 {offsets = [5, 2000], sizes = [1, 400], strides = [1, 1]} : vector<22x4400xf32> to vector<1x400xf32>
    %66 = arith.addf %64, %65 : vector<1x400xf32>
    %67 = vector.extract_strided_slice %53 {offsets = [6, 2400], sizes = [1, 400], strides = [1, 1]} : vector<22x4400xf32> to vector<1x400xf32>
    %68 = arith.addf %66, %67 : vector<1x400xf32>
    %69 = vector.extract_strided_slice %53 {offsets = [7, 2800], sizes = [1, 400], strides = [1, 1]} : vector<22x4400xf32> to vector<1x400xf32>
    %70 = arith.addf %68, %69 : vector<1x400xf32>
    %71 = vector.extract_strided_slice %53 {offsets = [8, 3200], sizes = [1, 400], strides = [1, 1]} : vector<22x4400xf32> to vector<1x400xf32>
    %72 = arith.addf %70, %71 : vector<1x400xf32>
    %73 = vector.extract_strided_slice %53 {offsets = [9, 3600], sizes = [1, 400], strides = [1, 1]} : vector<22x4400xf32> to vector<1x400xf32>
    %74 = arith.addf %72, %73 : vector<1x400xf32>
    %75 = vector.extract_strided_slice %53 {offsets = [10, 4000], sizes = [1, 400], strides = [1, 1]} : vector<22x4400xf32> to vector<1x400xf32>
    %76 = arith.addf %74, %75 : vector<1x400xf32>
    %cst_38 = arith.constant 0.000000e+00 : f32
    %77 = vector.broadcast %cst_38 : f32 to vector<1x400xf32>
    %78 = arith.maximumf %76, %77 : vector<1x400xf32>
    %c0_39 = arith.constant 0 : index
    %c0_40 = arith.constant 0 : index
    %79 = vector.load %arg10[%c0_39, %c0_40] : memref<1x400xf32, #tpu.memory_space<vmem>>, vector<1x400xf32>
    %80 = vector.extract_strided_slice %53 {offsets = [11, 0], sizes = [1, 400], strides = [1, 1]} : vector<22x4400xf32> to vector<1x400xf32>
    %81 = arith.addf %79, %80 : vector<1x400xf32>
    %82 = vector.extract_strided_slice %53 {offsets = [12, 400], sizes = [1, 400], strides = [1, 1]} : vector<22x4400xf32> to vector<1x400xf32>
    %83 = arith.addf %81, %82 : vector<1x400xf32>
    %84 = vector.extract_strided_slice %53 {offsets = [13, 800], sizes = [1, 400], strides = [1, 1]} : vector<22x4400xf32> to vector<1x400xf32>
    %85 = arith.addf %83, %84 : vector<1x400xf32>
    %86 = vector.extract_strided_slice %53 {offsets = [14, 1200], sizes = [1, 400], strides = [1, 1]} : vector<22x4400xf32> to vector<1x400xf32>
    %87 = arith.addf %85, %86 : vector<1x400xf32>
    %88 = vector.extract_strided_slice %53 {offsets = [15, 1600], sizes = [1, 400], strides = [1, 1]} : vector<22x4400xf32> to vector<1x400xf32>
    %89 = arith.addf %87, %88 : vector<1x400xf32>
    %90 = vector.extract_strided_slice %53 {offsets = [16, 2000], sizes = [1, 400], strides = [1, 1]} : vector<22x4400xf32> to vector<1x400xf32>
    %91 = arith.addf %89, %90 : vector<1x400xf32>
    %92 = vector.extract_strided_slice %53 {offsets = [17, 2400], sizes = [1, 400], strides = [1, 1]} : vector<22x4400xf32> to vector<1x400xf32>
    %93 = arith.addf %91, %92 : vector<1x400xf32>
    %94 = vector.extract_strided_slice %53 {offsets = [18, 2800], sizes = [1, 400], strides = [1, 1]} : vector<22x4400xf32> to vector<1x400xf32>
    %95 = arith.addf %93, %94 : vector<1x400xf32>
    %96 = vector.extract_strided_slice %53 {offsets = [19, 3200], sizes = [1, 400], strides = [1, 1]} : vector<22x4400xf32> to vector<1x400xf32>
    %97 = arith.addf %95, %96 : vector<1x400xf32>
    %98 = vector.extract_strided_slice %53 {offsets = [20, 3600], sizes = [1, 400], strides = [1, 1]} : vector<22x4400xf32> to vector<1x400xf32>
    %99 = arith.addf %97, %98 : vector<1x400xf32>
    %100 = vector.extract_strided_slice %53 {offsets = [21, 4000], sizes = [1, 400], strides = [1, 1]} : vector<22x4400xf32> to vector<1x400xf32>
    %101 = arith.addf %99, %100 : vector<1x400xf32>
    %cst_41 = arith.constant 0.000000e+00 : f32
    %102 = vector.broadcast %cst_41 : f32 to vector<1x400xf32>
    %103 = arith.maximumf %101, %102 : vector<1x400xf32>
    %104 = tpu.concatenate %78, %103 in 0 : vector<1x400xf32>, vector<1x400xf32> -> vector<2x400xf32>
    %105 = arith.truncf %104 : vector<2x400xf32> to vector<2x400xbf16>
    %c0_42 = arith.constant 0 : index
    %c0_43 = arith.constant 0 : index
    %106 = vector.load %arg11[%c0_42, %c0_43] : memref<400x128xbf16, #tpu.memory_space<vmem>>, vector<400x128xbf16>
    %cst_44 = arith.constant dense<0.000000e+00> : vector<2x128xf32>
    %107 = tpu.matmul %105, %106, %cst_44 {dimension_numbers = #tpu.dot_dimension_numbers<[1], [0], [0], [1], [0, 0, 1, 1], [], []>} : vector<2x400xbf16>, vector<400x128xbf16>, vector<2x128xf32> -> vector<2x128xf32>
    %c0_45 = arith.constant 0 : index
    %c0_46 = arith.constant 0 : index
    %108 = vector.load %arg12[%c0_45, %c0_46] : memref<1x128xf32, #tpu.memory_space<vmem>>, vector<1x128xf32>
    %109 = vector.broadcast %108 : vector<1x128xf32> to vector<2x128xf32>
    %110 = arith.addf %107, %109 : vector<2x128xf32>
    %cst_47 = arith.constant 0.000000e+00 : f32
    %111 = vector.broadcast %cst_47 : f32 to vector<2x128xf32>
    %112 = arith.maximumf %110, %111 : vector<2x128xf32>
    %113 = arith.truncf %112 : vector<2x128xf32> to vector<2x128xbf16>
    %c0_48 = arith.constant 0 : index
    %c0_49 = arith.constant 0 : index
    %114 = vector.load %arg13[%c0_48, %c0_49] : memref<128x128xbf16, #tpu.memory_space<vmem>>, vector<128x128xbf16>
    %cst_50 = arith.constant dense<0.000000e+00> : vector<2x128xf32>
    %115 = tpu.matmul %113, %114, %cst_50 {dimension_numbers = #tpu.dot_dimension_numbers<[1], [0], [0], [1], [0, 0, 1, 1], [], []>} : vector<2x128xbf16>, vector<128x128xbf16>, vector<2x128xf32> -> vector<2x128xf32>
    %c0_51 = arith.constant 0 : index
    %c0_52 = arith.constant 0 : index
    %116 = vector.load %arg14[%c0_51, %c0_52] : memref<1x128xf32, #tpu.memory_space<vmem>>, vector<1x128xf32>
    %117 = vector.broadcast %116 : vector<1x128xf32> to vector<2x128xf32>
    %118 = arith.addf %115, %117 : vector<2x128xf32>
    %c0_53 = arith.constant 0 : index
    %c0_54 = arith.constant 0 : index
    %119 = vector.load %arg15[%c0_53, %c0_54] : memref<2x128xf32, #tpu.memory_space<vmem>>, vector<2x128xf32>
    tpu.vector_store %arg15[%c0_53, %c0_54], %118 {strides = array<i32>} : memref<2x128xf32, #tpu.memory_space<vmem>>, vector<2x128xf32>,
    return
  }
}

</mosaic_0001>

<bundles_post_ra>
// kernel: tpu_custom_call.1
= control target key start
LH: loop header
LB: loop body
LE: loop exit
PB: predicated region body
PF: predicated region fallthrough
CT: control target
= control target key end

     0   :  { %v13793_v3 = vmov 0.0|0.0   ;;  %vm209_vm0 = vcmask 1046528   ;;  %vm268_vm1 = vcmask 130048   ;;  %s13760_s0 = inlined_call_operand.vmem [shape: f32[96,144], index: 0, kind: input, shape index: {}]   ;;  %s13761_s1 = inlined_call_operand.vmem [shape: f32[2,144,282], index: 1, kind: input, shape index: {}]   ;;  %s13762_s2 = inlined_call_operand.vmem [shape: f32[1,282], index: 2, kind: input, shape index: {}]   ;;  %s13763_s3 = inlined_call_operand.vmem [shape: f32[46,94], index: 3, kind: input, shape index: {}]   ;;  %s13764_s4 = inlined_call_operand.vmem [shape: f32[281,138], index: 4, kind: input, shape index: {}]   ;;  %s13765_s5 = inlined_call_operand.vmem [shape: f32[2,138,352], index: 5, kind: input, shape index: {}]   ;;  %s13766_s6 = inlined_call_operand.vmem [shape: f32[1,352], index: 6, kind: input, shape index: {}]   ;;  %s13767_s7 = inlined_call_operand.vmem [shape: f32[22,44], index: 7, kind: input, shape index: {}]   ;;  %s13768_s8 = inlined_call_operand.vmem [shape: f32[351,176], index: 8, kind: input, shape index: {}]   ;;  %s13769_s9 = inlined_call_operand.vmem [shape: bf16[176,4400], index: 9, kind: input, shape index: {}]   ;;  %s13770_s10 = inlined_call_operand.vmem [shape: f32[1,400], index: 10, kind: input, shape index: {}]   ;;  %s13771_s11 = inlined_call_operand.vmem [shape: bf16[400,128], index: 11, kind: input, shape index: {}]   ;;  %s13772_s12 = inlined_call_operand.vmem [shape: f32[1,128], index: 12, kind: input, shape index: {}]   ;;  %s13773_s13 = inlined_call_operand.vmem [shape: bf16[128,128], index: 13, kind: input, shape index: {}]   ;;  %s13774_s14 = inlined_call_operand.vmem [shape: f32[1,128], index: 14, kind: input, shape index: {}]   ;;  %s13775_s15 = inlined_call_operand.hbm [shape: f32[2,128], index: 15, kind: output, shape index: {}]  }
   0x1   :  { %v7506_v0 = vld [vmem:[%s13761_s1 + $0x1b8] sm:$0xff]  ;;  %v7509_v1 = vld [vmem:[%s13761_s1 + $0x1d0] sm:$0xff]  ;;  %v7507_v2 = vld [vmem:[%s13761_s1 + $0x1c0] sm:$0xff]  ;;  %8270 = vmatprep.subr.bf16.mxu1 %v13793_v3 }
   0x2   :  { %v8234_v4 = vpack.c.bf16 %v7509_v1, %v7506_v0  ;;  %v7510_v5 = vld [vmem:[%s13761_s1 + $0x1d8] sm:$0xff]  ;;  %v7505_v6 = vld [vmem:[%s13761_s1 + $0x1b0] sm:$0xff]  ;;  %v7508_v7 = vld [vmem:[%s13761_s1 + $0x1c8] sm:$0xff] }
   0x3   :  { %v8271_v8 = vpack.c.bf16 %v7510_v5, %v7507_v2  ;;  %v8236_v9 = vpack.c.bf16 %v7508_v7, %v7505_v6  ;;  %v7512_v10 = vld [vmem:[%s13761_s1 + $0x1e8] sm:$0xff]  ;;  %v7515_v11 = vld [vmem:[%s13761_s1 + $0x200] sm:$0xff]  ;;  %v7513_v12 = vld [vmem:[%s13761_s1 + $0x1f0] sm:$0xff] }
   0x4   :  { %8235 = vmatprep.subr.bf16.mxu0 %v8234_v4  ;;  %v8238_v13 = vpack.c.bf16 %v7515_v11, %v7512_v10  ;;  %v7516_v14 = vld [vmem:[%s13761_s1 + $0x208] sm:$0xff]  ;;  %v7511_v15 = vld [vmem:[%s13761_s1 + $0x1e0] sm:$0xff]  ;;  %v7514_v16 = vld [vmem:[%s13761_s1 + $0x1f8] sm:$0xff] }
   0x5   :  { %8272 = vmatpush1.bf16.msra.mxu1 %v8271_v8  ;;  %8237 = vmatpush1.bf16.msra.mxu0 %v8236_v9  ;;  %v8274_v17 = vpack.c.bf16 %v7516_v14, %v7513_v12  ;;  %v8240_v18 = vpack.c.bf16 %v7514_v16, %v7511_v15  ;;  %v7518_v19 = vld [vmem:[%s13761_s1 + $0x218] sm:$0xff]  ;;  %v7521_v20 = vld [vmem:[%s13761_s1 + $0x230] sm:$0xff]  ;;  %v7519_v21 = vld [vmem:[%s13761_s1 + $0x220] sm:$0xff] }
   0x6   :  { %8273 = vmatprep.subr.bf16.mxu1 %v13793_v3  ;;  %8239 = vmatprep.subr.bf16.mxu0 %v8238_v13  ;;  %v8242_v22 = vpack.c.bf16 %v7521_v20, %v7518_v19  ;;  %v7522_v23 = vld [vmem:[%s13761_s1 + $0x238] sm:$0xff]  ;;  %v7517_v24 = vld [vmem:[%s13761_s1 + $0x210] sm:$0xff]  ;;  %v7520_v25 = vld [vmem:[%s13761_s1 + $0x228] sm:$0xff] }
   0x7   :  { %v7524_v26 = vld [vmem:[%s13761_s1 + $0x248] sm:$0xff]  ;;  %v7527_v27 = vld [vmem:[%s13761_s1 + $0x260] sm:$0xff]  ;;  %v8277_v28 = vpack.c.bf16 %v7522_v23, %v7519_v21  ;;  %v8244_v29 = vpack.c.bf16 %v7520_v25, %v7517_v24  ;;  %v7525_v30 = vld [vmem:[%s13761_s1 + $0x250] sm:$0xff] }
   0x8   :  { %v8246_v31 = vpack.c.bf16 %v7527_v27, %v7524_v26  ;;  %v7528_v32 = vld [vmem:[%s13761_s1 + $0x268] sm:$0xff]  ;;  %v7523_v33 = vld [vmem:[%s13761_s1 + $0x240] sm:$0xff]  ;;  %v7526_v34 = vld [vmem:[%s13761_s1 + $0x258] sm:$0xff] }
   0x9   :  { %8275 = vmatpush1.bf16.msra.mxu1 %v8274_v17  ;;  %8241 = vmatpush1.bf16.msra.mxu0 %v8240_v18  ;;  %v7530_v35 = vld [vmem:[%s13761_s1 + $0x278] sm:$0xff]  ;;  %v7533_v36 = vld [vmem:[%s13761_s1 + $0x290] sm:$0xff]  ;;  %v8280_v37 = vpack.c.bf16 %v7528_v32, %v7525_v30  ;;  %v8248_v38 = vpack.c.bf16 %v7526_v34, %v7523_v33  ;;  %v7531_v39 = vld [vmem:[%s13761_s1 + $0x280] sm:$0xff] }
   0xa   :  { %8276 = vmatprep.subr.bf16.mxu1 %v13793_v3  ;;  %8243 = vmatprep.subr.bf16.mxu0 %v8242_v22  ;;  %v8250_v40 = vpack.c.bf16 %v7533_v36, %v7530_v35  ;;  %v7534_v41 = vld [vmem:[%s13761_s1 + $0x298] sm:$0xff]  ;;  %v7529_v42 = vld [vmem:[%s13761_s1 + $0x270] sm:$0xff]  ;;  %v7532_v43 = vld [vmem:[%s13761_s1 + $0x288] sm:$0xff] }
   0xb   :  { %v7536_v44 = vld [vmem:[%s13761_s1 + $0x2a8] sm:$0xff]  ;;  %v7539_v45 = vld [vmem:[%s13761_s1 + $0x2c0] sm:$0xff]  ;;  %v8283_v46 = vpack.c.bf16 %v7534_v41, %v7531_v39  ;;  %v8252_v47 = vpack.c.bf16 %v7532_v43, %v7529_v42  ;;  %v7537_v48 = vld [vmem:[%s13761_s1 + $0x2b0] sm:$0xff] }
   0xc   :  { %v7540_v49 = vld [vmem:[%s13761_s1 + $0x2c8] sm:$0xff]  ;;  %v8254_v50 = vpack.c.bf16 %v7539_v45, %v7536_v44  ;;  %v7535_v51 = vld [vmem:[%s13761_s1 + $0x2a0] sm:$0xff]  ;;  %v7538_v52 = vld [vmem:[%s13761_s1 + $0x2b8] sm:$0xff] }
   0xd   :  { %8278 = vmatpush1.bf16.msra.mxu1 %v8277_v28  ;;  %8245 = vmatpush1.bf16.msra.mxu0 %v8244_v29  ;;  %v7542_v53 = vld [vmem:[%s13761_s1 + $0x2d8] sm:$0xff]  ;;  %v7545_v54 = vld [vmem:[%s13761_s1 + $0x2f0] sm:$0xff]  ;;  %v9719_v55 = vld [vmem:[%s13760_s0 + $0x8] sm:$0xff]  ;;  %v8286_v59 = vpack.c.bf16 %v7540_v49, %v7537_v48  ;;  %v8256_v60 = vpack.c.bf16 %v7538_v52, %v7535_v51 }
   0xe   :  { %8279 = vmatprep.subr.bf16.mxu1 %v13793_v3  ;;  %8247 = vmatprep.subr.bf16.mxu0 %v8246_v31  ;;  %v9724_v56 = vld [vmem:[%s13760_s0 + $0x18] sm:$0xff]  ;;  %v213_v57 = vrot.slane %v9719_v55, 1  ;;  %v7543_v61 = vld [vmem:[%s13761_s1 + $0x2e0] sm:$0xff]  ;;  %v8258_v62 = vpack.c.bf16 %v7545_v54, %v7542_v53  ;;  %v7541_v0 = vld [vmem:[%s13761_s1 + $0x2d0] sm:$0xff] }
   0xf   :  { %v214_v58 = vrot.slane %v9724_v56, 1  ;;  %v7546_v63 = vld [vmem:[%s13761_s1 + $0x2f8] sm:$0xff]  ;;  %v7544_v1 = vld [vmem:[%s13761_s1 + $0x2e8] sm:$0xff]  ;;  %v7551_v5 = vld [vmem:[%s13761_s1 + $0x320] sm:$0xff] }
  0x10   :  { %v7548_v4 = vld [vmem:[%s13761_s1 + $0x308] sm:$0xff]  ;;  %v8289_v6 = vpack.c.bf16 %v7546_v63, %v7543_v61  ;;  %v8260_v7 = vpack.c.bf16 %v7544_v1, %v7541_v0  ;;  %v7549_v8 = vld [vmem:[%s13761_s1 + $0x310] sm:$0xff]  ;;  %v7547_v11 = vld [vmem:[%s13761_s1 + $0x300] sm:$0xff] }
  0x11   :  { %8281 = vmatpush1.bf16.msra.mxu1 %v8280_v37  ;;  %8249 = vmatpush1.bf16.msra.mxu0 %v8248_v38  ;;  %v215_v2 = vsel %vm209_vm0, %v213_v57, %v214_v58  ;;  %v8262_v9 = vpack.c.bf16 %v7551_v5, %v7548_v4  ;;  %v7552_v10 = vld [vmem:[%s13761_s1 + $0x328] sm:$0xff]  ;;  %v7550_v12 = vld [vmem:[%s13761_s1 + $0x318] sm:$0xff]  ;;  %v7557_v14 = vld [vmem:[%s13761_s1 + $0x350] sm:$0xff] }
  0x12   :  { %8282 = vmatprep.subr.bf16.mxu1 %v13793_v3  ;;  %8251 = vmatprep.subr.bf16.mxu0 %v8250_v40  ;;  %v7554_v13 = vld [vmem:[%s13761_s1 + $0x338] sm:$0xff]  ;;  %v8292_v15 = vpack.c.bf16 %v7552_v10, %v7549_v8  ;;  %v8264_v16 = vpack.c.bf16 %v7550_v12, %v7547_v11  ;;  %v7555_v17 = vld [vmem:[%s13761_s1 + $0x340] sm:$0xff]  ;;  %v7553_v19 = vld [vmem:[%s13761_s1 + $0x330] sm:$0xff] }
  0x13   :  { %7571 = vmatprep.mubr.msk.f32.mxu1 %vm268_vm1, %v215_v2  ;;  %7559 = vmatprep.mubr.msk.f32.mxu0 %vm268_vm1, %v215_v2  ;;  %v7558_v18 = vld [vmem:[%s13761_s1 + $0x358] sm:$0xff]  ;;  %v8266_v20 = vpack.c.bf16 %v7557_v14, %v7554_v13  ;;  %v7556_v21 = vld [vmem:[%s13761_s1 + $0x348] sm:$0xff]  ;;  %v9787_v22 = vld [vmem:[%s13760_s0] sm:$0xff] }
  0x14   :  { %v9792_v23 = vld [vmem:[%s13760_s0 + $0x10] sm:$0xff]  ;;  %v9797_v24 = vld [vmem:[%s13760_s0 + $0x28] sm:$0xff]  ;;  %v80_v26 = vld [vmem:[%s13761_s1 + $0x20] sm:$0xff]  ;;  %v8295_v27 = vpack.c.bf16 %v7558_v18, %v7555_v17  ;;  %v8268_v28 = vpack.c.bf16 %v7556_v21, %v7553_v19  ;;  %v210_v29 = vrot.slane %v9787_v22, 1 }
  0x15   :  { %8284 = vmatpush1.bf16.msra.mxu1 %v8283_v46  ;;  %8253 = vmatpush1.bf16.msra.mxu0 %v8252_v47  ;;  %v77_v25 = vld [vmem:[%s13761_s1 + $0x8] sm:$0xff]  ;;  %v211_v30 = vrot.slane %v9792_v23, 1  ;;  %v218_v31 = vrot.slane %v9797_v24, 1  ;;  %v9812_v32 = vld [vmem:[%s13760_s0 + $0x20] sm:$0xff]  ;;  %v79_v35 = vld [vmem:[%s13761_s1 + $0x18] sm:$0xff] }
  0x16   :  { %8285 = vmatprep.subr.bf16.mxu1 %v13793_v3  ;;  %8255 = vmatprep.subr.bf16.mxu0 %v8254_v50  ;;  %v8297_v33 = vpack.c.bf16 %v80_v26, %v77_v25  ;;  %v76_v34 = vld [vmem:[%s13761_s1] sm:$0xff]  ;;  %v9823_v36 = vld [vmem:[%s13760_s0 + $0x38] sm:$0xff]  ;;  %v78_v37 = vld [vmem:[%s13761_s1 + $0x10] sm:$0xff]  ;;  %v216_v42 = vrot.slane %v9812_v32, 1 }
  0x17   :  { %v81_v38 = vld [vmem:[%s13761_s1 + $0x28] sm:$0xff]  ;;  %v83_v39 = vld [vmem:[%s13761_s1 + $0x38] sm:$0xff]  ;;  %v86_v40 = vld [vmem:[%s13761_s1 + $0x50] sm:$0xff]  ;;  %v212_v41 = vsel %vm209_vm0, %v210_v29, %v211_v30  ;;  %v219_v43 = vsel %vm209_vm0, %v214_v58, %v218_v31  ;;  %v8299_v44 = vpack.c.bf16 %v79_v35, %v76_v34  ;;  %v222_v45 = vrot.slane %v9823_v36, 1 }
  0x18   :  { %v9847_v46 = vld [vmem:[%s13760_s0 + $0x30] sm:$0xff]  ;;  %v8334_v47 = vpack.c.bf16 %v81_v38, %v78_v37  ;;  %v9852_v48 = vld [vmem:[%s13760_s0 + $0x48] sm:$0xff]  ;;  %v8301_v50 = vpack.c.bf16 %v86_v40, %v83_v39  ;;  %v84_v52 = vld [vmem:[%s13761_s1 + $0x40] sm:$0xff]  ;;  %v217_v58 = vsel %vm209_vm0, %v211_v30, %v216_v42 }
  0x19   :  { %8287 = vmatpush1.bf16.msra.mxu1 %v8286_v59  ;;  %8257 = vmatpush1.bf16.msra.mxu0 %v8256_v60  ;;  %v82_v49 = vld [vmem:[%s13761_s1 + $0x30] sm:$0xff]  ;;  %v85_v51 = vld [vmem:[%s13761_s1 + $0x48] sm:$0xff]  ;;  %v87_v53 = vld [vmem:[%s13761_s1 + $0x58] sm:$0xff]  ;;  %v220_v59 = vrot.slane %v9847_v46, 1  ;;  %v223_v60 = vsel %vm209_vm0, %v218_v31, %v222_v45  ;;  %v226_v61 = vrot.slane %v9852_v48, 1 }
  0x1a   :  { %8288 = vmatprep.subr.bf16.mxu1 %v13793_v3  ;;  %8259 = vmatprep.subr.bf16.mxu0 %v8258_v62  ;;  %v89_v54 = vld [vmem:[%s13761_s1 + $0x68] sm:$0xff]  ;;  %v92_v57 = vld [vmem:[%s13761_s1 + $0x80] sm:$0xff]  ;;  %v8303_v63 = vpack.c.bf16 %v85_v51, %v82_v49  ;;  %v8337_v0 = vpack.c.bf16 %v87_v53, %v84_v52  ;;  %v9886_v1 = vld [vmem:[%s13760_s0 + $0x58] sm:$0xff] }
  0x1b   :  { %v9881_v62 = vld [vmem:[%s13760_s0 + $0x40] sm:$0xff]  ;;  %v8305_v4 = vpack.c.bf16 %v92_v57, %v89_v54  ;;  %v91_v5 = vld [vmem:[%s13761_s1 + $0x78] sm:$0xff]  ;;  %v9904_v8 = vld [vmem:[%s13760_s0 + $0x50] sm:$0xff]  ;;  %v221_v11 = vsel %vm209_vm0, %v216_v42, %v220_v59  ;;  %v227_v18 = vsel %vm209_vm0, %v222_v45, %v226_v61  ;;  %v230_v19 = vrot.slane %v9886_v1, 1 }
  0x1c   :  { %v88_v2 = vld [vmem:[%s13761_s1 + $0x60] sm:$0xff]  ;;  %v98_v10 = vld [vmem:[%s13761_s1 + $0xb0] sm:$0xff]  ;;  %v224_v12 = vrot.slane %v9881_v62, 1  ;;  %v9919_v13 = vld [vmem:[%s13760_s0 + $0x68] sm:$0xff]  ;;  %v228_v30 = vrot.slane %v9904_v8, 1 }
  0x1d   :  { %8290 = vmatpush1.bf16.msra.mxu1 %v8289_v6  ;;  %8261 = vmatpush1.bf16.msra.mxu0 %v8260_v7  ;;  %v90_v6 = vld [vmem:[%s13761_s1 + $0x70] sm:$0xff]  ;;  %v93_v7 = vld [vmem:[%s13761_s1 + $0x88] sm:$0xff]  ;;  %v99_v17 = vld [vmem:[%s13761_s1 + $0xb8] sm:$0xff]  ;;  %v231_v38 = vsel %vm209_vm0, %v226_v61, %v230_v19  ;;  %v234_v39 = vrot.slane %v9919_v13, 1 }
  0x1e   :  { %8291 = vmatprep.subr.bf16.mxu1 %v13793_v3  ;;  %8263 = vmatprep.subr.bf16.mxu0 %v8262_v9  ;;  %v95_v9 = vld [vmem:[%s13761_s1 + $0x98] sm:$0xff]  ;;  %v94_v14 = vld [vmem:[%s13761_s1 + $0x90] sm:$0xff]  ;;  %v8340_v21 = vpack.c.bf16 %v93_v7, %v90_v6  ;;  %v101_v25 = vld [vmem:[%s13761_s1 + $0xc8] sm:$0xff]  ;;  %v225_v29 = vsel %vm209_vm0, %v220_v59, %v224_v12 }
  0x1f   :  { %v104_v26 = vld [vmem:[%s13761_s1 + $0xe0] sm:$0xff]  ;;  %v9954_v31 = vld [vmem:[%s13760_s0 + $0x78] sm:$0xff]  ;;  %v102_v35 = vld [vmem:[%s13761_s1 + $0xd0] sm:$0xff]  ;;  %v235_v57 = vsel %vm209_vm0, %v230_v19, %v234_v39 }
  0x20   :  { %v103_v34 = vld [vmem:[%s13761_s1 + $0xd8] sm:$0xff]  ;;  %v105_v37 = vld [vmem:[%s13761_s1 + $0xe8] sm:$0xff]  ;;  %v9980_v45 = vld [vmem:[%s13760_s0 + $0x70] sm:$0xff] }
  0x21   :  { %8293 = vmatpush1.bf16.msra.mxu1 %v8292_v15  ;;  %8265 = vmatpush1.bf16.msra.mxu0 %v8264_v16  ;;  %v97_v15 = vld [vmem:[%s13761_s1 + $0xa8] sm:$0xff]  ;;  %v96_v16 = vld [vmem:[%s13761_s1 + $0xa0] sm:$0xff]  ;;  %v107_v42 = vld [vmem:[%s13761_s1 + $0xf8] sm:$0xff] }
  0x22   :  { %8294 = vmatprep.subr.bf16.mxu1 %v13793_v3  ;;  %8267 = vmatprep.subr.bf16.mxu0 %v8266_v20  ;;  %v8307_v20 = vpack.c.bf16 %v91_v5, %v88_v2  ;;  %v8311_v40 = vpack.c.bf16 %v97_v15, %v94_v14  ;;  %v106_v51 = vld [vmem:[%s13761_s1 + $0xf0] sm:$0xff]  ;;  %v109_v52 = vld [vmem:[%s13761_s1 + $0x108] sm:$0xff]  ;;  %v108_v53 = vld [vmem:[%s13761_s1 + $0x100] sm:$0xff]  ;;  %v236_v5 = vrot.slane %v9980_v45, 1 }
  0x23   :  { %v111_v54 = vld [vmem:[%s13761_s1 + $0x118] sm:$0xff]  ;;  %v113_v61 = vld [vmem:[%s13761_s1 + $0x128] sm:$0xff]  ;;  %v10015_v2 = vld [vmem:[%s13760_s0 + $0x80] sm:$0xff]  ;;  %v8319_v15 = vpack.c.bf16 %v109_v52, %v106_v51 }
  0x24   :  { %v10024_v6 = vld [vmem:[%s13760_s0 + $0x98] sm:$0xff]  ;;  %v114_v7 = vld [vmem:[%s13761_s1 + $0x130] sm:$0xff]  ;;  %v129_v51 = vld [vmem:[%s13761_s1 + $0x1a8] sm:$0xff] }
  0x25   :  { %8296 = vmatpush1.bf16.msra.mxu1 %v8295_v27  ;;  %8269 = vmatpush1.bf16.msra.mxu0 %v8268_v28  ;;  %v8309_v27 = vpack.c.bf16 %v98_v10, %v95_v9  ;;  %v9945_v28 = vld [vmem:[%s13760_s0 + $0x60] sm:$0xff]  ;;  %v117_v9 = vld [vmem:[%s13761_s1 + $0x148] sm:$0xff] }
  0x26   :  { %8298 = vmatprep.subr.bf16.mxu0 %v8297_v33  ;;  %8333 = vmatprep.subr.bf16.mxu1 %v13793_v3  ;;  %v100_v33 = vld [vmem:[%s13761_s1 + $0xc0] sm:$0xff]  ;;  %v232_v49 = vrot.slane %v9945_v28, 1 }
  0x27   :  { %v8315_v59 = vpack.c.bf16 %v103_v34, %v100_v33  ;;  %v112_v10 = vld [vmem:[%s13761_s1 + $0x120] sm:$0xff]  ;;  %v121_v33 = vld [vmem:[%s13761_s1 + $0x168] sm:$0xff] }
  0x28   :  { %495 = vmatmul.mubr.f32.vlgmr.msra.gmra.mrb[0].mxu1 %v212_v41  ;;  %358 = vmatmul.mubr.f32.vlgmr.msra.gmra.mrb[0].mxu0 %v212_v41  ;;  %v8343_v41 = vpack.c.bf16 %v99_v17, %v96_v16  ;;  %v8349_v16 = vpack.c.bf16 %v111_v54, %v108_v53  ;;  %v119_v17 = vld [vmem:[%s13761_s1 + $0x158] sm:$0xff]  ;;  %v124_v52 = vld [vmem:[%s13761_s1 + $0x180] sm:$0xff] }
  0x29   :  { %7572 = vmatprep.mubr.msk.f32.mxu1 %vm268_vm1, %v219_v43  ;;  %7560 = vmatprep.mubr.msk.f32.mxu0 %vm268_vm1, %v219_v43  ;;  %v110_v43 = vld [vmem:[%s13761_s1 + $0x110] sm:$0xff]  ;;  %v127_v53 = vld [vmem:[%s13761_s1 + $0x198] sm:$0xff] }
  0x2a   :  { %8300 = vmatpush1.bf16.msra.mxu0 %v8299_v44  ;;  %8335 = vmatpush1.bf16.msra.mxu1 %v8334_v47  ;;  %v8313_v44 = vpack.c.bf16 %v104_v26, %v101_v25  ;;  %v229_v47 = vsel %vm209_vm0, %v224_v12, %v228_v30  ;;  %v240_v25 = vrot.slane %v10015_v2, 1  ;;  %v10059_v26 = vld [vmem:[%s13760_s0 + $0xa8] sm:$0xff] }
  0x2b   :  { %8302 = vmatprep.subr.bf16.mxu0 %v8301_v50  ;;  %8336 = vmatprep.subr.bf16.mxu1 %v13793_v3  ;;  %v9989_v50 = vld [vmem:[%s13760_s0 + $0x88] sm:$0xff] }
  0x2c   :  { %500 = vmatmul.mubr.f32.gmra.mrb[2].mxu1 %v217_v58  ;;  %364 = vmatmul.mubr.f32.gmra.mrb[2].mxu0 %v217_v58  ;;  %v238_v58 = vrot.slane %v9954_v31, 1  ;;  %v242_v14 = vrot.slane %v9989_v50, 1 }
  0x2d   :  { %7573 = vmatprep.mubr.msk.f32.mxu1 %vm268_vm1, %v223_v60  ;;  %7561 = vmatprep.mubr.msk.f32.mxu0 %vm268_vm1, %v223_v60  ;;  %v8346_v60 = vpack.c.bf16 %v105_v37, %v102_v35  ;;  %v246_v35 = vrot.slane %v10024_v6, 1  ;;  %v8352_v37 = vpack.c.bf16 %v117_v9, %v114_v7  ;;  %v8331_v9 = vpack.c.bf16 %v127_v53, %v124_v52 }
  0x2e   :  { %8304 = vmatpush1.bf16.msra.mxu0 %v8303_v63  ;;  %8338 = vmatpush1.bf16.msra.mxu1 %v8337_v0  ;;  %v116_v63 = vld [vmem:[%s13761_s1 + $0x140] sm:$0xff]  ;;  %v8317_v0 = vpack.c.bf16 %v110_v43, %v107_v42  ;;  %v239_v12 = vsel %vm209_vm0, %v234_v39, %v238_v58  ;;  %v243_v34 = vsel %vm209_vm0, %v238_v58, %v242_v14  ;;  %v125_v39 = vld [vmem:[%s13761_s1 + $0x188] sm:$0xff] }
  0x2f   :  { %8306 = vmatprep.subr.bf16.mxu0 %v8305_v4  ;;  %8339 = vmatprep.subr.bf16.mxu1 %v13793_v3  ;;  %v233_v4 = vsel %vm209_vm0, %v228_v30, %v232_v49  ;;  %v8321_v19 = vpack.c.bf16 %v116_v63, %v113_v61  ;;  %v118_v30 = vld [vmem:[%s13761_s1 + $0x150] sm:$0xff]  ;;  %v10085_v42 = vld [vmem:[%s13760_s0 + $0xa0] sm:$0xff]  ;;  %v241_v43 = vsel %vm209_vm0, %v236_v5, %v240_v25 }
  0x30   :  { %505 = vmatmul.mubr.f32.gmra.mrb[4].mxu1 %v221_v11  ;;  %370 = vmatmul.mubr.f32.gmra.mrb[4].mxu0 %v221_v11  ;;  %v115_v11 = vld [vmem:[%s13761_s1 + $0x138] sm:$0xff]  ;;  %v247_v54 = vsel %vm209_vm0, %v242_v14, %v246_v35  ;;  %v10114_v61 = vld [vmem:[%s13760_s0 + $0xb0] sm:$0xff] }
  0x31   :  { %7574 = vmatprep.mubr.msk.f32.mxu1 %vm268_vm1, %v227_v18  ;;  %7562 = vmatprep.mubr.msk.f32.mxu0 %vm268_vm1, %v227_v18  ;;  %v122_v18 = vld [vmem:[%s13761_s1 + $0x170] sm:$0xff] }
  0x32   :  { %8308 = vmatpush1.bf16.msra.mxu0 %v8307_v20  ;;  %8341 = vmatpush1.bf16.msra.mxu1 %v8340_v21  ;;  %v10050_v20 = vld [vmem:[%s13760_s0 + $0x90] sm:$0xff]  ;;  %v237_v21 = vsel %vm209_vm0, %v232_v49, %v236_v5 }
  0x33   :  { %8310 = vmatprep.subr.bf16.mxu0 %v8309_v27  ;;  %8342 = vmatprep.subr.bf16.mxu1 %v13793_v3  ;;  %v120_v27 = vld [vmem:[%s13761_s1 + $0x160] sm:$0xff]  ;;  %v126_v49 = vld [vmem:[%s13761_s1 + $0x190] sm:$0xff] }
  0x34   :  { %510 = vmatmul.mubr.f32.gmra.mrb[6].mxu1 %v225_v29  ;;  %376 = vmatmul.mubr.f32.gmra.mrb[6].mxu0 %v225_v29  ;;  %v123_v29 = vld [vmem:[%s13761_s1 + $0x178] sm:$0xff]  ;;  %v8358_v7 = vpack.c.bf16 %v129_v51, %v126_v49 }
  0x35   :  { %7575 = vmatprep.mubr.msk.f32.mxu1 %vm268_vm1, %v231_v38  ;;  %7563 = vmatprep.mubr.msk.f32.mxu0 %vm268_vm1, %v231_v38  ;;  %v8323_v38 = vpack.c.bf16 %v115_v11, %v112_v10  ;;  %v8355_v58 = vpack.c.bf16 %v123_v29, %v120_v27  ;;  %v252_v11 = vrot.slane %v10114_v61, 1 }
  0x36   :  { %8312 = vmatpush1.bf16.msra.mxu0 %v8311_v40  ;;  %8344 = vmatpush1.bf16.msra.mxu1 %v8343_v41  ;;  %v128_v40 = vld [vmem:[%s13761_s1 + $0x1a0] sm:$0xff]  ;;  %v8325_v41 = vpack.c.bf16 %v122_v18, %v119_v17 }
  0x37   :  { %8314 = vmatprep.subr.bf16.mxu0 %v8313_v44  ;;  %8345 = vmatprep.subr.bf16.mxu1 %v13793_v3  ;;  %v244_v44 = vrot.slane %v10050_v20, 1 }
  0x38   :  { %515 = vmatmul.mubr.f32.gmra.mrb[8].mxu1 %v229_v47  ;;  %382 = vmatmul.mubr.f32.gmra.mrb[8].mxu0 %v229_v47  ;;  %v10094_v47 = vld [vmem:[%s13760_s0 + $0xb8] sm:$0xff] }
  0x39   :  { %7576 = vmatprep.mubr.msk.f32.mxu1 %vm268_vm1, %v235_v57  ;;  %7564 = vmatprep.mubr.msk.f32.mxu0 %vm268_vm1, %v235_v57  ;;  %v250_v57 = vrot.slane %v10059_v26, 1  ;;  %v245_v63 = vsel %vm209_vm0, %v240_v25, %v244_v44  ;;  %v254_v5 = vrot.slane %v10094_v47, 1 }
  0x3a   :  { %8316 = vmatpush1.bf16.msra.mxu0 %v8315_v59  ;;  %8347 = vmatpush1.bf16.msra.mxu1 %v8346_v60  ;;  %v8327_v59 = vpack.c.bf16 %v121_v33, %v118_v30  ;;  %v8329_v60 = vpack.c.bf16 %v128_v40, %v125_v39 }
  0x3b   :  { %8318 = vmatprep.subr.bf16.mxu0 %v8317_v0  ;;  %8348 = vmatprep.subr.bf16.mxu1 %v13793_v3  ;;  %v248_v0 = vrot.slane %v10085_v42, 1 }
  0x3c   :  { %520 = vmatmul.mubr.f32.gmra.mrb[10].mxu1 %v233_v4  ;;  %388 = vmatmul.mubr.f32.gmra.mrb[10].mxu0 %v233_v4  ;;  %v251_v4 = vsel %vm209_vm0, %v246_v35, %v250_v57 }
  0x3d   :  { %7577 = vmatprep.mubr.msk.f32.mxu1 %vm268_vm1, %v239_v12  ;;  %7565 = vmatprep.mubr.msk.f32.mxu0 %vm268_vm1, %v239_v12  ;;  %v249_v10 = vsel %vm209_vm0, %v244_v44, %v248_v0  ;;  %v255_v12 = vsel %vm209_vm0, %v250_v57, %v254_v5  ;;  %v253_v14 = vsel %vm209_vm0, %v248_v0, %v252_v11 }
  0x3e   :  { %8320 = vmatpush1.bf16.msra.mxu0 %v8319_v15  ;;  %8350 = vmatpush1.bf16.msra.mxu1 %v8349_v16 }
  0x3f   :  { %8351 = vmatprep.subr.bf16.mxu1 %v13793_v3  ;;  %8322 = vmatprep.subr.bf16.mxu0 %v8321_v19 }
  0x40   :  { %525 = vmatmul.mubr.f32.gmra.mrb[12].mxu1 %v237_v21  ;;  %394 = vmatmul.mubr.f32.gmra.mrb[12].mxu0 %v237_v21 }
  0x41   :  { %7578 = vmatprep.mubr.msk.f32.mxu1 %vm268_vm1, %v243_v34  ;;  %7566 = vmatprep.mubr.msk.f32.mxu0 %vm268_vm1, %v243_v34 }
  0x42   :  { %8353 = vmatpush1.bf16.msra.mxu1 %v8352_v37  ;;  %8324 = vmatpush1.bf16.msra.mxu0 %v8323_v38 }
  0x43   :  { %8354 = vmatprep.subr.bf16.mxu1 %v13793_v3  ;;  %8326 = vmatprep.subr.bf16.mxu0 %v8325_v41 }
  0x44   :  { %530 = vmatmul.mubr.f32.gmra.mrb[14].mxu1 %v241_v43  ;;  %400 = vmatmul.mubr.f32.gmra.mrb[14].mxu0 %v241_v43 }
  0x45   :  { %7579 = vmatprep.mubr.msk.f32.mxu1 %vm268_vm1, %v247_v54  ;;  %7567 = vmatprep.mubr.msk.f32.mxu0 %vm268_vm1, %v247_v54 }
  0x46   :  { %8356 = vmatpush1.bf16.msra.mxu1 %v8355_v58  ;;  %8328 = vmatpush1.bf16.msra.mxu0 %v8327_v59 }
  0x47   :  { %8357 = vmatprep.subr.bf16.mxu1 %v13793_v3  ;;  %8330 = vmatprep.subr.bf16.mxu0 %v8329_v60 }
  0x48   :  { %535 = vmatmul.mubr.f32.gmra.mrb[16].mxu1 %v245_v63  ;;  %406 = vmatmul.mubr.f32.gmra.mrb[16].mxu0 %v245_v63 }
  0x49   :  { %7580 = vmatprep.mubr.msk.f32.mxu1 %vm268_vm1, %v251_v4  ;;  %7568 = vmatprep.mubr.msk.f32.mxu0 %vm268_vm1, %v251_v4 }
  0x4a   :  { %8359 = vmatpush1.bf16.msra.mxu1 %v8358_v7  ;;  %8332 = vmatpush1.bf16.msra.mxu0 %v8331_v9 }
  0x4c   :  { %540 = vmatmul.mubr.f32.gmra.mrb[18].mxu1 %v249_v10  ;;  %412 = vmatmul.mubr.f32.gmra.mrb[18].mxu0 %v249_v10 }
  0x4d   :  { %7581 = vmatprep.mubr.msk.f32.mxu1 %vm268_vm1, %v255_v12  ;;  %7569 = vmatprep.mubr.msk.f32.mxu0 %vm268_vm1, %v255_v12 }
  0x50   :  { %545 = vmatmul.mubr.f32.gmra.mrb[20].mxu1 %v253_v14  ;;  %418 = vmatmul.mubr.f32.gmra.mrb[20].mxu0 %v253_v14 }
  0x51   :  { %7582 = vmatprep.mubr.msk.f32.mxu1 %vm268_vm1, %v254_v5  ;;  %7570 = vmatprep.mubr.msk.f32.mxu0 %vm268_vm1, %v254_v5 }
  0x54   :  { %550 = vmatmul.mubr.f32.gmra.mrb[22].mxu1 %v252_v11  ;;  %424 = vmatmul.mubr.f32.gmra.mrb[22].mxu0 %v252_v11 }
  0x55   :  { %7595 = vmatprep.mubr.msk.f32.mxu1 %vm268_vm1, %v9719_v55  ;;  %7583 = vmatprep.mubr.msk.f32.mxu0 %vm268_vm1, %v9719_v55 }
  0x58   :  { %781 = vmatmul.mubr.f32.vlgmr.msra.gmra.mrb[24].mxu1 %v9787_v22  ;;  %644 = vmatmul.mubr.f32.vlgmr.msra.gmra.mrb[0].mxu0 %v9787_v22 }
  0x59   :  { %7596 = vmatprep.mubr.msk.f32.mxu1 %vm268_vm1, %v9724_v56  ;;  %7584 = vmatprep.mubr.msk.f32.mxu0 %vm268_vm1, %v9724_v56 }
  0x5c   :  { %786 = vmatmul.mubr.f32.gmra.mrb[26].mxu1 %v9792_v23  ;;  %650 = vmatmul.mubr.f32.gmra.mrb[2].mxu0 %v9792_v23 }
  0x5d   :  { %7597 = vmatprep.mubr.msk.f32.mxu1 %vm268_vm1, %v9797_v24  ;;  %7585 = vmatprep.mubr.msk.f32.mxu0 %vm268_vm1, %v9797_v24 }
  0x60   :  { %791 = vmatmul.mubr.f32.gmra.mrb[28].mxu1 %v9812_v32  ;;  %656 = vmatmul.mubr.f32.gmra.mrb[4].mxu0 %v9812_v32 }
  0x61   :  { %7598 = vmatprep.mubr.msk.f32.mxu1 %vm268_vm1, %v9823_v36  ;;  %7586 = vmatprep.mubr.msk.f32.mxu0 %vm268_vm1, %v9823_v36 }
  0x64   :  { %796 = vmatmul.mubr.f32.gmra.mrb[30].mxu1 %v9847_v46  ;;  %662 = vmatmul.mubr.f32.gmra.mrb[6].mxu0 %v9847_v46 }
  0x65   :  { %7599 = vmatprep.mubr.msk.f32.mxu1 %vm268_vm1, %v9852_v48  ;;  %7587 = vmatprep.mubr.msk.f32.mxu0 %vm268_vm1, %v9852_v48 }
  0x68   :  { %801 = vmatmul.mubr.f32.gmra.mrb[32].mxu1 %v9881_v62  ;;  %668 = vmatmul.mubr.f32.gmra.mrb[8].mxu0 %v9881_v62 }
  0x69   :  { %7600 = vmatprep.mubr.msk.f32.mxu1 %vm268_vm1, %v9886_v1  ;;  %7588 = vmatprep.mubr.msk.f32.mxu0 %vm268_vm1, %v9886_v1 }
  0x6c   :  { %806 = vmatmul.mubr.f32.gmra.mrb[34].mxu1 %v9904_v8  ;;  %674 = vmatmul.mubr.f32.gmra.mrb[10].mxu0 %v9904_v8 }
  0x6d   :  { %7601 = vmatprep.mubr.msk.f32.mxu1 %vm268_vm1, %v9919_v13  ;;  %7589 = vmatprep.mubr.msk.f32.mxu0 %vm268_vm1, %v9919_v13 }
  0x70   :  { %811 = vmatmul.mubr.f32.gmra.mrb[36].mxu1 %v9945_v28  ;;  %680 = vmatmul.mubr.f32.gmra.mrb[12].mxu0 %v9945_v28 }
  0x71   :  { %7602 = vmatprep.mubr.msk.f32.mxu1 %vm268_vm1, %v9954_v31  ;;  %7590 = vmatprep.mubr.msk.f32.mxu0 %vm268_vm1, %v9954_v31 }
  0x74   :  { %816 = vmatmul.mubr.f32.gmra.mrb[38].mxu1 %v9980_v45  ;;  %686 = vmatmul.mubr.f32.gmra.mrb[14].mxu0 %v9980_v45 }
  0x75   :  { %7603 = vmatprep.mubr.msk.f32.mxu1 %vm268_vm1, %v9989_v50  ;;  %7591 = vmatprep.mubr.msk.f32.mxu0 %vm268_vm1, %v9989_v50 }
  0x78   :  { %821 = vmatmul.mubr.f32.gmra.mrb[40].mxu1 %v10015_v2  ;;  %692 = vmatmul.mubr.f32.gmra.mrb[16].mxu0 %v10015_v2 }
  0x79   :  { %7604 = vmatprep.mubr.msk.f32.mxu1 %vm268_vm1, %v10024_v6  ;;  %7592 = vmatprep.mubr.msk.f32.mxu0 %vm268_vm1, %v10024_v6 }
  0x7c   :  { %826 = vmatmul.mubr.f32.gmra.mrb[42].mxu1 %v10050_v20  ;;  %698 = vmatmul.mubr.f32.gmra.mrb[18].mxu0 %v10050_v20 }
  0x7d   :  { %7605 = vmatprep.mubr.msk.f32.mxu1 %vm268_vm1, %v10059_v26  ;;  %7593 = vmatprep.mubr.msk.f32.mxu0 %vm268_vm1, %v10059_v26 }
  0x80   :  { %831 = vmatmul.mubr.f32.gmra.mrb[44].mxu1 %v10085_v42  ;;  %704 = vmatmul.mubr.f32.gmra.mrb[20].mxu0 %v10085_v42 }
  0x81   :  { %7606 = vmatprep.mubr.msk.f32.mxu1 %vm268_vm1, %v10094_v47  ;;  %7594 = vmatprep.mubr.msk.f32.mxu0 %vm268_vm1, %v10094_v47 }
  0x84   :  { %836 = vmatmul.mubr.f32.gmra.mrb[46].mxu1 %v10114_v61  ;;  %710 = vmatmul.mubr.f32.gmra.mrb[22].mxu0 %v10114_v61 }
  0x85   :  { %20 = vsyncpa [#allocation3], 0  ;;  %v1319_v55 = vld [vmem:[%s13764_s4 + $0x8] sm:$0xff]  ;;  %v1321_v56 = vld [vmem:[%s13764_s4 + $0x18] sm:$0xff]  ;;  %vm1038_vm2 = vcmask 1039360   ;;  %vm1427_vm3 = vcmask 1040384  }
  0x86   :  { %v1318_v22 = vld [vmem:[%s13764_s4] sm:$0xff]  ;;  %v8360_v23 = vpack.c.bf16 %v1321_v56, %v1319_v55  ;;  %v1320_v24 = vld [vmem:[%s13764_s4 + $0x10] sm:$0xff]  ;;  %v1323_v32 = vld [vmem:[%s13764_s4 + $0x28] sm:$0xff]  ;;  %vm9505_vm4 = vmmov 1   ;;  %vm1390_vm6 = vcmask 203776   ;;  %vm1727_vm7 = vcmask 1045504  }
  0x87   :  { %v1325_v36 = vld [vmem:[%s13764_s4 + $0x38] sm:$0xff]  ;;  %v8362_v46 = vpack.c.bf16 %v1320_v24, %v1318_v22  ;;  %v1322_v62 = vld [vmem:[%s13764_s4 + $0x20] sm:$0xff]  ;;  %v1324_v1 = vld [vmem:[%s13764_s4 + $0x30] sm:$0xff]  ;;  %vm1708_vm9 = vcmask 769024   ;;  %vm1997_vm10 = vcmask 1041408   ;;  %vm1984_vm12 = vcmask 80896  }
  0x88   :  { %v8364_v48 = vpack.c.bf16 %v1325_v36, %v1323_v32  ;;  %v1327_v8 = vld [vmem:[%s13764_s4 + $0x48] sm:$0xff]  ;;  %8361 = vmatprep.subr.bf16.mxu0 %v8360_v23  ;;  %v1329_v13 = vld [vmem:[%s13764_s4 + $0x58] sm:$0xff]  ;;  %v8366_v28 = vpack.c.bf16 %v1324_v1, %v1322_v62  ;;  %v1326_v45 = vld [vmem:[%s13764_s4 + $0x40] sm:$0xff]  ;;  %vm2753_vm14 = vcmask 777216   ;;  %vm2990_vm15 = vcmask 1043456   ;;  %s9507_s25 = smov 112  }
  0x89   :  { %8363 = vmatpush1.bf16.msra.mxu0 %v8362_v46  ;;  %v8368_v31 = vpack.c.bf16 %v1329_v13, %v1327_v8  ;;  %v1328_v50 = vld [vmem:[%s13764_s4 + $0x50] sm:$0xff]  ;;  %v1331_v2 = vld [vmem:[%s13764_s4 + $0x68] sm:$0xff]  ;;  %v1333_v6 = vld [vmem:[%s13764_s4 + $0x78] sm:$0xff]  ;;  %s9508_s27 = smov 96   ;;  %s9510_s26 = smov 80  }
  0x8a   :  { %8365 = vmatprep.subr.bf16.mxu0 %v8364_v48  ;;  %v8370_v15 = vpack.c.bf16 %v1328_v50, %v1326_v45  ;;  %v8372_v16 = vpack.c.bf16 %v1333_v6, %v1331_v2  ;;  %v1330_v17 = vld [vmem:[%s13764_s4 + $0x60] sm:$0xff]  ;;  %v1332_v18 = vld [vmem:[%s13764_s4 + $0x70] sm:$0xff]  ;;  %v1335_v19 = vld [vmem:[%s13764_s4 + $0x88] sm:$0xff]  ;;  %s9514_s0 = smov 16  }
  0x8b   :  { %v1337_v20 = vld [vmem:[%s13764_s4 + $0x98] sm:$0xff]  ;;  %v8374_v21 = vpack.c.bf16 %v1332_v18, %v1330_v17  ;;  %v1334_v26 = vld [vmem:[%s13764_s4 + $0x80] sm:$0xff]  ;;  %v1336_v27 = vld [vmem:[%s13764_s4 + $0x90] sm:$0xff] }
  0x8c   :  { %v8376_v25 = vpack.c.bf16 %v1337_v20, %v1335_v19  ;;  %v1339_v29 = vld [vmem:[%s13764_s4 + $0xa8] sm:$0xff]  ;;  %v1341_v30 = vld [vmem:[%s13764_s4 + $0xb8] sm:$0xff]  ;;  %v8378_v33 = vpack.c.bf16 %v1336_v27, %v1334_v26  ;;  %v1338_v35 = vld [vmem:[%s13764_s4 + $0xa0] sm:$0xff]  ;;  %v843_v20 = vlaneseq }
  0x8d   :  { %8367 = vmatpush1.bf16.msra.mxu0 %v8366_v28  ;;  %v8380_v34 = vpack.c.bf16 %v1341_v30, %v1339_v29  ;;  %v1340_v37 = vld [vmem:[%s13764_s4 + $0xb0] sm:$0xff]  ;;  %v1343_v38 = vld [vmem:[%s13764_s4 + $0xc8] sm:$0xff]  ;;  %v1345_v39 = vld [vmem:[%s13764_s4 + $0xd8] sm:$0xff] }
  0x8e   :  { %8369 = vmatprep.subr.bf16.mxu0 %v8368_v31  ;;  %v8382_v40 = vpack.c.bf16 %v1340_v37, %v1338_v35  ;;  %v8384_v41 = vpack.c.bf16 %v1345_v39, %v1343_v38  ;;  %v1342_v42 = vld [vmem:[%s13764_s4 + $0xc0] sm:$0xff]  ;;  %v1344_v43 = vld [vmem:[%s13764_s4 + $0xd0] sm:$0xff]  ;;  %v1347_v44 = vld [vmem:[%s13764_s4 + $0xe8] sm:$0xff]  ;;  %v10369_v29 = vshrl.u32 %v843_v20, 7 }
  0x8f   :  { %v1349_v47 = vld [vmem:[%s13764_s4 + $0xf8] sm:$0xff]  ;;  %v8386_v49 = vpack.c.bf16 %v1344_v43, %v1342_v42  ;;  %v1346_v53 = vld [vmem:[%s13764_s4 + $0xe0] sm:$0xff]  ;;  %v1348_v54 = vld [vmem:[%s13764_s4 + $0xf0] sm:$0xff] }
  0x90   :  { %v8388_v52 = vpack.c.bf16 %v1349_v47, %v1347_v44  ;;  %v1351_v58 = vld [vmem:[%s13764_s4 + $0x108] sm:$0xff]  ;;  %v1353_v59 = vld [vmem:[%s13764_s4 + $0x118] sm:$0xff]  ;;  %v8390_v60 = vpack.c.bf16 %v1348_v54, %v1346_v53  ;;  %v1350_v0 = vld [vmem:[%s13764_s4 + $0x100] sm:$0xff]  ;;  %13814 = vst [vmem:[#allocation5_spill] sm:$0xff] %v10369_v29  ;;  %v10389_v42 = vsub.s32 2, %v10369_v29 }
  0x91   :  { %8371 = vmatpush1.bf16.msra.mxu0 %v8370_v15  ;;  %v8392_v63 = vpack.c.bf16 %v1353_v59, %v1351_v58  ;;  %v1352_v4 = vld [vmem:[%s13764_s4 + $0x110] sm:$0xff]  ;;  %v1355_v7 = vld [vmem:[%s13764_s4 + $0x128] sm:$0xff]  ;;  %v1357_v9 = vld [vmem:[%s13764_s4 + $0x138] sm:$0xff] }
  0x92   :  { %8373 = vmatprep.subr.bf16.mxu0 %v8372_v16  ;;  %v8394_v10 = vpack.c.bf16 %v1352_v4, %v1350_v0  ;;  %v8396_v12 = vpack.c.bf16 %v1357_v9, %v1355_v7  ;;  %v1354_v14 = vld [vmem:[%s13764_s4 + $0x120] sm:$0xff]  ;;  %v1356_v55 = vld [vmem:[%s13764_s4 + $0x130] sm:$0xff]  ;;  %v1359_v22 = vld [vmem:[%s13764_s4 + $0x148] sm:$0xff] }
  0x93   :  { %v1361_v23 = vld [vmem:[%s13764_s4 + $0x158] sm:$0xff]  ;;  %v8398_v24 = vpack.c.bf16 %v1356_v55, %v1354_v14  ;;  %v1358_v46 = vld [vmem:[%s13764_s4 + $0x140] sm:$0xff]  ;;  %v1360_v48 = vld [vmem:[%s13764_s4 + $0x150] sm:$0xff] }
  0x94   :  { %v8400_v36 = vpack.c.bf16 %v1361_v23, %v1359_v22  ;;  %v1363_v1 = vld [vmem:[%s13764_s4 + $0x168] sm:$0xff]  ;;  %v1365_v8 = vld [vmem:[%s13764_s4 + $0x178] sm:$0xff]  ;;  %v8402_v13 = vpack.c.bf16 %v1360_v48, %v1358_v46  ;;  %v1362_v26 = vld [vmem:[%s13764_s4 + $0x160] sm:$0xff] }
  0x95   :  { %8375 = vmatpush1.bf16.msra.mxu0 %v8374_v21  ;;  %v8404_v31 = vpack.c.bf16 %v1365_v8, %v1363_v1  ;;  %v1364_v27 = vld [vmem:[%s13764_s4 + $0x170] sm:$0xff]  ;;  %v1367_v35 = vld [vmem:[%s13764_s4 + $0x188] sm:$0xff]  ;;  %v1369_v37 = vld [vmem:[%s13764_s4 + $0x198] sm:$0xff] }
  0x96   :  { %8377 = vmatprep.subr.bf16.mxu0 %v8376_v25  ;;  %v8406_v30 = vpack.c.bf16 %v1364_v27, %v1362_v26  ;;  %v8408_v38 = vpack.c.bf16 %v1369_v37, %v1367_v35  ;;  %v1366_v39 = vld [vmem:[%s13764_s4 + $0x180] sm:$0xff]  ;;  %v1371_v53 = vld [vmem:[%s13764_s4 + $0x1a8] sm:$0xff]  ;;  %v1373_v54 = vld [vmem:[%s13764_s4 + $0x1b8] sm:$0xff] }
  0x97   :  { %v841_v47 = vld [vmem:[%s13762_s2] sm:$0x7]  ;;  %v1372_v59 = vld [vmem:[%s13764_s4 + $0x1b0] sm:$0xff]  ;;  %v1375_v14 = vld [vmem:[%s13764_s4 + $0x1c8] sm:$0xff]  ;;  %s9503_s2 = smov 127  }
  0x98   :  { %v1370_v58 = vld [vmem:[%s13764_s4 + $0x1a0] sm:$0xff]  ;;  %v1377_v55 = vld [vmem:[%s13764_s4 + $0x1d8] sm:$0xff]  ;;  %v1380_v20 = vld [vmem:[%s13764_s4 + $0x1f0] sm:$0xff] }
  0x99   :  { %8379 = vmatpush1.bf16.msra.mxu0 %v8378_v33  ;;  %v8414_v0 = vpack.c.bf16 %v1372_v59, %v1370_v58  ;;  %v1374_v22 = vld [vmem:[%s13764_s4 + $0x1c0] sm:$0xff]  ;;  %vm10770_vm5 = vmpackc.low %vm1427_vm3, %vm9505_vm4 }
  0x9a   :  { %8381 = vmatprep.subr.bf16.mxu0 %v8380_v34  ;;  %vm8455_vm8 = vmpackc.low %vm1727_vm7, %vm9505_vm4  ;;  %vm6435_vm7 = vcmask 654336  }
  0x9b   :  { %vm11134_vm11 = vmpackc.low %vm1997_vm10, %vm9505_vm4 }
  0x9c   :  { %vm8677_vm13 = vmpackc.low %vm209_vm0, %vm9505_vm4 }
  0x9d   :  { %8383 = vmatpush1.bf16.msra.mxu0 %v8382_v40  ;;  %v1368_v40 = vld [vmem:[%s13764_s4 + $0x190] sm:$0xff] }
  0x9e   :  { %8385 = vmatprep.subr.bf16.mxu0 %v8384_v41  ;;  %v10386_v41 = vsub.s32 0, %v10369_v29  ;;  %v8410_v43 = vpack.c.bf16 %v1368_v40, %v1366_v39 }
  0xa1   :  { %8387 = vmatpush1.bf16.msra.mxu0 %v8386_v49  ;;  %v10397_v49 = vsub.s32 1, %v10369_v29 }
  0xa2   :  { %8389 = vmatprep.subr.bf16.mxu0 %v8388_v52 }
  0xa3   :  { %13815 = vst [vmem:[#allocation6_spill] sm:$0xff] %v10397_v49  ;;  %v10418_v7 = vrot.slane %v841_v47, %v10397_v49  ;;  %v1386_v49 = vld [vmem:[%s13764_s4 + $0x220] sm:$0xff] }
  0xa5   :  { %8391 = vmatpush1.bf16.msra.mxu0 %v8390_v60  ;;  %v10412_v60 = vrot.slane %v841_v47, %v10386_v41 }
  0xa6   :  { %8393 = vmatprep.subr.bf16.mxu0 %v8392_v63  ;;  %v10415_v63 = vrot.slane %v841_v47, %v10389_v42 }
  0xa9   :  { %8395 = vmatpush1.bf16.msra.mxu0 %v8394_v10 }
  0xaa   :  { %8397 = vmatprep.subr.bf16.mxu0 %v8396_v12 }
  0xad   :  { %8399 = vmatpush1.bf16.msra.mxu0 %v8398_v24 }
  0xae   :  { %8401 = vmatprep.subr.bf16.mxu0 %v8400_v36 }
  0xb1   :  { %8403 = vmatpush1.bf16.msra.mxu0 %v8402_v13 }
  0xb2   :  { %8405 = vmatprep.subr.bf16.mxu0 %v8404_v31 }
  0xb5   :  { %8407 = vmatpush1.bf16.msra.mxu0 %v8406_v30 }
  0xb6   :  { %8409 = vmatprep.subr.bf16.mxu0 %v8408_v38 }
  0xb9   :  { %8411 = vmatpush1.bf16.msra.mxu0 %v8410_v43 }
  0xfb   :  { %v10295_v51 = vpop.f32.mrb[0].mxu1 }
  0xfc   :  { %v498_v57 = vpop.f32.mrb[1].mxu1 }
  0xfd   :  { %v8412_v57 = vpack.c.bf16 %v1373_v54, %v1371_v53 }
  0xff   :  { %v10309_v61 = vpop.f32.mrb[2].mxu1  ;;  %8413 = vmatprep.subr.bf16.mxu0 %v8412_v57 }
 0x100   :  { %v503_v5 = vpop.f32.mrb[3].mxu1  ;;  %8415 = vmatpush1.bf16.msra.mxu0 %v8414_v0 }
 0x103   :  { %v10323_v11 = vpop.f32.mrb[4].mxu1 }
 0x104   :  { %v508_v56 = vpop.f32.mrb[5].mxu1 }
 0x105   :  { %v8416_v56 = vpack.c.bf16 %v1377_v55, %v1375_v14 }
 0x107   :  { %v10337_v32 = vpop.f32.mrb[6].mxu1  ;;  %8417 = vmatprep.subr.bf16.mxu0 %v8416_v56 }
 0x108   :  { %v513_v62 = vpop.f32.mrb[7].mxu1 }
 0x10b   :  { %v10351_v28 = vpop.f32.mrb[8].mxu1 }
 0x10c   :  { %v518_v45 = vpop.f32.mrb[9].mxu1 }
 0x10f   :  { %v10353_v50 = vpop.f32.mrb[10].mxu1 }
 0x110   :  { %v523_v2 = vpop.f32.mrb[11].mxu1 }
 0x111   :  { %v1379_v2 = vld [vmem:[%s13764_s4 + $0x1e8] sm:$0xff] }
 0x113   :  { %v10355_v6 = vpop.f32.mrb[12].mxu1 }
 0x114   :  { %v528_v15 = vpop.f32.mrb[13].mxu1 }
 0x115   :  { %v1381_v15 = vld [vmem:[%s13764_s4 + $0x1f8] sm:$0xff] }
 0x117   :  { %v10357_v16 = vpop.f32.mrb[14].mxu1 }
 0x118   :  { %v533_v17 = vpop.f32.mrb[15].mxu1 }
 0x11b   :  { %v10359_v18 = vpop.f32.mrb[16].mxu1 }
 0x11c   :  { %v538_v19 = vpop.f32.mrb[17].mxu1 }
 0x11d   :  { %v1378_v19 = vld [vmem:[%s13764_s4 + $0x1e0] sm:$0xff] }
 0x11e   :  { %v8422_v27 = vpack.c.bf16 %v1380_v20, %v1378_v19 }
 0x11f   :  { %v10361_v21 = vpop.f32.mrb[18].mxu1 }
 0x120   :  { %v543_v25 = vpop.f32.mrb[19].mxu1 }
 0x123   :  { %v10371_v33 = vpop.f32.mrb[20].mxu1 }
 0x124   :  { %v548_v34 = vpop.f32.mrb[21].mxu1 }
 0x127   :  { %v10391_v44 = vpop.f32.mrb[22].mxu1 }
 0x128   :  { %v553_v52 = vpop.f32.mrb[23].mxu1 }
 0x12b   :  { %v782_v4 = vpop.f32.mrb[24].mxu1  ;;  %v645_v5 = vpop.f32.mrb[0].mxu0 }
 0x12c   :  { %v783_v9 = vadd.f32 %v782_v4, %v10295_v51  ;;  %v647_v10 = vpop.f32.mrb[1].mxu0  ;;  %v784_v12 = vpop.f32.mrb[25].mxu1  ;;  %v1376_v51 = vld [vmem:[%s13764_s4 + $0x1d0] sm:$0xff]  ;;  %v10434_v23 = vadd.f32 %v10412_v60, %v645_v5 }
 0x12d   :  { %v8418_v36 = vpack.c.bf16 %v1376_v51, %v1374_v22  ;;  %v10440_v46 = vadd.f32 %v10418_v7, %v647_v10 }
 0x12e   :  { %v10437_v24 = vadd.f32 %v10415_v63, %v783_v9  ;;  %v894_v25 = vmax.f32 %v10434_v23, 0.0 }
 0x12f   :  { %v787_v48 = vpop.f32.mrb[26].mxu1  ;;  %v651_v62 = vpop.f32.mrb[2].mxu0  ;;  %8419 = vmatpush1.bf16.msra.mxu0 %v8418_v36  ;;  %v895_v30 = vmax.f32 %v10440_v46, 0.0  ;;  %v1382_v46 = vld [vmem:[%s13764_s4 + $0x200] sm:$0xff] }
 0x130   :  { %v788_v1 = vadd.f32 %v787_v48, %v10309_v61  ;;  %v10444_v8 = vadd.f32 %v10412_v60, %v651_v62  ;;  %v653_v13 = vpop.f32.mrb[3].mxu0  ;;  %v789_v31 = vpop.f32.mrb[27].mxu1  ;;  %v13780_v45 = vmax.f32 %v10437_v24, 0.0  ;;  %v8420_v61 = vpack.c.bf16 %v1381_v15, %v1379_v2 }
 0x131   :  { %v10454_v17 = vadd.f32 %v10418_v7, %v653_v13 }
 0x132   :  { %v897_v26 = vmax.f32 %v10444_v8, 0.0  ;;  %970 = vrot.lane.b32.xlu0 %v13780_v45, %s9503_s2  ;;  %8421 = vmatprep.subr.bf16.mxu0 %v8420_v61  ;;  %v10470_v38 = vadd.f32 %v10415_v63, %v788_v1 }
 0x133   :  { %v898_v34 = vmax.f32 %v10454_v17, 0.0  ;;  %v792_v35 = vpop.f32.mrb[28].mxu1  ;;  %v657_v37 = vpop.f32.mrb[4].mxu0  ;;  %8423 = vmatpush1.bf16.msra.mxu0 %v8422_v27 }
 0x134   :  { %v793_v39 = vadd.f32 %v792_v35, %v10323_v11  ;;  %v10474_v40 = vadd.f32 %v10412_v60, %v657_v37  ;;  %v659_v43 = vpop.f32.mrb[5].mxu0  ;;  %v794_v47 = vpop.f32.mrb[29].mxu1  ;;  %v8783_v52 = vpack.i.bf16 %v897_v26, %v894_v25  ;;  %v13781_v0 = vmax.f32 %v10470_v38, 0.0  ;;  %v1383_v35 = vld [vmem:[%s13764_s4 + $0x208] sm:$0xff]  ;;  %v1385_v37 = vld [vmem:[%s13764_s4 + $0x218] sm:$0xff] }
 0x135   :  { %v8788_v53 = vpack.i.bf16 %v898_v34, %v895_v30  ;;  %v10485_v54 = vadd.f32 %v10418_v7, %v659_v43 }
 0x136   :  { %v900_v11 = vmax.f32 %v10474_v40, 0.0  ;;  %8784 = vrot.lane.b32.xlu1 %v8783_v52, %s9503_s2  ;;  %v10493_v4 = vadd.f32 %v10415_v63, %v793_v39  ;;  %v1387_v40 = vld [vmem:[%s13764_s4 + $0x228] sm:$0xff] }
 0x137   :  { %v901_v57 = vmax.f32 %v10485_v54, 0.0  ;;  %v797_v58 = vpop.f32.mrb[30].mxu1  ;;  %8789 = vrot.lane.b32.xlu0 %v8788_v53, %s9503_s2  ;;  %v663_v59 = vpop.f32.mrb[6].mxu0 }
 0x138   :  { %v798_v5 = vadd.f32 %v797_v58, %v10337_v32  ;;  %v10497_v9 = vadd.f32 %v10412_v60, %v663_v59  ;;  %v665_v10 = vpop.f32.mrb[7].mxu0  ;;  %v799_v12 = vpop.f32.mrb[31].mxu1  ;;  %v13778_v48 = vmax.f32 %v10493_v4, 0.0  ;;  %v8424_v58 = vpack.c.bf16 %v1385_v37, %v1383_v35 }
 0x139   :  { %v8793_v14 = vpack.i.bf16 %v900_v11, %v901_v57  ;;  %v10504_v55 = vadd.f32 %v10418_v7, %v665_v10 }
 0x13a   :  { %v13809_v56 = vmax.f32 %v10497_v9, 0.0  ;;  %976 = vrot.lane.b32.xlu1 %v13781_v0, %s9503_s2  ;;  %v10511_v32 = vadd.f32 %v10415_v63, %v798_v5  ;;  %8425 = vmatprep.subr.bf16.mxu0 %v8424_v58 }
 0x13b   :  { %v13808_v22 = vmax.f32 %v10504_v55, 0.0  ;;  %v802_v51 = vpop.f32.mrb[32].mxu1  ;;  %8794 = vrot.lane.b32.xlu0 %v8793_v14, %s9503_s2  ;;  %v669_v36 = vpop.f32.mrb[8].mxu0 }
 0x13c   :  { %v803_v62 = vadd.f32 %v802_v51, %v10351_v28  ;;  %v10518_v1 = vadd.f32 %v10412_v60, %v669_v36  ;;  %v671_v13 = vpop.f32.mrb[9].mxu0  ;;  %v804_v31 = vpop.f32.mrb[33].mxu1  ;;  %v13777_v28 = vmax.f32 %v10511_v32, 0.0 }
 0x13d   :  { %v8798_v2 = vpack.i.bf16 %v13809_v56, %v13808_v22  ;;  %v10525_v15 = vadd.f32 %v10418_v7, %v671_v13 }
 0x13e   :  { %v13807_v61 = vmax.f32 %v10518_v1, 0.0  ;;  %982 = vrot.lane.b32.xlu1 %v13778_v48, %s9503_s2  ;;  %v10541_v39 = vadd.f32 %v10415_v63, %v803_v62 }
 0x13f   :  { %v13806_v19 = vmax.f32 %v10525_v15, 0.0  ;;  %v807_v20 = vpop.f32.mrb[34].mxu1  ;;  %8799 = vrot.lane.b32.xlu0 %v8798_v2, %s9503_s2  ;;  %v675_v27 = vpop.f32.mrb[10].mxu0 }
 0x140   :  { %v808_v43 = vadd.f32 %v807_v20, %v10353_v50  ;;  %v10545_v47 = vadd.f32 %v10412_v60, %v675_v27  ;;  %v677_v52 = vpop.f32.mrb[11].mxu0  ;;  %v809_v53 = vpop.f32.mrb[35].mxu1  ;;  %v13776_v51 = vmax.f32 %v10541_v39, 0.0 }
 0x141   :  { %v8803_v59 = vpack.i.bf16 %v13807_v61, %v13806_v19  ;;  %v10552_v5 = vadd.f32 %v10418_v7, %v677_v52 }
 0x142   :  { %v13796_v10 = vmax.f32 %v10545_v47, 0.0  ;;  %988 = vrot.lane.b32.xlu1 %v13777_v28, %s9503_s2  ;;  %v10562_v36 = vadd.f32 %v10415_v63, %v808_v43 }
 0x143   :  { %v13790_v50 = vmax.f32 %v10552_v5, 0.0  ;;  %v812_v12 = vpop.f32.mrb[36].mxu1  ;;  %8804 = vrot.lane.b32.xlu0 %v8803_v59, %s9503_s2  ;;  %v681_v14 = vpop.f32.mrb[12].mxu0 }
 0x144   :  { %v813_v62 = vadd.f32 %v812_v12, %v10355_v6  ;;  %v10566_v13 = vadd.f32 %v10412_v60, %v681_v14  ;;  %v683_v31 = vpop.f32.mrb[13].mxu0  ;;  %v814_v2 = vpop.f32.mrb[37].mxu1  ;;  %v13779_v52 = vmax.f32 %v10562_v36, 0.0 }
 0x145   :  { %v8808_v20 = vpack.i.bf16 %v13796_v10, %v13790_v50  ;;  %v10573_v27 = vadd.f32 %v10418_v7, %v683_v31 }
 0x146   :  { %v13788_v35 = vmax.f32 %v10566_v13, 0.0  ;;  %994 = vrot.lane.b32.xlu1 %v13776_v51, %s9503_s2  ;;  %v10583_v53 = vadd.f32 %v10415_v63, %v813_v62 }
 0x147   :  { %v13785_v6 = vmax.f32 %v10573_v27, 0.0  ;;  %v817_v37 = vpop.f32.mrb[38].mxu1  ;;  %8809 = vrot.lane.b32.xlu0 %v8808_v20, %s9503_s2  ;;  %v687_v43 = vpop.f32.mrb[14].mxu0 }
 0x148   :  { %v818_v58 = vadd.f32 %v817_v37, %v10357_v16  ;;  %v10587_v59 = vadd.f32 %v10412_v60, %v687_v43  ;;  %v689_v12 = vpop.f32.mrb[15].mxu0  ;;  %v819_v14 = vpop.f32.mrb[39].mxu1  ;;  %v13784_v43 = vmax.f32 %v10583_v53, 0.0 }
 0x149   :  { %v8813_v31 = vpack.i.bf16 %v13788_v35, %v13785_v6  ;;  %v10594_v2 = vadd.f32 %v10418_v7, %v689_v12 }
 0x14a   :  { %v13783_v20 = vmax.f32 %v10587_v59, 0.0  ;;  %1000 = vrot.lane.b32.xlu1 %v13779_v52, %s9503_s2  ;;  %v10604_v14 = vadd.f32 %v10415_v63, %v818_v58 }
 0x14b   :  { %v13782_v16 = vmax.f32 %v10594_v2, 0.0  ;;  %v822_v62 = vpop.f32.mrb[40].mxu1  ;;  %8814 = vrot.lane.b32.xlu0 %v8813_v31, %s9503_s2  ;;  %v693_v37 = vpop.f32.mrb[16].mxu0 }
 0x14c   :  { %v823_v12 = vadd.f32 %v822_v62, %v10359_v18  ;;  %v10608_v51 = vadd.f32 %v10412_v60, %v693_v37  ;;  %v695_v28 = vpop.f32.mrb[17].mxu0  ;;  %v824_v48 = vpop.f32.mrb[41].mxu1  ;;  %v13789_v62 = vmax.f32 %v10604_v14, 0.0 }
 0x14d   :  { %v8818_v52 = vpack.i.bf16 %v13783_v20, %v13782_v16  ;;  %v10615_v31 = vadd.f32 %v10418_v7, %v695_v28 }
 0x14e   :  { %v13787_v45 = vmax.f32 %v10608_v51, 0.0  ;;  %1006 = vrot.lane.b32.xlu1 %v13784_v43, %s9503_s2  ;;  %v10625_v37 = vadd.f32 %v10415_v63, %v823_v12 }
 0x14f   :  { %v13786_v18 = vmax.f32 %v10615_v31, 0.0  ;;  %v827_v58 = vpop.f32.mrb[42].mxu1  ;;  %8819 = vrot.lane.b32.xlu0 %v8818_v52, %s9503_s2  ;;  %v699_v48 = vpop.f32.mrb[18].mxu0 }
 0x150   :  { %v828_v28 = vadd.f32 %v827_v58, %v10361_v21  ;;  %v10629_v0 = vadd.f32 %v10412_v60, %v699_v48  ;;  %v701_v16 = vpop.f32.mrb[19].mxu0  ;;  %v829_v20 = vpop.f32.mrb[43].mxu1  ;;  %v13795_v58 = vmax.f32 %v10625_v37, 0.0 }
 0x151   :  { %v8823_v43 = vpack.i.bf16 %v13787_v45, %v13786_v18  ;;  %v10636_v52 = vadd.f32 %v10418_v7, %v701_v16 }
 0x152   :  { %v13792_v6 = vmax.f32 %v10629_v0, 0.0  ;;  %1012 = vrot.lane.b32.xlu1 %v13789_v62, %s9503_s2  ;;  %v10646_v48 = vadd.f32 %v10415_v63, %v828_v28 }
 0x153   :  { %v13791_v21 = vmax.f32 %v10636_v52, 0.0  ;;  %v832_v12 = vpop.f32.mrb[44].mxu1  ;;  %8824 = vrot.lane.b32.xlu0 %v8823_v43, %s9503_s2  ;;  %v705_v20 = vpop.f32.mrb[20].mxu0 }
 0x154   :  { %v833_v16 = vadd.f32 %v832_v12, %v10371_v33  ;;  %v10650_v18 = vadd.f32 %v10412_v60, %v705_v20  ;;  %v707_v45 = vpop.f32.mrb[21].mxu0  ;;  %v834_v35 = vpop.f32.mrb[45].mxu1  ;;  %v13797_v12 = vmax.f32 %v10646_v48, 0.0 }
 0x155   :  { %v8828_v62 = vpack.i.bf16 %v13792_v6, %v13791_v21  ;;  %v10657_v43 = vadd.f32 %v10418_v7, %v707_v45 }
 0x156   :  { %v13805_v50 = vmax.f32 %v10650_v18, 0.0  ;;  %1018 = vrot.lane.b32.xlu1 %v13795_v58, %s9503_s2  ;;  %v10667_v20 = vadd.f32 %v10415_v63, %v833_v16 }
 0x157   :  { %v13804_v33 = vmax.f32 %v10657_v43, 0.0  ;;  %v837_v28 = vpop.f32.mrb[46].mxu1  ;;  %8829 = vrot.lane.b32.xlu0 %v8828_v62, %s9503_s2  ;;  %v711_v35 = vpop.f32.mrb[22].mxu0 }
 0x158   :  { %v838_v45 = vadd.f32 %v837_v28, %v10391_v44  ;;  %v10671_v21 = vadd.f32 %v10412_v60, %v711_v35  ;;  %v713_v6 = vpop.f32.mrb[23].mxu0  ;;  %v839_v3 = vpop.f32.mrb[47].mxu1 }
 0x159   :  { %v8833_v58 = vpack.i.bf16 %v13805_v50, %v13804_v33  ;;  %v10678_v62 = vadd.f32 %v10418_v7, %v713_v6  ;;  %v13798_v3 = vmax.f32 %v10667_v20, 0.0 }
 0x15a   :  { %v13800_v10 = vmax.f32 %v10671_v21, 0.0  ;;  %1024 = vrot.lane.b32.xlu1 %v13797_v12, %s9503_s2  ;;  %v10688_v60 = vadd.f32 %v10415_v63, %v838_v45 }
 0x15b   :  { %v13799_v44 = vmax.f32 %v10678_v62, 0.0  ;;  %8834 = vrot.lane.b32.xlu0 %v8833_v58, %s9503_s2  ;;  %v13802_v58 = vmov 0.0  }
 0x15c   :  { %v13801_v6 = vmax.f32 %v10688_v60, 0.0  ;;  %1798 = vmatprep.mubr.f32.mxu1 %v13802_v58 }
 0x15d   :  { %v8838_v7 = vpack.i.bf16 %v13800_v10, %v13799_v44 }
 0x15e   :  { %1030 = vrot.lane.b32.xlu1 %v13798_v3, %s9503_s2 }
 0x15f   :  { %8839 = vrot.lane.b32.xlu0 %v8838_v7, %s9503_s2 }
 0x162   :  { %1036 = vrot.lane.b32.xlu1 %v13801_v6, %s9503_s2 }
 0x1a4   :  { %v10703_v63 = vpop.permute.xlu0 %970 }
 0x1a8   :  { %v8785_v16 = vpop.permute.xlu1 %8784 }
 0x1a9   :  { %v8787_v28 = vunpack.i.h.bf16 %v8785_v16  ;;  %v8786_v35 = vunpack.i.l.bf16 %v8785_v16  ;;  %v8790_v45 = vpop.permute.xlu0 %8789 }
 0x1aa   :  { %v8792_v12 = vunpack.i.h.bf16 %v8790_v45  ;;  %v8791_v3 = vunpack.i.l.bf16 %v8790_v45 }
 0x1ac   :  { %v1041_v7 = vsel %vm1038_vm2, %v8787_v28, %v8792_v12  ;;  %v1039_v44 = vsel %vm1038_vm2, %v8786_v35, %v8791_v3  ;;  %v1040_v10 = vsel %vm1038_vm2, %v8791_v3, %v10703_v63  ;;  %v10709_v6 = vpop.permute.xlu1 %976 }
 0x1ad   :  { %v10713_v58 = vmax.f32 %v897_v26, %v1041_v7  ;;  %v1099_v16 = vmax.f32 %v894_v25, %v1039_v44  ;;  %v1042_v33 = vsel %vm1038_vm2, %v8792_v12, %v10709_v6  ;;  %v8795_v45 = vpop.permute.xlu0 %8794  ;;  %v1100_v3 = vmax.f32 %v895_v30, %v1040_v10  ;;  %v1384_v30 = vld [vmem:[%s13764_s4 + $0x210] sm:$0xff] }
 0x1ae   :  { %v1103_v28 = vmax.f32 %v898_v34, %v1042_v33  ;;  %v8797_v35 = vunpack.i.h.bf16 %v8795_v45  ;;  %v8796_v50 = vunpack.i.l.bf16 %v8795_v45 }
 0x1af   :  { %v1172_v19 = vrot.slane %v10713_v58, 1  ;;  %v1171_v8 = vrot.slane %v1099_v16, 1  ;;  %v1174_v25 = vrot.slane %v1100_v3, 1 }
 0x1b0   :  { %v1175_v26 = vrot.slane %v1103_v28, 1  ;;  %v1043_v7 = vsel %vm1038_vm2, %v8797_v35, %v8796_v50  ;;  %v10725_v23 = vpop.permute.xlu1 %982 }
 0x1b1   :  { %v10729_v12 = vmax.f32 %v900_v11, %v1043_v7  ;;  %v1044_v17 = vsel %vm1038_vm2, %v8796_v50, %v10725_v23  ;;  %v8800_v34 = vpop.permute.xlu0 %8799  ;;  %v1173_v10 = vsel %vm209_vm0, %v1171_v8, %v1172_v19  ;;  %v1389_v11 = vld [vmem:[%s13764_s4 + $0x238] sm:$0x1] }
 0x1b2   :  { %v1106_v33 = vmax.f32 %v901_v57, %v1044_v17  ;;  %v8802_v44 = vunpack.i.h.bf16 %v8800_v34  ;;  %v8801_v45 = vunpack.i.l.bf16 %v8800_v34  ;;  %v1176_v35 = vsel %vm209_vm0, %v1174_v25, %v1175_v26  ;;  %v1388_v25 = vld [vmem:[%s13764_s4 + $0x230] sm:$0x1] }
 0x1b3   :  { %v1180_v50 = vrot.slane %v10729_v12, 1  ;;  %v1277_v54 = vmax.f32 %v1100_v3, %v1176_v35  ;;  %v8426_v57 = vpack.c.bf16 %v1384_v30, %v1382_v46  ;;  %v1276_v17 = vmax.f32 %v1099_v16, %v1173_v10 }
 0x1b4   :  { %v1182_v7 = vrot.slane %v1106_v33, 1  ;;  %v10750_v8 = vpop.permute.xlu1 %988  ;;  %v1045_v61 = vsel %vm1038_vm2, %v8802_v44, %v8801_v45  ;;  %v8428_v29 = vpack.c.bf16 %v1389_v11, %v1387_v40  ;;  %v13816_v34 = vmax.f32 %v10497_v9, 0.0 }
 0x1b5   :  { %v1046_v22 = vsel %vm1038_vm2, %v8801_v45, %v10750_v8  ;;  %v8805_v56 = vpop.permute.xlu0 %8804  ;;  %v13817_v16 = vmax.f32 %v10504_v55, 0.0  ;;  %1498 = vmatprep.mubr.f32.mxu0 %v1277_v54  ;;  %v1181_v10 = vsel %vm209_vm0, %v1172_v19, %v1180_v50  ;;  %v8431_v45 = vpack.c.bf16 %v1388_v25, %v1386_v49 }
 0x1b6   :  { %v10763_v3 = vmax.f32 %v13816_v34, %v1045_v61  ;;  %v8807_v30 = vunpack.i.h.bf16 %v8805_v56  ;;  %v8806_v11 = vunpack.i.l.bf16 %v8805_v56  ;;  %1499 = vmatmul.mubr.f32.vlgmr.msra.gmra.mrb[24].mxu0 %v1276_v17  ;;  %v1183_v9 = vsel %vm209_vm0, %v1175_v26, %v1182_v7 }
 0x1b7   :  { %v1109_v46 = vmax.f32 %v13817_v16, %v1046_v22  ;;  %v1280_v22 = vmax.f32 %v1103_v28, %v1183_v9  ;;  %8427 = vmatpush1.bf16.msra.mxu0 %v8426_v57  ;;  %v1279_v34 = vmax.f32 %v10713_v58, %v1181_v10  ;;  %v13820_v56 = vmax.f32 %v10518_v1, 0.0 }
 0x1b8   :  { %v1186_v61 = vrot.slane %v10763_v3, 1  ;;  %v10776_v55 = vpop.permute.xlu1 %994  ;;  %v1047_v19 = vsel %vm1038_vm2, %v8807_v30, %v8806_v11  ;;  %8430 = vmatprep.subr.msk.bf16.mxu0 %vm10770_vm5, %v8428_v29  ;;  %v13821_v17 = vmax.f32 %v10525_v15, 0.0  ;;  %v13822_v1 = vmax.f32 %v10545_v47, 0.0 }
 0x1b9   :  { %v1188_v44 = vrot.slane %v1109_v46, 1  ;;  %v1048_v35 = vsel %vm1038_vm2, %v8806_v11, %v10776_v55  ;;  %v8810_v54 = vpop.permute.xlu0 %8809  ;;  %v1111_v26 = vmax.f32 %v13820_v56, %v1047_v19  ;;  %1504 = vmatprep.mubr.f32.mxu0 %v1280_v22  ;;  %v13823_v22 = vmov 0.0|0.0  }
 0x1ba   :  { %v1112_v16 = vmax.f32 %v13821_v17, %v1048_v35  ;;  %v8812_v28 = vunpack.i.h.bf16 %v8810_v54  ;;  %v8811_v49 = vunpack.i.l.bf16 %v8810_v54  ;;  %1505 = vmatmul.mubr.f32.gmra.mrb[26].mxu0 %v1279_v34  ;;  %v1187_v25 = vsel %vm209_vm0, %v1180_v50, %v1186_v61 }
 0x1bb   :  { %v1189_v57 = vsel %vm209_vm0, %v1182_v7, %v1188_v44  ;;  %v1192_v30 = vrot.slane %v1111_v26, 1  ;;  %8433 = vmatpush1.bf16.msk.msra.mxu0 %vm10770_vm5, %v8431_v45  ;;  %v13824_v50 = vmax.f32 %v10552_v5, 0.0  ;;  %v13825_v5 = vmax.f32 %v10566_v13, 0.0 }
 0x1bc   :  { %v1194_v11 = vrot.slane %v1112_v16, 1  ;;  %v1049_v58 = vsel %vm1038_vm2, %v8812_v28, %v8811_v49  ;;  %v10791_v10 = vpop.permute.xlu1 %1000  ;;  %v1283_v29 = vmax.f32 %v1106_v33, %v1189_v57  ;;  %8564 = vmatprep.subr.bf16.mxu0 %v13823_v22  ;;  %v1282_v33 = vmax.f32 %v10729_v12, %v1187_v25 }
 0x1bd   :  { %v10797_v15 = vmax.f32 %v13822_v1, %v1049_v58  ;;  %v1050_v9 = vsel %vm1038_vm2, %v8811_v49, %v10791_v10  ;;  %v8815_v7 = vpop.permute.xlu0 %8814  ;;  %v1193_v45 = vsel %vm209_vm0, %v1186_v61, %v1192_v30  ;;  %vm6365_vm5 = vcmask 916480  }
 0x1be   :  { %v1115_v19 = vmax.f32 %v13824_v50, %v1050_v9  ;;  %1510 = vmatprep.mubr.f32.mxu0 %v1283_v29  ;;  %v8817_v35 = vunpack.i.h.bf16 %v8815_v7  ;;  %v8816_v54 = vunpack.i.l.bf16 %v8815_v7  ;;  %v1195_v47 = vsel %vm209_vm0, %v1188_v44, %v1194_v11 }
 0x1bf   :  { %v1198_v40 = vrot.slane %v10797_v15, 1  ;;  %1511 = vmatmul.mubr.f32.gmra.mrb[28].mxu0 %v1282_v33  ;;  %v1286_v28 = vmax.f32 %v1109_v46, %v1195_v47  ;;  %v1285_v25 = vmax.f32 %v10763_v3, %v1193_v45  ;;  %v13826_v44 = vmax.f32 %v10573_v27, 0.0 }
 0x1c0   :  { %v1200_v34 = vrot.slane %v1115_v19, 1  ;;  %v1051_v56 = vsel %vm1038_vm2, %v8817_v35, %v8816_v54  ;;  %v10809_v17 = vpop.permute.xlu1 %1006  ;;  %v13827_v3 = vmax.f32 %v10587_v59, 0.0 }
 0x1c1   :  { %v10813_v49 = vmax.f32 %v13825_v5, %v1051_v56  ;;  %v1052_v12 = vsel %vm1038_vm2, %v8816_v54, %v10809_v17  ;;  %v8820_v57 = vpop.permute.xlu0 %8819  ;;  %1516 = vmatprep.mubr.f32.mxu0 %v1286_v28  ;;  %v1199_v13 = vsel %vm209_vm0, %v1192_v30, %v1198_v40 }
 0x1c2   :  { %v1118_v61 = vmax.f32 %v13826_v44, %v1052_v12  ;;  %v8822_v58 = vunpack.i.h.bf16 %v8820_v57  ;;  %v8821_v29 = vunpack.i.l.bf16 %v8820_v57  ;;  %v1201_v1 = vsel %vm209_vm0, %v1194_v11, %v1200_v34 }
 0x1c3   :  { %v1204_v46 = vrot.slane %v10813_v49, 1  ;;  %v1289_v9 = vmax.f32 %v1112_v16, %v1201_v1  ;;  %1517 = vmatmul.mubr.f32.gmra.mrb[30].mxu0 %v1285_v25  ;;  %v1288_v33 = vmax.f32 %v1111_v26, %v1199_v13  ;;  %v13828_v16 = vmax.f32 %v10594_v2, 0.0 }
 0x1c4   :  { %v1206_v7 = vrot.slane %v1118_v61, 1  ;;  %v1053_v50 = vsel %vm1038_vm2, %v8822_v58, %v8821_v29  ;;  %v10824_v35 = vpop.permute.xlu1 %1012  ;;  %v13829_v26 = vmax.f32 %v10608_v51, 0.0 }
 0x1c5   :  { %v10828_v27 = vmax.f32 %v13827_v3, %v1053_v50  ;;  %v1054_v54 = vsel %vm1038_vm2, %v8821_v29, %v10824_v35  ;;  %1522 = vmatprep.mubr.f32.mxu0 %v1289_v9  ;;  %v8825_v11 = vpop.permute.xlu0 %8824  ;;  %v1205_v59 = vsel %vm209_vm0, %v1198_v40, %v1204_v46 }
 0x1c6   :  { %v1121_v47 = vmax.f32 %v13828_v16, %v1054_v54  ;;  %v8827_v30 = vunpack.i.h.bf16 %v8825_v11  ;;  %v8826_v45 = vunpack.i.l.bf16 %v8825_v11  ;;  %v1207_v56 = vsel %vm209_vm0, %v1200_v34, %v1206_v7 }
 0x1c7   :  { %v1210_v28 = vrot.slane %v10828_v27, 1  ;;  %v1292_v5 = vmax.f32 %v1115_v19, %v1207_v56  ;;  %1523 = vmatmul.mubr.f32.gmra.mrb[32].mxu0 %v1288_v33  ;;  %v1291_v34 = vmax.f32 %v10797_v15, %v1205_v59  ;;  %v13830_v19 = vmax.f32 %v10615_v31, 0.0 }
 0x1c8   :  { %v1212_v12 = vrot.slane %v1121_v47, 1  ;;  %v1055_v57 = vsel %vm1038_vm2, %v8827_v30, %v8826_v45  ;;  %v10838_v25 = vpop.permute.xlu1 %1018  ;;  %v13831_v33 = vmax.f32 %v10629_v0, 0.0 }
 0x1c9   :  { %v1123_v44 = vmax.f32 %v13829_v26, %v1055_v57  ;;  %v1056_v2 = vsel %vm1038_vm2, %v8826_v45, %v10838_v25  ;;  %1528 = vmatprep.mubr.f32.mxu0 %v1292_v5  ;;  %v8830_v58 = vpop.permute.xlu0 %8829  ;;  %v1211_v3 = vsel %vm209_vm0, %v1204_v46, %v1210_v28 }
 0x1ca   :  { %v1124_v29 = vmax.f32 %v13830_v19, %v1056_v2  ;;  %v8832_v40 = vunpack.i.h.bf16 %v8830_v58  ;;  %v8831_v1 = vunpack.i.l.bf16 %v8830_v58  ;;  %v1213_v9 = vsel %vm209_vm0, %v1206_v7, %v1212_v12 }
 0x1cb   :  { %v1216_v13 = vrot.slane %v1123_v44, 1  ;;  %v1295_v50 = vmax.f32 %v1118_v61, %v1213_v9  ;;  %1529 = vmatmul.mubr.f32.gmra.mrb[34].mxu0 %v1291_v34  ;;  %v1294_v7 = vmax.f32 %v10813_v49, %v1211_v3  ;;  %v13832_v61 = vmax.f32 %v10636_v52, 0.0 }
 0x1cc   :  { %v1218_v51 = vrot.slane %v1124_v29, 1  ;;  %v1057_v54 = vsel %vm1038_vm2, %v8832_v40, %v8831_v1  ;;  %v10850_v11 = vpop.permute.xlu1 %1024  ;;  %v13833_v58 = vmax.f32 %v10650_v18, 0.0 }
 0x1cd   :  { %v1126_v15 = vmax.f32 %v13831_v33, %v1057_v54  ;;  %v1058_v31 = vsel %vm1038_vm2, %v8831_v1, %v10850_v11  ;;  %1534 = vmatprep.mubr.f32.mxu0 %v1295_v50  ;;  %v8835_v16 = vpop.permute.xlu0 %8834  ;;  %v1217_v57 = vsel %vm209_vm0, %v1210_v28, %v1216_v13 }
 0x1ce   :  { %v1127_v30 = vmax.f32 %v13832_v61, %v1058_v31  ;;  %v8837_v46 = vunpack.i.h.bf16 %v8835_v16  ;;  %v8836_v45 = vunpack.i.l.bf16 %v8835_v16  ;;  %v1219_v56 = vsel %vm209_vm0, %v1212_v12, %v1218_v51 }
 0x1cf   :  { %v1222_v5 = vrot.slane %v1126_v15, 1  ;;  %v1298_v59 = vmax.f32 %v1121_v47, %v1219_v56  ;;  %1535 = vmatmul.mubr.f32.gmra.mrb[36].mxu0 %v1294_v7  ;;  %v1297_v12 = vmax.f32 %v10828_v27, %v1217_v57  ;;  %v13834_v47 = vmax.f32 %v10657_v43, 0.0 }
 0x1d0   :  { %v1224_v0 = vrot.slane %v1127_v30, 1  ;;  %v1059_v26 = vsel %vm1038_vm2, %v8837_v46, %v8836_v45  ;;  %v10862_v2 = vpop.permute.xlu1 %1030  ;;  %v13835_v31 = vmax.f32 %v10671_v21, 0.0  ;;  %v13836_v16 = vmax.f32 %v10678_v62, 0.0 }
 0x1d1   :  { %v1129_v49 = vmax.f32 %v13833_v58, %v1059_v26  ;;  %v1060_v52 = vsel %vm1038_vm2, %v8836_v45, %v10862_v2  ;;  %1540 = vmatprep.mubr.f32.mxu0 %v1298_v59  ;;  %v8840_v34 = vpop.permute.xlu0 %8839  ;;  %v1223_v3 = vsel %vm209_vm0, %v1216_v13, %v1222_v5  ;;  %v13837_v59 = vmax.f32 %v10470_v38, 0.0 }
 0x1d2   :  { %v1130_v19 = vmax.f32 %v13834_v47, %v1060_v52  ;;  %v8842_v28 = vunpack.i.h.bf16 %v8840_v34  ;;  %v8841_v40 = vunpack.i.l.bf16 %v8840_v34  ;;  %v1225_v1 = vsel %vm209_vm0, %v1218_v51, %v1224_v0 }
 0x1d3   :  { %v1228_v9 = vrot.slane %v1129_v49, 1  ;;  %v1301_v50 = vmax.f32 %v1124_v29, %v1225_v1  ;;  %1541 = vmatmul.mubr.f32.gmra.mrb[38].mxu0 %v1297_v12  ;;  %v1300_v7 = vmax.f32 %v1123_v44, %v1223_v3  ;;  %v1104_v57 = vmax.f32 %v13837_v59, %v10709_v6 }
 0x1d4   :  { %v1230_v18 = vrot.slane %v1130_v19, 1  ;;  %v1061_v54 = vsel %vm1038_vm2, %v8842_v28, %v8841_v40  ;;  %v10874_v33 = vpop.permute.xlu1 %1036  ;;  %v13838_v44 = vmax.f32 %v10437_v24, 0.0  ;;  %v13840_v47 = vmax.f32 %v10511_v32, 0.0 }
 0x1d5   :  { %v1132_v27 = vmax.f32 %v13835_v31, %v1061_v54  ;;  %v1062_v43 = vsel %vm1038_vm2, %v8841_v40, %v10874_v33  ;;  %1546 = vmatprep.mubr.f32.mxu0 %v1301_v50  ;;  %v1229_v46 = vsel %vm209_vm0, %v1222_v5, %v1228_v9  ;;  %v13843_v1 = vmax.f32 %v10562_v36, 0.0 }
 0x1d6   :  { %v1133_v51 = vmax.f32 %v13836_v16, %v1062_v43  ;;  %v1231_v29 = vsel %vm209_vm0, %v1224_v0, %v1230_v18  ;;  %v1303_v56 = vmax.f32 %v1126_v15, %v1229_v46  ;;  %v1178_v0 = vrot.slane %v1104_v57, 1 }
 0x1d7   :  { %v1234_v13 = vrot.slane %v1132_v27, 1  ;;  %v1304_v61 = vmax.f32 %v1127_v30, %v1231_v29  ;;  %1547 = vmatmul.mubr.f32.gmra.mrb[40].mxu0 %v1300_v7  ;;  %v1101_v30 = vmax.f32 %v13838_v44, %v10703_v63  ;;  %v13839_v15 = vmax.f32 %v10493_v4, 0.0  ;;  %v1837_v44 = vld [vmem:[%s13765_s5 + $0x10] sm:$0xff] }
 0x1d8   :  { %v1236_v45 = vrot.slane %v1133_v51, 1  ;;  %v1110_v24 = vmax.f32 %v13840_v47, %v10750_v8  ;;  %v13841_v63 = vmov 0.0   ;;  %v13844_v3 = vmax.f32 %v10583_v53, 0.0 }
 0x1d9   :  { %1552 = vmatprep.mubr.f32.mxu0 %v1304_v61  ;;  %v1235_v62 = vsel %vm209_vm0, %v1228_v9, %v1234_v13  ;;  %v1107_v58 = vmax.f32 %v13839_v15, %v10725_v23  ;;  %v1177_v34 = vrot.slane %v1101_v30, 1  ;;  %v1309_v38 = vmax.f32 %v1132_v27, %v1234_v13  ;;  %v1846_v15 = vld [vmem:[%s13765_s5 + $0x58] sm:$0xff] }
 0x1da   :  { %v1237_v21 = vsel %vm209_vm0, %v1230_v18, %v1236_v45  ;;  %v1306_v5 = vmax.f32 %v1129_v49, %v1235_v62  ;;  %v1310_v52 = vmax.f32 %v1133_v51, %v1236_v45  ;;  %v1190_v23 = vrot.slane %v1110_v24, 1 }
 0x1db   :  { %v1307_v26 = vmax.f32 %v1130_v19, %v1237_v21  ;;  %1553 = vmatmul.mubr.f32.gmra.mrb[42].mxu0 %v1303_v56  ;;  %v1179_v6 = vsel %vm209_vm0, %v1177_v34, %v1178_v0  ;;  %v1184_v12 = vrot.slane %v1107_v58, 1  ;;  %v13842_v19 = vmax.f32 %v10541_v39, 0.0  ;;  %v1852_v34 = vld [vmem:[%s13765_s5 + $0x88] sm:$0xff] }
 0x1dc   :  { %v1278_v49 = vmax.f32 %v1101_v30, %v1179_v6  ;;  %v1116_v9 = vmax.f32 %v13843_v1, %v10791_v10  ;;  %v1119_v18 = vmax.f32 %v13844_v3, %v10809_v17  ;;  %v13845_v31 = vmax.f32 %v10604_v14, 0.0  ;;  %v1840_v30 = vld [vmem:[%s13765_s5 + $0x28] sm:$0xff]  ;;  %v1855_v6 = vld [vmem:[%s13765_s5 + $0xa0] sm:$0xff] }
 0x1dd   :  { %1558 = vmatprep.mubr.f32.mxu0 %v1307_v26  ;;  %v1185_v4 = vsel %vm209_vm0, %v1178_v0, %v1184_v12  ;;  %v1113_v28 = vmax.f32 %v13842_v19, %v10776_v55  ;;  %v1191_v32 = vsel %vm209_vm0, %v1184_v12, %v1190_v23  ;;  %v13846_v16 = vmax.f32 %v10625_v37, 0.0  ;;  %v1858_v12 = vld [vmem:[%s13765_s5 + $0xb8] sm:$0xff]  ;;  %v1879_v1 = vld [vmem:[%s13765_s5 + $0x160] sm:$0xff] }
 0x1de   :  { %v1281_v40 = vmax.f32 %v1104_v57, %v1185_v4  ;;  %v1284_v50 = vmax.f32 %v1107_v58, %v1191_v32  ;;  %v1202_v55 = vrot.slane %v1116_v9, 1  ;;  %v1208_v10 = vrot.slane %v1119_v18, 1  ;;  %v1870_v19 = vld [vmem:[%s13765_s5 + $0x118] sm:$0xff]  ;;  %v1876_v32 = vld [vmem:[%s13765_s5 + $0x148] sm:$0xff] }
 0x1df   :  { %1559 = vmatmul.mubr.f32.gmra.mrb[44].mxu0 %v1306_v5  ;;  %v1196_v8 = vrot.slane %v1113_v28, 1  ;;  %v1122_v27 = vmax.f32 %v13845_v31, %v10824_v35  ;;  %v1125_v51 = vmax.f32 %v13846_v16, %v10838_v25  ;;  %v13847_v29 = vmax.f32 %v10646_v48, 0.0  ;;  %v1843_v5 = vld [vmem:[%s13765_s5 + $0x40] sm:$0xff] }
 0x1e0   :  { %1564 = vmatprep.mubr.f32.mxu0 %v1310_v52  ;;  %v1209_v53 = vsel %vm209_vm0, %v1202_v55, %v1208_v10  ;;  %v13848_v46 = vmax.f32 %v10667_v20, 0.0  ;;  %v13849_v21 = vmax.f32 %v10688_v60, 0.0  ;;  %v8565_v0 = vpack.c.bf16 %v1840_v30, %v1837_v44  ;;  %v1849_v52 = vld [vmem:[%s13765_s5 + $0x70] sm:$0xff] }
 0x1e1   :  { %v1197_v39 = vsel %vm209_vm0, %v1190_v23, %v1196_v8  ;;  %v1203_v36 = vsel %vm209_vm0, %v1196_v8, %v1202_v55  ;;  %v1214_v17 = vrot.slane %v1122_v27, 1  ;;  %v1293_v7 = vmax.f32 %v1116_v9, %v1209_v53  ;;  %v1867_v23 = vld [vmem:[%s13765_s5 + $0x100] sm:$0xff]  ;;  %v1882_v9 = vld [vmem:[%s13765_s5 + $0x178] sm:$0xff] }
 0x1e2   :  { %v1287_v54 = vmax.f32 %v1110_v24, %v1197_v39  ;;  %v1290_v43 = vmax.f32 %v1113_v28, %v1203_v36  ;;  %v1220_v35 = vrot.slane %v1125_v51, 1  ;;  %v1128_v13 = vmax.f32 %v13847_v29, %v10850_v11  ;;  %v1861_v24 = vld [vmem:[%s13765_s5 + $0xd0] sm:$0xff] }
 0x1e3   :  { %1565 = vmatmul.mubr.f32.gmra.mrb[46].mxu0 %v1309_v38  ;;  %v1215_v14 = vsel %vm209_vm0, %v1208_v10, %v1214_v17  ;;  %v1131_v45 = vmax.f32 %v13848_v46, %v10862_v2  ;;  %v1134_v59 = vmax.f32 %v13849_v21, %v10874_v33  ;;  %v8568_v58 = vpack.c.bf16 %v1846_v15, %v1843_v5  ;;  %v7632_v15 = vld [vmem:[%s13765_s5 + $0x1c8] sm:$0xff] }
 0x1e4   :  { %1635 = vmatprep.mubr.f32.mxu0 %v13841_v63  ;;  %v1296_v61 = vmax.f32 %v1119_v18, %v1215_v14  ;;  %v1221_v37 = vsel %vm209_vm0, %v1214_v17, %v1220_v35  ;;  %v1226_v25 = vrot.slane %v1128_v13, 1  ;;  %v8571_v38 = vpack.c.bf16 %v1852_v34, %v1849_v52  ;;  %v7639_v52 = vld [vmem:[%s13765_s5 + $0x200] sm:$0xff] }
 0x1e5   :  { %v1299_v56 = vmax.f32 %v1122_v27, %v1221_v37  ;;  %v1232_v11 = vrot.slane %v1131_v45, 1  ;;  %v1238_v2 = vrot.slane %v1134_v59, 1  ;;  %v8574_v47 = vpack.c.bf16 %v1858_v12, %v1855_v6  ;;  %v1312_v34 = vld [vmem:[%s13763_s3] sm:$0xff] }
 0x1e6   :  { %v1227_v48 = vsel %vm209_vm0, %v1220_v35, %v1226_v25  ;;  %v8580_v28 = vpack.c.bf16 %v1870_v19, %v1867_v23  ;;  %v7635_v12 = vld [vmem:[%s13765_s5 + $0x1e0] sm:$0xff] }
 0x1e7   :  { %7609 = vmatmul.mubr.msk.f32.vlgmr.msra.gmra.mrb[24].mxu0 %vm1390_vm6, %v1278_v49  ;;  %v1302_v57 = vmax.f32 %v1125_v51, %v1227_v48  ;;  %v1233_v20 = vsel %vm209_vm0, %v1226_v25, %v1232_v11  ;;  %v1239_v62 = vsel %vm209_vm0, %v1232_v11, %v1238_v2  ;;  %v1311_v33 = vmax.f32 %v1134_v59, %v1238_v2  ;;  %v1864_v49 = vld [vmem:[%s13765_s5 + $0xe8] sm:$0xff] }
 0x1e8   :  { %1641 = vmatprep.mubr.f32.mxu0 %v13841_v63  ;;  %v1305_v26 = vmax.f32 %v1128_v13, %v1233_v20  ;;  %v1308_v60 = vmax.f32 %v1131_v45, %v1239_v62  ;;  %8566 = vmatpush1.bf16.msra.mxu0 %v8565_v0  ;;  %v8577_v4 = vpack.c.bf16 %v1864_v49, %v1861_v24  ;;  %v7633_v62 = vld [vmem:[%s13765_s5 + $0x1d0] sm:$0xff]  ;;  %v7642_v24 = vld [vmem:[%s13765_s5 + $0x218] sm:$0xff] }
 0x1e9   :  { %8567 = vmatprep.subr.bf16.mxu0 %v13823_v22  ;;  %v7629_v0 = vld [vmem:[%s13765_s5 + $0x1b0] sm:$0xff] }
 0x1ea   :  { %v7645_v49 = vld [vmem:[%s13765_s5 + $0x230] sm:$0xff] }
 0x1eb   :  { %7610 = vmatmul.mubr.msk.f32.gmra.mrb[26].mxu0 %vm1390_vm6, %v1281_v40  ;;  %v1873_v40 = vld [vmem:[%s13765_s5 + $0x130] sm:$0xff]  ;;  %v8468_v19 = vpack.c.bf16 %v7645_v49, %v7642_v24 }
 0x1ec   :  { %1647 = vmatprep.mubr.f32.mxu0 %v13841_v63  ;;  %8569 = vmatpush1.bf16.msra.mxu0 %v8568_v58  ;;  %v8583_v8 = vpack.c.bf16 %v1876_v32, %v1873_v40  ;;  %v7636_v58 = vld [vmem:[%s13765_s5 + $0x1e8] sm:$0xff] }
 0x1ed   :  { %8570 = vmatprep.subr.bf16.mxu0 %v13823_v22  ;;  %v8464_v6 = vpack.c.bf16 %v7639_v52, %v7636_v58  ;;  %v7644_v40 = vld [vmem:[%s13765_s5 + $0x228] sm:$0xff] }
 0x1ee   :  { %v7648_v32 = vld [vmem:[%s13765_s5 + $0x248] sm:$0xff] }
 0x1ef   :  { %7611 = vmatmul.mubr.msk.f32.gmra.mrb[28].mxu0 %vm1390_vm6, %v1284_v50  ;;  %v8586_v50 = vpack.c.bf16 %v1882_v9, %v1879_v1  ;;  %v1314_v1 = vld [vmem:[%s13763_s3 + $0x10] sm:$0xff] }
 0x1f0   :  { %1653 = vmatprep.mubr.f32.mxu0 %v13841_v63  ;;  %8572 = vmatpush1.bf16.msra.mxu0 %v8571_v38  ;;  %v8462_v38 = vpack.c.bf16 %v7632_v15, %v7629_v0 }
 0x1f1   :  { %8573 = vmatprep.subr.bf16.mxu0 %v13823_v22 }
 0x1f3   :  { %7612 = vmatmul.mubr.msk.f32.gmra.mrb[30].mxu0 %vm1390_vm6, %v1287_v54 }
 0x1f4   :  { %1659 = vmatprep.mubr.f32.mxu0 %v13841_v63  ;;  %8575 = vmatpush1.bf16.msra.mxu0 %v8574_v47  ;;  %v7638_v47 = vld [vmem:[%s13765_s5 + $0x1f8] sm:$0xff] }
 0x1f5   :  { %8576 = vmatprep.subr.bf16.mxu0 %v13823_v22  ;;  %v8466_v23 = vpack.c.bf16 %v7638_v47, %v7635_v12 }
 0x1f7   :  { %7613 = vmatmul.mubr.msk.f32.gmra.mrb[32].mxu0 %vm1390_vm6, %v1290_v43 }
 0x1f8   :  { %1665 = vmatprep.mubr.f32.mxu0 %v13841_v63  ;;  %8578 = vmatpush1.bf16.msra.mxu0 %v8577_v4  ;;  %v1313_v4 = vld [vmem:[%s13763_s3 + $0x8] sm:$0xff] }
 0x1f9   :  { %8579 = vmatprep.subr.bf16.mxu0 %v13823_v22 }
 0x1fb   :  { %7614 = vmatmul.mubr.msk.f32.gmra.mrb[34].mxu0 %vm1390_vm6, %v1293_v7 }
 0x1fc   :  { %1671 = vmatprep.mubr.f32.mxu0 %v13841_v63  ;;  %8581 = vmatpush1.bf16.msra.mxu0 %v8580_v28  ;;  %v7641_v28 = vld [vmem:[%s13765_s5 + $0x210] sm:$0xff] }
 0x1fd   :  { %8582 = vmatprep.subr.bf16.mxu0 %v13823_v22  ;;  %v8470_v9 = vpack.c.bf16 %v7644_v40, %v7641_v28  ;;  %v7637_v40 = vld [vmem:[%s13765_s5 + $0x1f0] sm:$0xff] }
 0x1ff   :  { %7615 = vmatmul.mubr.msk.f32.gmra.mrb[36].mxu0 %vm1390_vm6, %v1296_v61 }
 0x200   :  { %1677 = vmatprep.mubr.f32.mxu0 %v13841_v63  ;;  %8584 = vmatpush1.bf16.msra.mxu0 %v8583_v8  ;;  %v7651_v8 = vld [vmem:[%s13765_s5 + $0x260] sm:$0xff] }
 0x201   :  { %8585 = vmatprep.subr.bf16.mxu0 %v13823_v22 }
 0x203   :  { %7616 = vmatmul.mubr.msk.f32.gmra.mrb[38].mxu0 %vm1390_vm6, %v1299_v56 }
 0x204   :  { %1683 = vmatprep.mubr.f32.mxu0 %v13841_v63  ;;  %8587 = vmatpush1.bf16.msra.mxu0 %v8586_v50  ;;  %v8472_v50 = vpack.c.bf16 %v7651_v8, %v7648_v32  ;;  %v7640_v32 = vld [vmem:[%s13765_s5 + $0x208] sm:$0xff] }
 0x205   :  { %8588 = vmatprep.subr.bf16.mxu0 %v13823_v22 }
 0x207   :  { %7617 = vmatmul.mubr.msk.f32.gmra.mrb[40].mxu0 %vm1390_vm6, %v1302_v57 }
 0x208   :  { %1689 = vmatprep.mubr.f32.mxu0 %v13841_v63 }
 0x20b   :  { %7618 = vmatmul.mubr.msk.f32.gmra.mrb[42].mxu0 %vm1390_vm6, %v1305_v26  ;;  %v7630_v26 = vld [vmem:[%s13765_s5 + $0x1b8] sm:$0xff] }
 0x20c   :  { %1695 = vmatprep.mubr.f32.mxu0 %v13841_v63  ;;  %v8460_v5 = vpack.c.bf16 %v7633_v62, %v7630_v26  ;;  %v7674_v26 = vld [vmem:[%s13765_s5 + $0x318] sm:$0xff] }
 0x20f   :  { %7619 = vmatmul.mubr.msk.f32.gmra.mrb[44].mxu0 %vm1390_vm6, %v1308_v60 }
 0x210   :  { %1701 = vmatprep.mubr.f32.mxu0 %v13841_v63 }
 0x213   :  { %7620 = vmatmul.mubr.msk.f32.gmra.mrb[46].mxu0 %vm1390_vm6, %v1311_v33  ;;  %vm6400_vm6 = vcmask 785408  }
 0x2ba   :  { %v1637_v39 = vpop.f32.mrb[24].mxu0 }
 0x2bb   :  { %v1639_v55 = vpop.f32.mrb[25].mxu0 }
 0x2be   :  { %v1643_v3 = vpop.f32.mrb[26].mxu0 }
 0x2bf   :  { %v8436_v18 = vpack.c.bf16 %v1643_v3, %v1637_v39  ;;  %v1645_v54 = vpop.f32.mrb[27].mxu0  ;;  %v7647_v39 = vld [vmem:[%s13765_s5 + $0x240] sm:$0xff]  ;;  %v7654_v3 = vld [vmem:[%s13765_s5 + $0x278] sm:$0xff] }
 0x2c0   :  { %v8434_v36 = vpack.c.bf16 %v1645_v54, %v1639_v55  ;;  %v7650_v55 = vld [vmem:[%s13765_s5 + $0x258] sm:$0xff] }
 0x2c1   :  { %v1315_v54 = vld [vmem:[%s13763_s3 + $0x18] sm:$0xff] }
 0x2c2   :  { %v1649_v10 = vpop.f32.mrb[28].mxu0  ;;  %8435 = vmatprep.subr.bf16.mxu1 %v8434_v36  ;;  %v8474_v36 = vpack.c.bf16 %v7650_v55, %v7647_v39  ;;  %v8502_v39 = vpack.c.bf16 %v7640_v32, %v7637_v40  ;;  %v1845_v40 = vld [vmem:[%s13765_s5 + $0x50] sm:$0xff] }
 0x2c3   :  { %v1651_v31 = vpop.f32.mrb[29].mxu0  ;;  %8437 = vmatpush1.bf16.msra.mxu1 %v8436_v18  ;;  %v7657_v18 = vld [vmem:[%s13765_s5 + $0x290] sm:$0xff] }
 0x2c6   :  { %v1655_v27 = vpop.f32.mrb[30].mxu0 }
 0x2c7   :  { %v8440_v43 = vpack.c.bf16 %v1655_v27, %v1649_v10  ;;  %v1657_v53 = vpop.f32.mrb[31].mxu0  ;;  %v8476_v10 = vpack.c.bf16 %v7657_v18, %v7654_v3  ;;  %v7656_v27 = vld [vmem:[%s13765_s5 + $0x288] sm:$0xff]  ;;  %v7643_v18 = vld [vmem:[%s13765_s5 + $0x220] sm:$0xff] }
 0x2c8   :  { %v8438_v17 = vpack.c.bf16 %v1657_v53, %v1651_v31  ;;  %v7653_v31 = vld [vmem:[%s13765_s5 + $0x270] sm:$0xff]  ;;  %v7663_v53 = vld [vmem:[%s13765_s5 + $0x2c0] sm:$0xff] }
 0x2ca   :  { %v1661_v16 = vpop.f32.mrb[32].mxu0  ;;  %8439 = vmatprep.subr.bf16.mxu1 %v8438_v17  ;;  %v1316_v17 = vld [vmem:[%s13763_s3 + $0x20] sm:$0xff] }
 0x2cb   :  { %v1663_v51 = vpop.f32.mrb[33].mxu0  ;;  %8441 = vmatpush1.bf16.msra.mxu1 %v8440_v43  ;;  %v7660_v43 = vld [vmem:[%s13765_s5 + $0x2a8] sm:$0xff] }
 0x2ce   :  { %v1667_v7 = vpop.f32.mrb[34].mxu0 }
 0x2cf   :  { %v8444_v14 = vpack.c.bf16 %v1667_v7, %v1661_v16  ;;  %v1669_v35 = vpop.f32.mrb[35].mxu0  ;;  %v8478_v16 = vpack.c.bf16 %v7656_v27, %v7653_v31  ;;  %v7659_v7 = vld [vmem:[%s13765_s5 + $0x2a0] sm:$0xff] }
 0x2d0   :  { %v8442_v29 = vpack.c.bf16 %v1669_v35, %v1663_v51  ;;  %v8480_v51 = vpack.c.bf16 %v7663_v53, %v7660_v43  ;;  %v7666_v35 = vld [vmem:[%s13765_s5 + $0x2d8] sm:$0xff] }
 0x2d2   :  { %v1673_v13 = vpop.f32.mrb[36].mxu0  ;;  %8443 = vmatprep.subr.bf16.mxu1 %v8442_v29  ;;  %v7669_v29 = vld [vmem:[%s13765_s5 + $0x2f0] sm:$0xff] }
 0x2d3   :  { %v1675_v61 = vpop.f32.mrb[37].mxu0  ;;  %8445 = vmatpush1.bf16.msra.mxu1 %v8444_v14  ;;  %v7662_v14 = vld [vmem:[%s13765_s5 + $0x2b8] sm:$0xff] }
 0x2d6   :  { %v1679_v37 = vpop.f32.mrb[38].mxu0 }
 0x2d7   :  { %v8448_v25 = vpack.c.bf16 %v1679_v37, %v1673_v13  ;;  %v1681_v46 = vpop.f32.mrb[39].mxu0  ;;  %v1317_v13 = vld [vmem:[%s13763_s3 + $0x28] sm:$0x3f]  ;;  %v8484_v37 = vpack.c.bf16 %v7669_v29, %v7666_v35 }
 0x2d8   :  { %v8446_v45 = vpack.c.bf16 %v1681_v46, %v1675_v61  ;;  %v8482_v61 = vpack.c.bf16 %v7662_v14, %v7659_v7  ;;  %v7668_v46 = vld [vmem:[%s13765_s5 + $0x2e8] sm:$0xff] }
 0x2da   :  { %v1685_v56 = vpop.f32.mrb[40].mxu0  ;;  %8447 = vmatprep.subr.bf16.mxu1 %v8446_v45 }
 0x2db   :  { %v1687_v48 = vpop.f32.mrb[41].mxu0  ;;  %8449 = vmatpush1.bf16.msra.mxu1 %v8448_v25  ;;  %v7665_v25 = vld [vmem:[%s13765_s5 + $0x2d0] sm:$0xff] }
 0x2dc   :  { %v8486_v45 = vpack.c.bf16 %v7668_v46, %v7665_v25  ;;  %v7655_v25 = vld [vmem:[%s13765_s5 + $0x280] sm:$0xff]  ;;  %v7658_v46 = vld [vmem:[%s13765_s5 + $0x298] sm:$0xff] }
 0x2de   :  { %v1691_v11 = vpop.f32.mrb[42].mxu0 }
 0x2df   :  { %v8452_v21 = vpack.c.bf16 %v1691_v11, %v1685_v56  ;;  %v1693_v59 = vpop.f32.mrb[43].mxu0  ;;  %v1885_v56 = vld [vmem:[%s13765_s5 + $0x190] sm:$0xff]  ;;  %v2666_v11 = vld [vmem:[%s13768_s8 + $0x8] sm:$0xff] }
 0x2e0   :  { %v8450_v57 = vpack.c.bf16 %v1693_v59, %v1687_v48  ;;  %v1888_v48 = vld [vmem:[%s13765_s5 + $0x1a8] sm:$0x3] }
 0x2e1   :  { %v7672_v59 = vld [vmem:[%s13765_s5 + $0x308] sm:$0xff] }
 0x2e2   :  { %v1697_v20 = vpop.f32.mrb[44].mxu0  ;;  %8451 = vmatprep.subr.bf16.mxu1 %v8450_v57  ;;  %v7675_v57 = vld [vmem:[%s13765_s5 + $0x320] sm:$0xff] }
 0x2e3   :  { %v1699_v2 = vpop.f32.mrb[45].mxu0  ;;  %8453 = vmatpush1.bf16.msra.mxu1 %v8452_v21  ;;  %v8589_v21 = vpack.c.bf16 %v1888_v48, %v1885_v56 }
 0x2e5   :  { %8591 = vmatpush1.bf16.msk.msra.mxu0 %vm11134_vm11, %v8589_v21 }
 0x2e6   :  { %v1703_v60 = vpop.f32.mrb[46].mxu0 }
 0x2e7   :  { %v8457_v33 = vpack.c.bf16 %v1703_v60, %v1697_v20  ;;  %v1705_v44 = vpop.f32.mrb[47].mxu0  ;;  %v8488_v20 = vpack.c.bf16 %v7675_v57, %v7672_v59  ;;  %v7678_v60 = vld [vmem:[%s13765_s5 + $0x338] sm:$0xff]  ;;  %v8511_v59 = vpack.c.bf16 %v7658_v46, %v7655_v25  ;;  %v1859_v46 = vld [vmem:[%s13765_s5 + $0xc0] sm:$0xff] }
 0x2e8   :  { %v8454_v30 = vpack.c.bf16 %v1705_v44, %v1699_v2  ;;  %v7671_v2 = vld [vmem:[%s13765_s5 + $0x300] sm:$0xff]  ;;  %v7677_v44 = vld [vmem:[%s13765_s5 + $0x330] sm:$0xff] }
 0x2e9   :  { %v8490_v62 = vpack.c.bf16 %v7674_v26, %v7671_v2  ;;  %v7664_v2 = vld [vmem:[%s13765_s5 + $0x2c8] sm:$0xff] }
 0x2ea   :  { %8456 = vmatprep.subr.msk.bf16.mxu1 %vm8455_vm8, %v8454_v30 }
 0x2eb   :  { %8459 = vmatpush1.bf16.msk.msra.mxu1 %vm8455_vm8, %v8457_v33  ;;  %v7681_v33 = vld [vmem:[%s13765_s5 + $0x350] sm:$0x3]  ;;  %vm6469_vm8 = vcmask 523264  }
 0x2ec   :  { %8461 = vmatprep.subr.bf16.mxu1 %v8460_v5  ;;  %v8492_v30 = vpack.c.bf16 %v7681_v33, %v7678_v60  ;;  %v7680_v5 = vld [vmem:[%s13765_s5 + $0x348] sm:$0x3]  ;;  %v7670_v60 = vld [vmem:[%s13765_s5 + $0x2f8] sm:$0xff] }
 0x2ed   :  { %v8495_v0 = vpack.c.bf16 %v7680_v5, %v7677_v44  ;;  %v7673_v44 = vld [vmem:[%s13765_s5 + $0x310] sm:$0xff] }
 0x2ee   :  { %7623 = vmatmul.mubr.msk.f32.vlgmr.msra.gmra.mrb[48].mxu1 %vm1708_vm9, %v1312_v34  ;;  %v7631_v34 = vld [vmem:[%s13765_s5 + $0x1c0] sm:$0xff] }
 0x2ef   :  { %1804 = vmatprep.mubr.f32.mxu1 %v13841_v63  ;;  %8463 = vmatpush1.bf16.msra.mxu1 %v8462_v38  ;;  %v7634_v38 = vld [vmem:[%s13765_s5 + $0x1d8] sm:$0xff] }
 0x2f0   :  { %8465 = vmatprep.subr.bf16.mxu1 %v8464_v6 }
 0x2f2   :  { %7624 = vmatmul.mubr.msk.f32.gmra.mrb[50].mxu1 %vm1708_vm9, %v1313_v4 }
 0x2f3   :  { %1810 = vmatprep.mubr.f32.mxu1 %v13841_v63  ;;  %8467 = vmatpush1.bf16.msra.mxu1 %v8466_v23  ;;  %v8499_v23 = vpack.c.bf16 %v7634_v38, %v7631_v34  ;;  %v7682_v34 = vld [vmem:[%s13765_s5 + $0x358] sm:$0x3]  ;;  %v1836_v38 = vld [vmem:[%s13765_s5 + $0x8] sm:$0xff] }
 0x2f4   :  { %8469 = vmatprep.subr.bf16.mxu1 %v8468_v19 }
 0x2f6   :  { %7625 = vmatmul.mubr.msk.f32.gmra.mrb[52].mxu1 %vm1708_vm9, %v1314_v1 }
 0x2f7   :  { %1816 = vmatprep.mubr.f32.mxu1 %v13841_v63  ;;  %8471 = vmatpush1.bf16.msra.mxu1 %v8470_v9 }
 0x2f8   :  { %8473 = vmatprep.subr.bf16.mxu1 %v8472_v50 }
 0x2fa   :  { %7626 = vmatmul.mubr.msk.f32.gmra.mrb[54].mxu1 %vm1708_vm9, %v1315_v54  ;;  %v7646_v54 = vld [vmem:[%s13765_s5 + $0x238] sm:$0xff] }
 0x2fb   :  { %1822 = vmatprep.mubr.f32.mxu1 %v13841_v63  ;;  %8475 = vmatpush1.bf16.msra.mxu1 %v8474_v36  ;;  %v8505_v43 = vpack.c.bf16 %v7646_v54, %v7643_v18  ;;  %v1851_v18 = vld [vmem:[%s13765_s5 + $0x80] sm:$0xff] }
 0x2fc   :  { %8477 = vmatprep.subr.bf16.mxu1 %v8476_v10 }
 0x2fe   :  { %7627 = vmatmul.mubr.msk.f32.gmra.mrb[56].mxu1 %vm1708_vm9, %v1316_v17 }
 0x2ff   :  { %1828 = vmatprep.mubr.f32.mxu1 %v13841_v63  ;;  %8479 = vmatpush1.bf16.msra.mxu1 %v8478_v16  ;;  %v7649_v16 = vld [vmem:[%s13765_s5 + $0x250] sm:$0xff] }
 0x300   :  { %8481 = vmatprep.subr.bf16.mxu1 %v8480_v51  ;;  %v7652_v51 = vld [vmem:[%s13765_s5 + $0x268] sm:$0xff] }
 0x302   :  { %7628 = vmatmul.mubr.msk.f32.gmra.mrb[58].mxu1 %vm1708_vm9, %v1317_v13  ;;  %v8508_v13 = vpack.c.bf16 %v7652_v51, %v7649_v16  ;;  %v1854_v16 = vld [vmem:[%s13765_s5 + $0x98] sm:$0xff]  ;;  %vm6537_vm9 = vcmask 261120  }
 0x303   :  { %8483 = vmatpush1.bf16.msra.mxu1 %v8482_v61 }
 0x304   :  { %8485 = vmatprep.subr.bf16.mxu1 %v8484_v37 }
 0x307   :  { %8487 = vmatpush1.bf16.msra.mxu1 %v8486_v45 }
 0x308   :  { %8489 = vmatprep.subr.bf16.mxu1 %v8488_v20  ;;  %v7661_v20 = vld [vmem:[%s13765_s5 + $0x2b0] sm:$0xff] }
 0x309   :  { %v8514_v26 = vpack.c.bf16 %v7664_v2, %v7661_v20  ;;  %v1866_v20 = vld [vmem:[%s13765_s5 + $0xf8] sm:$0xff] }
 0x30b   :  { %8491 = vmatpush1.bf16.msra.mxu1 %v8490_v62  ;;  %v7667_v62 = vld [vmem:[%s13765_s5 + $0x2e0] sm:$0xff] }
 0x30c   :  { %8494 = vmatprep.subr.msk.bf16.mxu1 %vm11134_vm11, %v8492_v30  ;;  %v8517_v33 = vpack.c.bf16 %v7670_v60, %v7667_v62  ;;  %v7676_v30 = vld [vmem:[%s13765_s5 + $0x328] sm:$0xff] }
 0x30d   :  { %v8520_v5 = vpack.c.bf16 %v7676_v30, %v7673_v44  ;;  %v1868_v62 = vld [vmem:[%s13765_s5 + $0x108] sm:$0xff]  ;;  %v1871_v44 = vld [vmem:[%s13765_s5 + $0x120] sm:$0xff]  ;;  %v1874_v30 = vld [vmem:[%s13765_s5 + $0x138] sm:$0xff] }
 0x30e   :  { %v1872_v60 = vld [vmem:[%s13765_s5 + $0x128] sm:$0xff] }
 0x30f   :  { %8497 = vmatpush1.bf16.msk.msra.mxu1 %vm11134_vm11, %v8495_v0  ;;  %v7679_v0 = vld [vmem:[%s13765_s5 + $0x340] sm:$0xff] }
 0x310   :  { %8498 = vmatprep.subr.bf16.mxu1 %v13823_v22 }
 0x3c1   :  { %v11169_v15 = vpop.f32.mrb[48].mxu1 }
 0x3c2   :  { %v11171_v58 = vpop.f32.mrb[49].mxu1  ;;  %v1956_v6 = vrot.slane %v11169_v15, 1 }
 0x3c3   :  { %7707 = vmatprep.mubr.msk.f32.mxu0 %vm1984_vm12, %v11171_v58  ;;  %v1959_v24 = vrot.slane %v11171_v58, 1 }
 0x3c4   :  { %2390 = vmatmul.mubr.f32.vlgmr.msra.gmra.mrb[48].mxu0 %v11169_v15 }
 0x3c5   :  { %v11176_v52 = vpop.f32.mrb[50].mxu1 }
 0x3c6   :  { %v1957_v12 = vrot.slane %v11176_v52, 1  ;;  %v11186_v47 = vpop.f32.mrb[51].mxu1 }
 0x3c7   :  { %v1960_v49 = vrot.slane %v11186_v47, 1  ;;  %7708 = vmatprep.mubr.msk.f32.mxu0 %vm1984_vm12, %v11186_v47 }
 0x3c8   :  { %2395 = vmatmul.mubr.f32.gmra.mrb[50].mxu0 %v11176_v52  ;;  %v11194_v4 = vsel %vm209_vm0, %v1956_v6, %v1957_v12  ;;  %v1839_v6 = vld [vmem:[%s13765_s5 + $0x20] sm:$0xff] }
 0x3c9   :  { %v11196_v19 = vpop.f32.mrb[52].mxu1  ;;  %v11199_v28 = vsel %vm209_vm0, %v1959_v24, %v1960_v49  ;;  %v8526_v24 = vpack.c.bf16 %v1839_v6, %v1836_v38  ;;  %v1880_v38 = vld [vmem:[%s13765_s5 + $0x168] sm:$0xff] }
 0x3ca   :  { %v1962_v8 = vrot.slane %v11196_v19, 1  ;;  %v11208_v1 = vpop.f32.mrb[53].mxu1  ;;  %7685 = vmatprep.mubr.msk.f32.mxu1 %vm1984_vm12, %v11199_v28  ;;  %v1884_v6 = vld [vmem:[%s13765_s5 + $0x188] sm:$0xff] }
 0x3cb   :  { %v1964_v9 = vrot.slane %v11208_v1, 1  ;;  %2072 = vmatmul.mubr.f32.vlgmr.msra.gmra.mrb[60].mxu1 %v11194_v4  ;;  %7709 = vmatprep.mubr.msk.f32.mxu0 %vm1984_vm12, %v11208_v1 }
 0x3cc   :  { %8500 = vmatpush1.bf16.msra.mxu1 %v8499_v23  ;;  %v11217_v50 = vsel %vm209_vm0, %v1957_v12, %v1962_v8  ;;  %2400 = vmatmul.mubr.f32.gmra.mrb[52].mxu0 %v11196_v19  ;;  %v8523_v12 = vpack.c.bf16 %v7682_v34, %v7679_v0  ;;  %v1838_v23 = vld [vmem:[%s13765_s5 + $0x18] sm:$0xff]  ;;  %v1877_v34 = vld [vmem:[%s13765_s5 + $0x150] sm:$0xff] }
 0x3cd   :  { %v11220_v55 = vpop.f32.mrb[54].mxu1  ;;  %v11223_v3 = vsel %vm209_vm0, %v1960_v49, %v1964_v9  ;;  %8501 = vmatprep.subr.bf16.mxu1 %v13823_v22  ;;  %v1835_v49 = vld [vmem:[%s13765_s5] sm:$0xff] }
 0x3ce   :  { %v1966_v36 = vrot.slane %v11220_v55, 1  ;;  %v11233_v10 = vpop.f32.mrb[55].mxu1  ;;  %7686 = vmatprep.mubr.msk.f32.mxu1 %vm1984_vm12, %v11223_v3 }
 0x3cf   :  { %v1968_v31 = vrot.slane %v11233_v10, 1  ;;  %2078 = vmatmul.mubr.f32.gmra.mrb[62].mxu1 %v11217_v50  ;;  %7710 = vmatprep.mubr.msk.f32.mxu0 %vm1984_vm12, %v11233_v10 }
 0x3d0   :  { %8503 = vmatpush1.bf16.msra.mxu1 %v8502_v39  ;;  %v11242_v27 = vsel %vm209_vm0, %v1962_v8, %v1966_v36  ;;  %2405 = vmatmul.mubr.f32.gmra.mrb[54].mxu0 %v11220_v55  ;;  %v1841_v8 = vld [vmem:[%s13765_s5 + $0x30] sm:$0xff]  ;;  %v1848_v39 = vld [vmem:[%s13765_s5 + $0x68] sm:$0xff] }
 0x3d1   :  { %v11245_v53 = vpop.f32.mrb[56].mxu1  ;;  %v11248_v17 = vsel %vm209_vm0, %v1964_v9, %v1968_v31  ;;  %8504 = vmatprep.subr.bf16.mxu1 %v13823_v22  ;;  %v1844_v9 = vld [vmem:[%s13765_s5 + $0x48] sm:$0xff] }
 0x3d2   :  { %v1970_v7 = vrot.slane %v11245_v53, 1  ;;  %v11258_v14 = vpop.f32.mrb[57].mxu1  ;;  %7687 = vmatprep.mubr.msk.f32.mxu1 %vm1984_vm12, %v11248_v17  ;;  %v8532_v54 = vpack.c.bf16 %v1844_v9, %v1841_v8  ;;  %v2675_v8 = vld [vmem:[%s13768_s8 + $0x50] sm:$0xff] }
 0x3d3   :  { %v1972_v35 = vrot.slane %v11258_v14, 1  ;;  %2084 = vmatmul.mubr.f32.gmra.mrb[64].mxu1 %v11242_v27  ;;  %7711 = vmatprep.mubr.msk.f32.mxu0 %vm1984_vm12, %v11258_v14 }
 0x3d4   :  { %8506 = vmatpush1.bf16.msra.mxu1 %v8505_v43  ;;  %v11267_v29 = vsel %vm209_vm0, %v1966_v36, %v1970_v7  ;;  %2410 = vmatmul.mubr.f32.gmra.mrb[56].mxu0 %v11245_v53  ;;  %v8534_v36 = vpack.c.bf16 %v1851_v18, %v1848_v39  ;;  %v1850_v43 = vld [vmem:[%s13765_s5 + $0x78] sm:$0xff] }
 0x3d5   :  { %v11270_v61 = vpop.f32.mrb[58].mxu1  ;;  %v11273_v37 = vsel %vm209_vm0, %v1968_v31, %v1972_v35  ;;  %8507 = vmatprep.subr.bf16.mxu1 %v13823_v22  ;;  %v1847_v31 = vld [vmem:[%s13765_s5 + $0x60] sm:$0xff] }
 0x3d6   :  { %v11283_v45 = vrot.slane %v11270_v61, 1  ;;  %v11285_v56 = vpop.f32.mrb[59].mxu1  ;;  %7688 = vmatprep.mubr.msk.f32.mxu1 %vm1984_vm12, %v11273_v37 }
 0x3d7   :  { %v11290_v48 = vrot.slane %v11285_v56, 1  ;;  %2090 = vmatmul.mubr.f32.gmra.mrb[66].mxu1 %v11267_v29  ;;  %7712 = vmatprep.mubr.msk.f32.mxu0 %vm1984_vm12, %v11285_v56 }
 0x3d8   :  { %8509 = vmatpush1.bf16.msra.mxu1 %v8508_v13  ;;  %v11297_v21 = vsel %vm209_vm0, %v1970_v7, %v11283_v45  ;;  %2415 = vmatmul.mubr.f32.gmra.mrb[58].mxu0 %v11270_v61  ;;  %v1853_v7 = vld [vmem:[%s13765_s5 + $0x90] sm:$0xff]  ;;  %v1860_v13 = vld [vmem:[%s13765_s5 + $0xc8] sm:$0xff] }
 0x3d9   :  { %v11302_v57 = vsel %vm209_vm0, %v1972_v35, %v11290_v48  ;;  %8510 = vmatprep.subr.bf16.mxu1 %v13823_v22  ;;  %3061 = vmatprep.mubr.f32.mxu0 %v13841_v63  ;;  %v1856_v35 = vld [vmem:[%s13765_s5 + $0xa8] sm:$0xff] }
 0x3da   :  { %7689 = vmatprep.mubr.msk.f32.mxu1 %vm1984_vm12, %v11302_v57 }
 0x3db   :  { %2096 = vmatmul.mubr.f32.gmra.mrb[68].mxu1 %v11297_v21 }
 0x3dc   :  { %8512 = vmatpush1.bf16.msra.mxu1 %v8511_v59  ;;  %7690 = vmatprep.mubr.msk.f32.mxu1 %vm1984_vm12, %v11290_v48  ;;  %v1862_v59 = vld [vmem:[%s13765_s5 + $0xd8] sm:$0xff] }
 0x3dd   :  { %8513 = vmatprep.subr.bf16.mxu1 %v13823_v22 }
 0x3df   :  { %2102 = vmatmul.mubr.f32.gmra.mrb[70].mxu1 %v11283_v45 }
 0x3e0   :  { %8515 = vmatpush1.bf16.msra.mxu1 %v8514_v26  ;;  %7692 = vmatprep.mubr.msk.f32.mxu1 %vm1984_vm12, %v11199_v28  ;;  %v1842_v28 = vld [vmem:[%s13765_s5 + $0x38] sm:$0xff]  ;;  %v1865_v26 = vld [vmem:[%s13765_s5 + $0xf0] sm:$0xff] }
 0x3e1   :  { %8516 = vmatprep.subr.bf16.mxu1 %v13823_v22  ;;  %v8530_v32 = vpack.c.bf16 %v1845_v40, %v1842_v28  ;;  %v2676_v28 = vld [vmem:[%s13768_s8 + $0x58] sm:$0xff] }
 0x3e4   :  { %8518 = vmatpush1.bf16.msra.mxu1 %v8517_v33 }
 0x3e5   :  { %8519 = vmatprep.subr.bf16.mxu1 %v13823_v22 }
 0x3e8   :  { %8521 = vmatpush1.bf16.msra.mxu1 %v8520_v5  ;;  %v1878_v5 = vld [vmem:[%s13765_s5 + $0x158] sm:$0xff] }
 0x3e9   :  { %8522 = vmatprep.subr.bf16.mxu1 %v13823_v22  ;;  %v8528_v22 = vpack.c.bf16 %v1838_v23, %v1835_v49  ;;  %v1886_v49 = vld [vmem:[%s13765_s5 + $0x198] sm:$0x3] }
 0x3ec   :  { %8525 = vmatpush1.bf16.msk.msra.mxu1 %vm11134_vm11, %v8523_v12 }
 0x3ed   :  { %8527 = vmatprep.subr.bf16.mxu1 %v8526_v24  ;;  %v1883_v24 = vld [vmem:[%s13765_s5 + $0x180] sm:$0xff] }
 0x3ee   :  { %v8561_v23 = vpack.c.bf16 %v1886_v49, %v1883_v24  ;;  %v2691_v24 = vld [vmem:[%s13768_s8 + $0xd0] sm:$0xff] }
 0x3ef   :  { %2173 = vmatmul.mubr.f32.vlgmr.msra.gmra.mrb[72].mxu1 %v11194_v4  ;;  %v1857_v4 = vld [vmem:[%s13765_s5 + $0xb0] sm:$0xff] }
 0x3f0   :  { %7693 = vmatprep.mubr.msk.f32.mxu1 %vm1984_vm12, %v11223_v3  ;;  %8529 = vmatpush1.bf16.msra.mxu1 %v8528_v22  ;;  %v8536_v3 = vpack.c.bf16 %v1850_v43, %v1847_v31  ;;  %v8538_v51 = vpack.c.bf16 %v1857_v4, %v1854_v16 }
 0x3f1   :  { %8531 = vmatprep.subr.bf16.mxu1 %v8530_v32  ;;  %v2673_v32 = vld [vmem:[%s13768_s8 + $0x40] sm:$0xff] }
 0x3f2   :  { %v8602_v9 = vpack.c.bf16 %v2675_v8, %v2673_v32 }
 0x3f3   :  { %2178 = vmatmul.mubr.f32.gmra.mrb[74].mxu1 %v11217_v50  ;;  %v1863_v50 = vld [vmem:[%s13765_s5 + $0xe0] sm:$0xff] }
 0x3f4   :  { %7694 = vmatprep.mubr.msk.f32.mxu1 %vm1984_vm12, %v11248_v17  ;;  %8533 = vmatpush1.bf16.msra.mxu1 %v8532_v54  ;;  %v8540_v17 = vpack.c.bf16 %v1856_v35, %v1853_v7  ;;  %v8542_v25 = vpack.c.bf16 %v1863_v50, %v1860_v13  ;;  %v2678_v13 = vld [vmem:[%s13768_s8 + $0x68] sm:$0xff]  ;;  %v2680_v50 = vld [vmem:[%s13768_s8 + $0x78] sm:$0xff] }
 0x3f5   :  { %8535 = vmatprep.subr.bf16.mxu1 %v8534_v36 }
 0x3f7   :  { %2183 = vmatmul.mubr.f32.gmra.mrb[76].mxu1 %v11242_v27  ;;  %v1869_v27 = vld [vmem:[%s13765_s5 + $0x110] sm:$0xff] }
 0x3f8   :  { %7695 = vmatprep.mubr.msk.f32.mxu1 %vm1984_vm12, %v11273_v37  ;;  %8537 = vmatpush1.bf16.msra.mxu1 %v8536_v3  ;;  %v8544_v37 = vpack.c.bf16 %v1862_v59, %v1859_v46  ;;  %v8546_v2 = vpack.c.bf16 %v1869_v27, %v1866_v20  ;;  %v2679_v46 = vld [vmem:[%s13768_s8 + $0x70] sm:$0xff]  ;;  %v11547_v59 = vld [vmem:[%s13766_s6] sm:$0x7]  ;;  %v2682_v27 = vld [vmem:[%s13768_s8 + $0x88] sm:$0xff] }
 0x3f9   :  { %8539 = vmatprep.subr.bf16.mxu1 %v8538_v51 }
 0x3fb   :  { %2188 = vmatmul.mubr.f32.gmra.mrb[78].mxu1 %v11267_v29  ;;  %v1875_v29 = vld [vmem:[%s13765_s5 + $0x140] sm:$0xff] }
 0x3fc   :  { %7696 = vmatprep.mubr.msk.f32.mxu1 %vm1984_vm12, %v11302_v57  ;;  %8541 = vmatpush1.bf16.msra.mxu1 %v8540_v17  ;;  %v8548_v57 = vpack.c.bf16 %v1868_v62, %v1865_v26  ;;  %v8550_v33 = vpack.c.bf16 %v1875_v29, %v1872_v60  ;;  %v8604_v17 = vpack.c.bf16 %v2680_v50, %v2678_v13  ;;  %v2681_v62 = vld [vmem:[%s13768_s8 + $0x80] sm:$0xff]  ;;  %v2683_v60 = vld [vmem:[%s13768_s8 + $0x90] sm:$0xff] }
 0x3fd   :  { %8543 = vmatprep.subr.bf16.mxu1 %v8542_v25  ;;  %v2677_v25 = vld [vmem:[%s13768_s8 + $0x60] sm:$0xff]  ;;  %v2703_v13 = vld [vmem:[%s13768_s8 + $0x130] sm:$0xff] }
 0x3fe   :  { %v8606_v20 = vpack.c.bf16 %v2679_v46, %v2677_v25 }
 0x3ff   :  { %2193 = vmatmul.mubr.f32.gmra.mrb[80].mxu1 %v11297_v21  ;;  %v8552_v21 = vpack.c.bf16 %v1874_v30, %v1871_v44  ;;  %v2686_v30 = vld [vmem:[%s13768_s8 + $0xa8] sm:$0xff] }
 0x400   :  { %7697 = vmatprep.mubr.msk.f32.mxu1 %vm1984_vm12, %v11290_v48  ;;  %8545 = vmatpush1.bf16.msra.mxu1 %v8544_v37  ;;  %v1881_v48 = vld [vmem:[%s13765_s5 + $0x170] sm:$0xff]  ;;  %v2684_v37 = vld [vmem:[%s13768_s8 + $0x98] sm:$0xff] }
 0x401   :  { %8547 = vmatprep.subr.bf16.mxu1 %v8546_v2  ;;  %v8554_v0 = vpack.c.bf16 %v1881_v48, %v1878_v5  ;;  %v11557_v2 = vrot.slane %v11547_v59, %v10389_v42  ;;  %v8608_v26 = vpack.c.bf16 %v2684_v37, %v2682_v27  ;;  %v2688_v5 = vld [vmem:[%s13768_s8 + $0xb8] sm:$0xff]  ;;  %v2705_v37 = vld [vmem:[%s13768_s8 + $0x140] sm:$0xff] }
 0x403   :  { %2198 = vmatmul.mubr.f32.gmra.mrb[82].mxu1 %v11283_v45  ;;  %v1887_v45 = vld [vmem:[%s13765_s5 + $0x1a0] sm:$0x3] }
 0x404   :  { %8549 = vmatpush1.bf16.msra.mxu1 %v8548_v57  ;;  %7700 = vmatprep.mubr.msk.f32.mxu1 %vm1984_vm12, %v11171_v58  ;;  %v8556_v58 = vpack.c.bf16 %v1880_v38, %v1877_v34  ;;  %v8558_v12 = vpack.c.bf16 %v1887_v45, %v1884_v6  ;;  %v8610_v57 = vpack.c.bf16 %v2683_v60, %v2681_v62  ;;  %v2687_v34 = vld [vmem:[%s13768_s8 + $0xb0] sm:$0xff]  ;;  %v2690_v38 = vld [vmem:[%s13768_s8 + $0xc8] sm:$0xff] }
 0x405   :  { %8551 = vmatprep.subr.bf16.mxu1 %v8550_v33  ;;  %v2710_v60 = vld [vmem:[%s13768_s8 + $0x168] sm:$0xff] }
 0x408   :  { %8553 = vmatpush1.bf16.msra.mxu1 %v8552_v21  ;;  %v8612_v21 = vpack.c.bf16 %v2688_v5, %v2686_v30  ;;  %v2709_v30 = vld [vmem:[%s13768_s8 + $0x160] sm:$0xff]  ;;  %v2711_v5 = vld [vmem:[%s13768_s8 + $0x170] sm:$0xff] }
 0x409   :  { %8555 = vmatprep.subr.bf16.mxu1 %v8554_v0  ;;  %v2685_v0 = vld [vmem:[%s13768_s8 + $0xa0] sm:$0xff] }
 0x40a   :  { %v8614_v45 = vpack.c.bf16 %v2687_v34, %v2685_v0  ;;  %v8638_v0 = vpack.c.bf16 %v2711_v5, %v2709_v30 }
 0x40c   :  { %8557 = vmatpush1.bf16.msra.mxu1 %v8556_v58  ;;  %v2692_v58 = vld [vmem:[%s13768_s8 + $0xd8] sm:$0xff] }
 0x40d   :  { %8560 = vmatprep.subr.msk.bf16.mxu1 %vm11134_vm11, %v8558_v12  ;;  %v2689_v12 = vld [vmem:[%s13768_s8 + $0xc0] sm:$0xff] }
 0x410   :  { %8563 = vmatpush1.bf16.msk.msra.mxu1 %vm11134_vm11, %v8561_v23 }
 0x413   :  { %2289 = vmatmul.mubr.f32.vlgmr.msra.gmra.mrb[60].mxu1 %v11169_v15  ;;  %v2668_v15 = vld [vmem:[%s13768_s8 + $0x18] sm:$0xff] }
 0x414   :  { %7701 = vmatprep.mubr.msk.f32.mxu1 %vm1984_vm12, %v11186_v47  ;;  %v8592_v47 = vpack.c.bf16 %v2668_v15, %v2666_v11  ;;  %v8616_v15 = vpack.c.bf16 %v2692_v58, %v2690_v38  ;;  %v2713_v38 = vld [vmem:[%s13768_s8 + $0x180] sm:$0xff]  ;;  %v2718_v58 = vld [vmem:[%s13768_s8 + $0x1a8] sm:$0xff] }
 0x416   :  { %8593 = vmatprep.subr.bf16.mxu1 %v8592_v47  ;;  %v2696_v47 = vld [vmem:[%s13768_s8 + $0xf8] sm:$0xff] }
 0x417   :  { %2295 = vmatmul.mubr.f32.gmra.mrb[62].mxu1 %v11176_v52  ;;  %v2665_v52 = vld [vmem:[%s13768_s8] sm:$0xff] }
 0x418   :  { %7702 = vmatprep.mubr.msk.f32.mxu1 %vm1984_vm12, %v11208_v1  ;;  %v2670_v1 = vld [vmem:[%s13768_s8 + $0x28] sm:$0xff] }
 0x41b   :  { %2301 = vmatmul.mubr.f32.gmra.mrb[64].mxu1 %v11196_v19  ;;  %v2667_v19 = vld [vmem:[%s13768_s8 + $0x10] sm:$0xff] }
 0x41c   :  { %7703 = vmatprep.mubr.msk.f32.mxu1 %vm1984_vm12, %v11233_v10  ;;  %v8594_v10 = vpack.c.bf16 %v2667_v19, %v2665_v52  ;;  %v2694_v52 = vld [vmem:[%s13768_s8 + $0xe8] sm:$0xff]  ;;  %v8618_v19 = vpack.c.bf16 %v2691_v24, %v2689_v12  ;;  %v2720_v12 = vld [vmem:[%s13768_s8 + $0x1b8] sm:$0xff]  ;;  %v11694_v24 = vrot.slane %v11547_v59, %v10386_v41 }
 0x41e   :  { %8595 = vmatpush1.bf16.msra.mxu1 %v8594_v10  ;;  %v2693_v10 = vld [vmem:[%s13768_s8 + $0xe0] sm:$0xff] }
 0x41f   :  { %2307 = vmatmul.mubr.f32.gmra.mrb[66].mxu1 %v11220_v55  ;;  %v2672_v55 = vld [vmem:[%s13768_s8 + $0x38] sm:$0xff] }
 0x420   :  { %7704 = vmatprep.mubr.msk.f32.mxu1 %vm1984_vm12, %v11258_v14  ;;  %v2669_v14 = vld [vmem:[%s13768_s8 + $0x20] sm:$0xff] }
 0x423   :  { %2313 = vmatmul.mubr.f32.gmra.mrb[68].mxu1 %v11245_v53  ;;  %v8596_v53 = vpack.c.bf16 %v2672_v55, %v2670_v1  ;;  %v8620_v55 = vpack.c.bf16 %v2696_v47, %v2694_v52  ;;  %v13852_v47 = vld [vmem:[#allocation6_spill] sm:$0xff] }
 0x424   :  { %7705 = vmatprep.mubr.msk.f32.mxu1 %vm1984_vm12, %v11285_v56  ;;  %v2674_v56 = vld [vmem:[%s13768_s8 + $0x48] sm:$0xff] }
 0x425   :  { %8597 = vmatprep.subr.bf16.mxu1 %v8596_v53  ;;  %v8600_v22 = vpack.c.bf16 %v2676_v28, %v2674_v56  ;;  %v2695_v53 = vld [vmem:[%s13768_s8 + $0xf0] sm:$0xff]  ;;  %v2700_v56 = vld [vmem:[%s13768_s8 + $0x118] sm:$0xff] }
 0x426   :  { %v8622_v32 = vpack.c.bf16 %v2695_v53, %v2693_v10  ;;  %v2722_v53 = vld [vmem:[%s13768_s8 + $0x1c8] sm:$0xff] }
 0x427   :  { %2319 = vmatmul.mubr.f32.gmra.mrb[70].mxu1 %v11270_v61  ;;  %v2671_v61 = vld [vmem:[%s13768_s8 + $0x30] sm:$0xff] }
 0x428   :  { %v8598_v40 = vpack.c.bf16 %v2671_v61, %v2669_v14  ;;  %v2698_v61 = vld [vmem:[%s13768_s8 + $0x108] sm:$0xff] }
 0x429   :  { %v8624_v8 = vpack.c.bf16 %v2700_v56, %v2698_v61 }
 0x42a   :  { %8599 = vmatpush1.bf16.msra.mxu1 %v8598_v40 }
 0x42b   :  { %8601 = vmatprep.subr.bf16.mxu1 %v8600_v22 }
 0x42e   :  { %8603 = vmatpush1.bf16.msra.mxu1 %v8602_v9  ;;  %v2697_v9 = vld [vmem:[%s13768_s8 + $0x100] sm:$0xff] }
 0x42f   :  { %8605 = vmatprep.subr.bf16.mxu1 %v8604_v17  ;;  %v2706_v17 = vld [vmem:[%s13768_s8 + $0x148] sm:$0xff] }
 0x432   :  { %8607 = vmatpush1.bf16.msra.mxu1 %v8606_v20 }
 0x433   :  { %8609 = vmatprep.subr.bf16.mxu1 %v8608_v26  ;;  %v2707_v26 = vld [vmem:[%s13768_s8 + $0x150] sm:$0xff] }
 0x436   :  { %8611 = vmatpush1.bf16.msra.mxu1 %v8610_v57 }
 0x437   :  { %8613 = vmatprep.subr.bf16.mxu1 %v8612_v21  ;;  %v2714_v21 = vld [vmem:[%s13768_s8 + $0x188] sm:$0xff] }
 0x43a   :  { %8615 = vmatpush1.bf16.msra.mxu1 %v8614_v45 }
 0x43b   :  { %8617 = vmatprep.subr.bf16.mxu1 %v8616_v15  ;;  %v2719_v15 = vld [vmem:[%s13768_s8 + $0x1b0] sm:$0xff] }
 0x43e   :  { %8619 = vmatpush1.bf16.msra.mxu1 %v8618_v19  ;;  %v11704_v19 = vrot.slane %v11547_v59, %v13852_v47  ;;  %v2721_v59 = vld [vmem:[%s13768_s8 + $0x1c0] sm:$0xff] }
 0x43f   :  { %8621 = vmatprep.subr.bf16.mxu1 %v8620_v55 }
 0x442   :  { %8623 = vmatpush1.bf16.msra.mxu1 %v8622_v32 }
 0x443   :  { %8625 = vmatprep.subr.bf16.mxu1 %v8624_v8 }
 0x497   :  { %v2391_v39 = vpop.f32.mrb[48].mxu0 }
 0x498   :  { %v2393_v18 = vpop.f32.mrb[49].mxu0 }
 0x49b   :  { %v2396_v54 = vpop.f32.mrb[50].mxu0 }
 0x49c   :  { %v2398_v36 = vpop.f32.mrb[51].mxu0 }
 0x49d   :  { %v2704_v36 = vld [vmem:[%s13768_s8 + $0x138] sm:$0xff] }
 0x49f   :  { %v2401_v31 = vpop.f32.mrb[52].mxu0 }
 0x4a0   :  { %v2403_v43 = vpop.f32.mrb[53].mxu0 }
 0x4a3   :  { %v11526_v16 = vpop.f32.mrb[54].mxu0 }
 0x4a4   :  { %v2408_v4 = vpop.f32.mrb[55].mxu0 }
 0x4a7   :  { %v11528_v3 = vpop.f32.mrb[56].mxu0 }
 0x4a8   :  { %v2413_v51 = vpop.f32.mrb[57].mxu0 }
 0x4ab   :  { %v11530_v7 = vpop.f32.mrb[58].mxu0 }
 0x4ac   :  { %v2418_v35 = vpop.f32.mrb[59].mxu0 }
 0x4ad   :  { %v2701_v35 = vld [vmem:[%s13768_s8 + $0x120] sm:$0xff] }
 0x4ae   :  { %v8630_v20 = vpack.c.bf16 %v2703_v13, %v2701_v35  ;;  %v2725_v13 = vld [vmem:[%s13768_s8 + $0x1e0] sm:$0xff] }
 0x4c2   :  { %v2174_v29 = vpop.f32.mrb[72].mxu1 }
 0x4c3   :  { %v2392_v33 = vadd.f32 %v2391_v39, %v2174_v29  ;;  %v2176_v44 = vpop.f32.mrb[73].mxu1  ;;  %v2699_v39 = vld [vmem:[%s13768_s8 + $0x110] sm:$0xff] }
 0x4c4   :  { %v8626_v4 = vpack.c.bf16 %v2699_v39, %v2697_v9 }
 0x4c5   :  { %v11572_v48 = vadd.f32 %v11557_v2, %v2392_v33  ;;  %v8634_v33 = vpack.c.bf16 %v2707_v26, %v2705_v37 }
 0x4c6   :  { %v2179_v6 = vpop.f32.mrb[74].mxu1  ;;  %8627 = vmatpush1.bf16.msra.mxu1 %v8626_v4 }
 0x4c7   :  { %v2457_v49 = vmax.f32 %v11572_v48, 0.0  ;;  %v2397_v23 = vadd.f32 %v2396_v54, %v2179_v6  ;;  %v2181_v11 = vpop.f32.mrb[75].mxu1  ;;  %v2702_v54 = vld [vmem:[%s13768_s8 + $0x128] sm:$0xff]  ;;  %v2715_v6 = vld [vmem:[%s13768_s8 + $0x190] sm:$0xff] }
 0x4c8   :  { %v8628_v51 = vpack.c.bf16 %v2704_v36, %v2702_v54  ;;  %v8642_v45 = vpack.c.bf16 %v2715_v6, %v2713_v38  ;;  %v2717_v11 = vld [vmem:[%s13768_s8 + $0x1a0] sm:$0xff]  ;;  %v2726_v36 = vld [vmem:[%s13768_s8 + $0x1e8] sm:$0xff] }
 0x4c9   :  { %v11600_v1 = vadd.f32 %v11557_v2, %v2397_v23  ;;  %2495 = vrot.lane.b32.xlu1 %v2457_v49, %s9503_s2  ;;  %v8644_v23 = vpack.c.bf16 %v2720_v12, %v2718_v58  ;;  %v8646_v55 = vpack.c.bf16 %v2719_v15, %v2717_v11 }
 0x4ca   :  { %v2184_v14 = vpop.f32.mrb[76].mxu1  ;;  %8629 = vmatprep.subr.bf16.mxu1 %v8628_v51 }
 0x4cb   :  { %v2460_v28 = vmax.f32 %v11600_v1, 0.0  ;;  %v11618_v40 = vadd.f32 %v2401_v31, %v2184_v14  ;;  %v2186_v22 = vpop.f32.mrb[77].mxu1  ;;  %8631 = vmatpush1.bf16.msra.mxu1 %v8630_v20  ;;  %v2724_v14 = vld [vmem:[%s13768_s8 + $0x1d8] sm:$0xff] }
 0x4cc   :  { %v8648_v56 = vpack.c.bf16 %v2724_v14, %v2722_v53  ;;  %v2723_v22 = vld [vmem:[%s13768_s8 + $0x1d0] sm:$0xff] }
 0x4cd   :  { %2501 = vrot.lane.b32.xlu0 %v2460_v28, %s9503_s2  ;;  %v8650_v9 = vpack.c.bf16 %v2723_v22, %v2721_v59 }
 0x4ce   :  { %v2189_v18 = vpop.f32.mrb[78].mxu1 }
 0x4cf   :  { %v11636_v31 = vadd.f32 %v11526_v16, %v2189_v18  ;;  %v2191_v43 = vpop.f32.mrb[79].mxu1  ;;  %v2708_v16 = vld [vmem:[%s13768_s8 + $0x158] sm:$0xff] }
 0x4d0   :  { %v8632_v27 = vpack.c.bf16 %v2708_v16, %v2706_v17  ;;  %v2728_v43 = vld [vmem:[%s13768_s8 + $0x1f8] sm:$0xff] }
 0x4d1   :  { %v8652_v35 = vpack.c.bf16 %v2728_v43, %v2726_v36 }
 0x4d2   :  { %v2194_v50 = vpop.f32.mrb[80].mxu1  ;;  %8633 = vmatprep.subr.bf16.mxu1 %v8632_v27  ;;  %v11748_v27 = vadd.f32 %v11557_v2, %v11618_v40  ;;  %v2730_v40 = vld [vmem:[%s13768_s8 + $0x208] sm:$0xff] }
 0x4d3   :  { %v11651_v25 = vadd.f32 %v11528_v3, %v2194_v50  ;;  %v2196_v46 = vpop.f32.mrb[81].mxu1  ;;  %v2712_v3 = vld [vmem:[%s13768_s8 + $0x178] sm:$0xff]  ;;  %8635 = vmatpush1.bf16.msra.mxu1 %v8634_v33  ;;  %v2727_v50 = vld [vmem:[%s13768_s8 + $0x1f0] sm:$0xff] }
 0x4d4   :  { %v8636_v44 = vpack.c.bf16 %v2712_v3, %v2710_v60  ;;  %v8654_v20 = vpack.c.bf16 %v2727_v50, %v2725_v13 }
 0x4d6   :  { %v2199_v62 = vpop.f32.mrb[82].mxu1  ;;  %8637 = vmatprep.subr.bf16.mxu1 %v8636_v44 }
 0x4d7   :  { %v11666_v29 = vadd.f32 %v11530_v7, %v2199_v62  ;;  %v2201_v57 = vpop.f32.mrb[83].mxu1  ;;  %v2716_v7 = vld [vmem:[%s13768_s8 + $0x198] sm:$0xff]  ;;  %8639 = vmatpush1.bf16.msra.mxu1 %v8638_v0 }
 0x4d8   :  { %v8640_v34 = vpack.c.bf16 %v2716_v7, %v2714_v21  ;;  %v2732_v57 = vld [vmem:[%s13768_s8 + $0x218] sm:$0xff]  ;;  %v2463_v21 = vmax.f32 %v11748_v27, 0.0  ;;  %v11777_v7 = vadd.f32 %v11557_v2, %v11636_v31 }
 0x4d9   :  { %v8656_v44 = vpack.c.bf16 %v2732_v57, %v2730_v40 }
 0x4da   :  { %8641 = vmatprep.subr.bf16.mxu1 %v8640_v34  ;;  %v2466_v12 = vmax.f32 %v11777_v7, 0.0 }
 0x4db   :  { %8643 = vmatpush1.bf16.msra.mxu1 %v8642_v45 }
 0x4dc   :  { %8645 = vmatprep.subr.bf16.mxu1 %v8644_v23  ;;  %v11798_v23 = vadd.f32 %v11557_v2, %v11651_v25 }
 0x4de   :  { %v2469_v14 = vmax.f32 %v11798_v23, 0.0 }
 0x4df   :  { %8647 = vmatpush1.bf16.msra.mxu1 %v8646_v55 }
 0x4e0   :  { %8649 = vmatprep.subr.bf16.mxu1 %v8648_v56  ;;  %v11819_v56 = vadd.f32 %v11557_v2, %v11666_v29 }
 0x4e2   :  { %v2472_v29 = vmax.f32 %v11819_v56, 0.0 }
 0x4e3   :  { %8651 = vmatpush1.bf16.msra.mxu1 %v8650_v9 }
 0x4e4   :  { %8653 = vmatprep.subr.bf16.mxu1 %v8652_v35 }
 0x4e6   :  { %v2290_v52 = vpop.f32.mrb[60].mxu1 }
 0x4e7   :  { %v2292_v10 = vpop.f32.mrb[61].mxu1  ;;  %v11713_v61 = vadd.f32 %v11694_v24, %v2290_v52  ;;  %8655 = vmatpush1.bf16.msra.mxu1 %v8654_v20 }
 0x4e8   :  { %v11722_v32 = vadd.f32 %v11704_v19, %v2292_v10  ;;  %8657 = vmatprep.subr.bf16.mxu1 %v8656_v44 }
 0x4e9   :  { %v2455_v4 = vmax.f32 %v11713_v61, 0.0 }
 0x4ea   :  { %v2296_v8 = vpop.f32.mrb[62].mxu1  ;;  %v2456_v17 = vmax.f32 %v11722_v32, 0.0 }
 0x4eb   :  { %v11725_v39 = vadd.f32 %v11694_v24, %v2296_v8  ;;  %v2298_v18 = vpop.f32.mrb[63].mxu1 }
 0x4ec   :  { %v11728_v54 = vadd.f32 %v11704_v19, %v2298_v18 }
 0x4ed   :  { %v2458_v51 = vmax.f32 %v11725_v39, 0.0 }
 0x4ee   :  { %v2459_v16 = vmax.f32 %v11728_v54, 0.0  ;;  %v2302_v46 = vpop.f32.mrb[64].mxu1 }
 0x4ef   :  { %v8843_v37 = vpack.i.bf16 %v2458_v51, %v2455_v4  ;;  %v11755_v26 = vadd.f32 %v11694_v24, %v2302_v46  ;;  %v2304_v62 = vpop.f32.mrb[65].mxu1 }
 0x4f0   :  { %v8848_v60 = vpack.i.bf16 %v2459_v16, %v2456_v17  ;;  %v11762_v3 = vadd.f32 %v11704_v19, %v2304_v62 }
 0x4f1   :  { %v2461_v33 = vmax.f32 %v11755_v26, 0.0  ;;  %8844 = vrot.lane.b32.xlu1 %v8843_v37, %s9503_s2  ;;  %v2734_v26 = vld [vmem:[%s13768_s8 + $0x228] sm:$0xff] }
 0x4f2   :  { %v2462_v30 = vmax.f32 %v11762_v3, 0.0  ;;  %8849 = vrot.lane.b32.xlu0 %v8848_v60, %s9503_s2  ;;  %v2308_v5 = vpop.f32.mrb[66].mxu1  ;;  %v2736_v3 = vld [vmem:[%s13768_s8 + $0x238] sm:$0xff] }
 0x4f3   :  { %v11780_v0 = vadd.f32 %v11694_v24, %v2308_v5  ;;  %v2310_v34 = vpop.f32.mrb[67].mxu1 }
 0x4f4   :  { %v8853_v38 = vpack.i.bf16 %v2461_v33, %v2462_v30  ;;  %v11787_v6 = vadd.f32 %v11704_v19, %v2310_v34 }
 0x4f5   :  { %v2464_v45 = vmax.f32 %v11780_v0, 0.0  ;;  %2507 = vrot.lane.b32.xlu1 %v2463_v21, %s9503_s2  ;;  %v2740_v0 = vld [vmem:[%s13768_s8 + $0x258] sm:$0xff] }
 0x4f6   :  { %v2465_v31 = vmax.f32 %v11787_v6, 0.0  ;;  %8854 = vrot.lane.b32.xlu0 %v8853_v38, %s9503_s2  ;;  %v2314_v58 = vpop.f32.mrb[68].mxu1 }
 0x4f7   :  { %v11801_v11 = vadd.f32 %v11694_v24, %v2314_v58  ;;  %v2316_v15 = vpop.f32.mrb[69].mxu1 }
 0x4f8   :  { %v8858_v52 = vpack.i.bf16 %v2464_v45, %v2465_v31  ;;  %v11808_v55 = vadd.f32 %v11704_v19, %v2316_v15 }
 0x4f9   :  { %v2467_v10 = vmax.f32 %v11801_v11, 0.0  ;;  %2513 = vrot.lane.b32.xlu1 %v2466_v12, %s9503_s2 }
 0x4fa   :  { %v2468_v25 = vmax.f32 %v11808_v55, 0.0  ;;  %8859 = vrot.lane.b32.xlu0 %v8858_v52, %s9503_s2  ;;  %v2320_v53 = vpop.f32.mrb[70].mxu1  ;;  %v2742_v55 = vld [vmem:[%s13768_s8 + $0x268] sm:$0xff] }
 0x4fb   :  { %v11822_v59 = vadd.f32 %v11694_v24, %v2320_v53  ;;  %v2322_v22 = vpop.f32.mrb[71].mxu1 }
 0x4fc   :  { %v8863_v8 = vpack.i.bf16 %v2467_v10, %v2468_v25  ;;  %v11829_v9 = vadd.f32 %v11704_v19, %v2322_v22 }
 0x4fd   :  { %v2470_v18 = vmax.f32 %v11822_v59, 0.0  ;;  %2519 = vrot.lane.b32.xlu1 %v2469_v14, %s9503_s2  ;;  %v2746_v59 = vld [vmem:[%s13768_s8 + $0x288] sm:$0xff] }
 0x4fe   :  { %v2471_v2 = vmax.f32 %v11829_v9, 0.0  ;;  %8864 = vrot.lane.b32.xlu0 %v8863_v8, %s9503_s2  ;;  %v2748_v9 = vld [vmem:[%s13768_s8 + $0x298] sm:$0xff] }
 0x500   :  { %v8868_v24 = vpack.i.bf16 %v2470_v18, %v2471_v2 }
 0x501   :  { %2525 = vrot.lane.b32.xlu1 %v2472_v29, %s9503_s2 }
 0x502   :  { %8869 = vrot.lane.b32.xlu0 %v8868_v24, %s9503_s2  ;;  %v2729_v24 = vld [vmem:[%s13768_s8 + $0x200] sm:$0xff] }
 0x53b   :  { %v11846_v19 = vpop.permute.xlu1 %2495 }
 0x53f   :  { %v11848_v36 = vpop.permute.xlu0 %2501 }
 0x563   :  { %v8845_v43 = vpop.permute.xlu1 %8844 }
 0x564   :  { %v8847_v35 = vunpack.i.h.bf16 %v8845_v43  ;;  %v8846_v13 = vunpack.i.l.bf16 %v8845_v43  ;;  %v8850_v50 = vpop.permute.xlu0 %8849  ;;  %v2731_v43 = vld [vmem:[%s13768_s8 + $0x210] sm:$0xff] }
 0x565   :  { %v8852_v46 = vunpack.i.h.bf16 %v8850_v50  ;;  %v8851_v20 = vunpack.i.l.bf16 %v8850_v50 }
 0x567   :  { %v2529_v37 = vsel %vm1038_vm2, %v8847_v35, %v8852_v46  ;;  %v2530_v62 = vsel %vm1038_vm2, %v8852_v46, %v11848_v36  ;;  %v2527_v60 = vsel %vm1038_vm2, %v8846_v13, %v8851_v20  ;;  %v2528_v40 = vsel %vm1038_vm2, %v8851_v20, %v11846_v19  ;;  %v11856_v57 = vpop.permute.xlu1 %2507 }
 0x568   :  { %v11860_v44 = vmax.f32 %v2458_v51, %v2529_v37  ;;  %v2561_v5 = vmax.f32 %v2459_v16, %v2530_v62  ;;  %v2557_v34 = vmax.f32 %v2455_v4, %v2527_v60  ;;  %v8855_v38 = vpop.permute.xlu0 %8854  ;;  %v2558_v52 = vmax.f32 %v2456_v17, %v2528_v40  ;;  %v2733_v40 = vld [vmem:[%s13768_s8 + $0x220] sm:$0xff] }
 0x569   :  { %v8857_v58 = vunpack.i.h.bf16 %v8855_v38  ;;  %v8856_v15 = vunpack.i.l.bf16 %v8855_v38  ;;  %v8658_v60 = vpack.c.bf16 %v2731_v43, %v2729_v24 }
 0x56a   :  { %v2594_v53 = vrot.slane %v11860_v44, 1  ;;  %v2597_v22 = vrot.slane %v2561_v5, 1  ;;  %v2593_v8 = vrot.slane %v2557_v34, 1  ;;  %v2596_v16 = vrot.slane %v2558_v52, 1 }
 0x56b   :  { %v2531_v39 = vsel %vm1038_vm2, %v8857_v58, %v8856_v15  ;;  %v2532_v51 = vsel %vm1038_vm2, %v8856_v15, %v11856_v57  ;;  %v11872_v54 = vpop.permute.xlu1 %2513 }
 0x56c   :  { %v2595_v61 = vsel %vm209_vm0, %v2593_v8, %v2594_v53  ;;  %v11877_v4 = vmax.f32 %v2461_v33, %v2531_v39  ;;  %v11881_v32 = vmax.f32 %v2462_v30, %v2532_v51  ;;  %v8860_v17 = vpop.permute.xlu0 %8859  ;;  %v2598_v46 = vsel %vm209_vm0, %v2596_v16, %v2597_v22 }
 0x56d   :  { %v8862_v35 = vunpack.i.h.bf16 %v8860_v17  ;;  %v8861_v13 = vunpack.i.l.bf16 %v8860_v17  ;;  %v2644_v33 = vmax.f32 %v2557_v34, %v2595_v61  ;;  %v2645_v62 = vmax.f32 %v2558_v52, %v2598_v46  ;;  %v2735_v34 = vld [vmem:[%s13768_s8 + $0x230] sm:$0xff]  ;;  %v2738_v17 = vld [vmem:[%s13768_s8 + $0x248] sm:$0xff] }
 0x56e   :  { %v2602_v30 = vrot.slane %v11877_v4, 1  ;;  %v2604_v50 = vrot.slane %v11881_v32, 1  ;;  %v8660_v39 = vpack.c.bf16 %v2736_v3, %v2734_v26  ;;  %v2737_v3 = vld [vmem:[%s13768_s8 + $0x240] sm:$0xff] }
 0x56f   :  { %v2533_v20 = vsel %vm1038_vm2, %v8862_v35, %v8861_v13  ;;  %v2534_v37 = vsel %vm1038_vm2, %v8861_v13, %v11872_v54  ;;  %v11913_v15 = vpop.permute.xlu1 %2519  ;;  %2842 = vmatprep.mubr.f32.mxu1 %v2645_v62 }
 0x570   :  { %v11909_v38 = vmax.f32 %v2464_v45, %v2533_v20  ;;  %v2567_v58 = vmax.f32 %v2465_v31, %v2534_v37  ;;  %v8865_v8 = vpop.permute.xlu0 %8864  ;;  %v2605_v52 = vsel %vm209_vm0, %v2597_v22, %v2604_v50  ;;  %2843 = vmatmul.mubr.f32.vlgmr.msra.gmra.mrb[84].mxu1 %v2644_v33  ;;  %v2603_v31 = vsel %vm209_vm0, %v2594_v53, %v2602_v30  ;;  %v2739_v33 = vld [vmem:[%s13768_s8 + $0x250] sm:$0xff] }
 0x571   :  { %v8867_v51 = vunpack.i.h.bf16 %v8865_v8  ;;  %v8866_v16 = vunpack.i.l.bf16 %v8865_v8  ;;  %v2648_v61 = vmax.f32 %v2561_v5, %v2605_v52  ;;  %v8662_v22 = vpack.c.bf16 %v2735_v34, %v2733_v40  ;;  %8659 = vmatpush1.bf16.msra.mxu1 %v8658_v60 }
 0x572   :  { %v2608_v6 = vrot.slane %v11909_v38, 1  ;;  %v2610_v45 = vrot.slane %v2567_v58, 1  ;;  %v2647_v43 = vmax.f32 %v11860_v44, %v2603_v31  ;;  %8661 = vmatprep.subr.bf16.mxu1 %v8660_v39  ;;  %v8664_v53 = vpack.c.bf16 %v2740_v0, %v2738_v17 }
 0x573   :  { %v2535_v24 = vsel %vm1038_vm2, %v8867_v51, %v8866_v16  ;;  %v2536_v5 = vsel %vm1038_vm2, %v8866_v16, %v11913_v15  ;;  %2848 = vmatprep.mubr.f32.mxu1 %v2648_v61  ;;  %v11949_v62 = vpop.permute.xlu1 %2525  ;;  %v8666_v34 = vpack.c.bf16 %v2739_v33, %v2737_v3  ;;  %v2743_v51 = vld [vmem:[%s13768_s8 + $0x270] sm:$0xff]  ;;  %v8672_v31 = vpack.c.bf16 %v2748_v9, %v2746_v59  ;;  %v8920_v59 = vld [vmem:[%s13769_s9 + $0x7bc] ss:$140 sps:$4 sm:$0xff]   ;;  %v8918_v9 = vld [vmem:[%s13769_s9 + $0x7b8] ss:$140 sps:$4 sm:$0xff]  }
 0x574   :  { %v11930_v35 = vmax.f32 %v2467_v10, %v2535_v24  ;;  %v2570_v13 = vmax.f32 %v2468_v25, %v2536_v5  ;;  %v8870_v26 = vpop.permute.xlu0 %8869  ;;  %v2611_v11 = vsel %vm209_vm0, %v2604_v50, %v2610_v45  ;;  %v2609_v10 = vsel %vm209_vm0, %v2602_v30, %v2608_v6  ;;  %v2744_v25 = vld [vmem:[%s13768_s8 + $0x278] sm:$0xff]  ;;  %2849 = vmatmul.mubr.f32.gmra.mrb[86].mxu1 %v2647_v43  ;;  %v2747_v24 = vld [vmem:[%s13768_s8 + $0x290] sm:$0xff]  ;;  %v2750_v5 = vld [vmem:[%s13768_s8 + $0x2a8] sm:$0xff] }
 0x575   :  { %v8872_v46 = vunpack.i.h.bf16 %v8870_v26  ;;  %v8871_v44 = vunpack.i.l.bf16 %v8870_v26  ;;  %v2651_v60 = vmax.f32 %v11881_v32, %v2611_v11  ;;  %8663 = vmatpush1.bf16.msra.mxu1 %v8662_v22  ;;  %v2650_v40 = vmax.f32 %v11877_v4, %v2609_v10  ;;  %v2741_v32 = vld [vmem:[%s13768_s8 + $0x260] sm:$0xff]  ;;  %v2752_v43 = vld [vmem:[%s13768_s8 + $0x2b8] sm:$0x7f] }
 0x576   :  { %v2614_v20 = vrot.slane %v11930_v35, 1  ;;  %v2616_v37 = vrot.slane %v2570_v13, 1  ;;  %v8668_v39 = vpack.c.bf16 %v2744_v25, %v2742_v55  ;;  %8665 = vmatprep.subr.bf16.mxu1 %v8664_v53  ;;  %v8670_v0 = vpack.c.bf16 %v2743_v51, %v2741_v32  ;;  %v2745_v22 = vld [vmem:[%s13768_s8 + $0x280] sm:$0xff]  ;;  %v8908_v32 = vld [vmem:[%s13769_s9 + $0x58c] ss:$140 sps:$4 sm:$0xff]  }
 0x577   :  { %v2537_v50 = vsel %vm1038_vm2, %v8872_v46, %v8871_v44  ;;  %v2538_v30 = vsel %vm1038_vm2, %v8871_v44, %v11949_v62  ;;  %2854 = vmatprep.mubr.f32.mxu1 %v2651_v60  ;;  %v2559_v53 = vmax.f32 %v2457_v49, %v11846_v19  ;;  %v8674_v1 = vpack.c.bf16 %v2747_v24, %v2745_v22  ;;  %v8884_v60 = vld [vmem:[%s13769_s9 + $0x12c] ss:$140 sps:$4 sm:$0xff]   ;;  %v8906_v51 = vld [vmem:[%s13769_s9 + $0x588] ss:$140 sps:$4 sm:$0xff]  }
 0x578   :  { %v2572_v8 = vmax.f32 %v2470_v18, %v2537_v50  ;;  %v2573_v52 = vmax.f32 %v2471_v2, %v2538_v30  ;;  %v2617_v4 = vsel %vm209_vm0, %v2610_v45, %v2616_v37  ;;  %v2615_v16 = vsel %vm209_vm0, %v2608_v6, %v2614_v20  ;;  %2855 = vmatmul.mubr.f32.gmra.mrb[88].mxu1 %v2650_v40  ;;  %v8882_v50 = vld [vmem:[%s13769_s9 + $0x128] ss:$140 sps:$4 sm:$0xff]   ;;  %v8890_v30 = vld [vmem:[%s13769_s9 + $0x244] ss:$140 sps:$4 sm:$0xff]   ;;  %v8888_v40 = vld [vmem:[%s13769_s9 + $0x240] ss:$140 sps:$4 sm:$0xff]  }
 0x579   :  { %v2654_v61 = vmax.f32 %v2567_v58, %v2617_v4  ;;  %v2653_v17 = vmax.f32 %v11909_v38, %v2615_v16  ;;  %8667 = vmatpush1.bf16.msra.mxu1 %v8666_v34  ;;  %v2562_v38 = vmax.f32 %v2460_v28, %v11848_v36  ;;  %v8676_v28 = vpack.c.bf16 %v2752_v43, %v2750_v5  ;;  %v2749_v36 = vld [vmem:[%s13768_s8 + $0x2a0] sm:$0xff]  ;;  %v8896_v34 = vld [vmem:[%s13769_s9 + $0x35c] ss:$140 sps:$4 sm:$0xff]  }
 0x57a   :  { %v2620_v18 = vrot.slane %v2572_v8, 1  ;;  %v2622_v2 = vrot.slane %v2573_v52, 1  ;;  %8669 = vmatprep.subr.bf16.mxu1 %v8668_v39  ;;  %v2599_v49 = vrot.slane %v2559_v53, 1  ;;  %v2568_v11 = vmax.f32 %v2466_v12, %v11872_v54  ;;  %v8900_v39 = vld [vmem:[%s13769_s9 + $0x470] ss:$140 sps:$4 sm:$0xff]  }
 0x57b   :  { %2860 = vmatprep.mubr.f32.mxu1 %v2654_v61  ;;  %v2600_v3 = vrot.slane %v2562_v38, 1  ;;  %v2571_v10 = vmax.f32 %v2469_v14, %v11913_v15  ;;  %v2574_v54 = vmax.f32 %v2472_v29, %v11949_v62  ;;  %v8878_v62 = vld [vmem:[%s13769_s9 + $0x14] ss:$140 sps:$4 sm:$0xff]   ;;  %v8914_v4 = vld [vmem:[%s13769_s9 + $0x6a4] ss:$140 sps:$4 sm:$0xff]   ;;  %vm2980_vm2 = vcmask 359424  }
 0x57c   :  { %v2623_v6 = vsel %vm209_vm0, %v2616_v37, %v2622_v2  ;;  %v2621_v45 = vsel %vm209_vm0, %v2614_v20, %v2620_v18  ;;  %2861 = vmatmul.mubr.f32.gmra.mrb[90].mxu1 %v2653_v17  ;;  %v2660_v48 = vmax.f32 %v2573_v52, %v2622_v2  ;;  %v2659_v33 = vmax.f32 %v2572_v8, %v2620_v18  ;;  %v8876_v37 = vld [vmem:[%s13769_s9 + $0x10] ss:$140 sps:$4 sm:$0xff]   ;;  %v8894_v8 = vld [vmem:[%s13769_s9 + $0x358] ss:$140 sps:$4 sm:$0xff]   ;;  %v8902_v52 = vld [vmem:[%s13769_s9 + $0x474] ss:$140 sps:$4 sm:$0xff]  }
 0x57d   :  { %v2657_v58 = vmax.f32 %v2570_v13, %v2623_v6  ;;  %v2656_v26 = vmax.f32 %v11930_v35, %v2621_v45  ;;  %8671 = vmatpush1.bf16.msra.mxu1 %v8670_v0  ;;  %v2751_v13 = vld [vmem:[%s13768_s8 + $0x2b0] sm:$0x7f]  ;;  %v2565_v35 = vmax.f32 %v2463_v21, %v11856_v57  ;;  %v2601_v46 = vsel %vm209_vm0, %v2599_v49, %v2600_v3  ;;  %v8912_v16 = vld [vmem:[%s13769_s9 + $0x6a0] ss:$140 sps:$4 sm:$0xff]  }
 0x57e   :  { %8673 = vmatprep.subr.bf16.mxu1 %v8672_v31  ;;  %v8679_v19 = vpack.c.bf16 %v2751_v13, %v2749_v36  ;;  %v2646_v27 = vmax.f32 %v2559_v53, %v2601_v46  ;;  %v2612_v57 = vrot.slane %v2568_v11, 1  ;;  %v2618_v12 = vrot.slane %v2571_v10, 1  ;;  %v8926_v18 = vld [vmem:[%s13769_s9 + $0x8d4] ss:$140 sps:$4 sm:$0xff]   ;;  %v8924_v2 = vld [vmem:[%s13769_s9 + $0x8d0] ss:$140 sps:$4 sm:$0xff]  }
 0x57f   :  { %2866 = vmatprep.mubr.f32.mxu1 %v2657_v58  ;;  %v2606_v44 = vrot.slane %v2565_v35, 1  ;;  %v2624_v14 = vrot.slane %v2574_v54, 1  ;;  %v8932_v61 = vld [vmem:[%s13769_s9 + $0x9ec] ss:$140 sps:$4 sm:$0xff]   ;;  %v8930_v17 = vld [vmem:[%s13769_s9 + $0x9e8] ss:$140 sps:$4 sm:$0xff]  }
 0x580   :  { %2867 = vmatmul.mubr.f32.gmra.mrb[92].mxu1 %v2656_v26  ;;  %v2619_v23 = vsel %vm209_vm0, %v2612_v57, %v2618_v12  ;;  %v2662_v49 = vld [vmem:[%s13767_s7] sm:$0xff]  ;;  %v2663_v46 = vld [vmem:[%s13767_s7 + $0x8] sm:$0xff] }
 0x581   :  { %2872 = vmatprep.mubr.f32.mxu1 %v2660_v48  ;;  %8675 = vmatpush1.bf16.msra.mxu1 %v8674_v1  ;;  %v2607_v21 = vsel %vm209_vm0, %v2600_v3, %v2606_v44  ;;  %v2613_v7 = vsel %vm209_vm0, %v2606_v44, %v2612_v57  ;;  %v2655_v15 = vmax.f32 %v2568_v11, %v2619_v23  ;;  %v8875_v48 = vld [vmem:[%s13769_s9 + $0x4] ss:$140 sps:$4 sm:$0xff]   ;;  %v8887_v11 = vld [vmem:[%s13769_s9 + $0x234] ss:$140 sps:$4 sm:$0xff]   ;;  %v8893_v57 = vld [vmem:[%s13769_s9 + $0x34c] ss:$140 sps:$4 sm:$0xff]  }
 0x582   :  { %8678 = vmatprep.subr.msk.bf16.mxu1 %vm8677_vm13, %v8676_v28  ;;  %v2649_v55 = vmax.f32 %v2562_v38, %v2607_v21  ;;  %v2652_v25 = vmax.f32 %v2565_v35, %v2613_v7  ;;  %v2625_v20 = vsel %vm209_vm0, %v2618_v12, %v2624_v14  ;;  %v2661_v29 = vmax.f32 %v2574_v54, %v2624_v14  ;;  %vm8691_vm0 = vmpackc.low %vm2990_vm15, %vm9505_vm4  ;;  %v8879_v44 = vld [vmem:[%s13769_s9 + $0x118] ss:$140 sps:$4 sm:$0xff]   ;;  %v8885_v21 = vld [vmem:[%s13769_s9 + $0x230] ss:$140 sps:$4 sm:$0xff]  }
 0x583   :  { %v2658_v56 = vmax.f32 %v2571_v10, %v2625_v20  ;;  %v8891_v10 = vld [vmem:[%s13769_s9 + $0x348] ss:$140 sps:$4 sm:$0xff]   ;;  %v8897_v7 = vld [vmem:[%s13769_s9 + $0x460] ss:$140 sps:$4 sm:$0xff]   ;;  %v8903_v54 = vld [vmem:[%s13769_s9 + $0x578] ss:$140 sps:$4 sm:$0xff]  }
 0x584   :  { %2873 = vmatmul.mubr.f32.gmra.mrb[94].mxu1 %v2659_v33  ;;  %v8881_v33 = vld [vmem:[%s13769_s9 + $0x11c] ss:$140 sps:$4 sm:$0xff]   ;;  %v8917_v14 = vld [vmem:[%s13769_s9 + $0x7ac] ss:$140 sps:$4 sm:$0xff]   ;;  %v8923_v20 = vld [vmem:[%s13769_s9 + $0x8c4] ss:$140 sps:$4 sm:$0xff]  }
 0x585   :  { %8681 = vmatpush1.bf16.msk.msra.mxu1 %vm8677_vm13, %v8679_v19  ;;  %2943 = vmatprep.mubr.f32.mxu1 %v13841_v63  ;;  %v8873_v19 = vld [vmem:[%s13769_s9] ss:$140 sps:$4 sm:$0xff]   ;;  %v8905_v12 = vld [vmem:[%s13769_s9 + $0x57c] ss:$140 sps:$4 sm:$0xff]   ;;  %vm5416_vm4 = vcmask 392192  }
 0x586   :  { %5521 = vmatprep.subr.bf16.mxu1 %v8878_v62  ;;  %v8909_v23 = vld [vmem:[%s13769_s9 + $0x690] ss:$140 sps:$4 sm:$0xff]  }
 0x587   :  { %v8933_v62 = vld [vmem:[%s13769_s9 + $0xaf0] ss:$140 sps:$4 sm:$0xff]  }
 0x588   :  { %7715 = vmatmul.mubr.msk.f32.vlgmr.msra.gmra.mrb[84].mxu1 %vm2753_vm14, %v2646_v27  ;;  %v2664_v27 = vld [vmem:[%s13767_s7 + $0x10] sm:$0x3f]  ;;  %s9511_s7 = smov 64  }
 0x589   :  { %2949 = vmatprep.mubr.f32.mxu1 %v13841_v63  ;;  %5522 = vmatpush1.bf16.msra.mxu1 %v8876_v37  ;;  %v8927_v37 = vld [vmem:[%s13769_s9 + $0x9d8] ss:$140 sps:$4 sm:$0xff]  }
 0x58a   :  { %5523 = vmatprep.subr.bf16.mxu1 %v8884_v60  ;;  %v8935_v60 = vld [vmem:[%s13769_s9 + $0xaf4] ss:$140 sps:$4 sm:$0xff]  }
 0x58c   :  { %7716 = vmatmul.mubr.msk.f32.gmra.mrb[86].mxu1 %vm2753_vm14, %v2649_v55  ;;  %v8899_v55 = vld [vmem:[%s13769_s9 + $0x464] ss:$140 sps:$4 sm:$0xff]  }
 0x58d   :  { %2955 = vmatprep.mubr.f32.mxu1 %v13841_v63  ;;  %5524 = vmatpush1.bf16.msra.mxu1 %v8882_v50  ;;  %v8936_v50 = vld [vmem:[%s13769_s9 + $0xb00] ss:$140 sps:$4 sm:$0xff]  }
 0x58e   :  { %5525 = vmatprep.subr.bf16.mxu1 %v8890_v30  ;;  %v8938_v30 = vld [vmem:[%s13769_s9 + $0xb04] ss:$140 sps:$4 sm:$0xff]  }
 0x590   :  { %7717 = vmatmul.mubr.msk.f32.gmra.mrb[88].mxu1 %vm2753_vm14, %v2652_v25  ;;  %v8911_v25 = vld [vmem:[%s13769_s9 + $0x694] ss:$140 sps:$4 sm:$0xff]  }
 0x591   :  { %2961 = vmatprep.mubr.f32.mxu1 %v13841_v63  ;;  %5526 = vmatpush1.bf16.msra.mxu1 %v8888_v40  ;;  %v8941_v40 = vld [vmem:[%s13769_s9 + $0xc] ss:$140 sps:$4 sm:$0xff]  }
 0x592   :  { %5527 = vmatprep.subr.bf16.mxu1 %v8896_v34  ;;  %v8944_v34 = vld [vmem:[%s13769_s9 + $0x24] ss:$140 sps:$4 sm:$0xff]  }
 0x594   :  { %7718 = vmatmul.mubr.msk.f32.gmra.mrb[90].mxu1 %vm2753_vm14, %v2655_v15  ;;  %v8915_v15 = vld [vmem:[%s13769_s9 + $0x7a8] ss:$140 sps:$4 sm:$0xff]  }
 0x595   :  { %2967 = vmatprep.mubr.f32.mxu1 %v13841_v63  ;;  %5528 = vmatpush1.bf16.msra.mxu1 %v8894_v8 }
 0x596   :  { %5529 = vmatprep.subr.bf16.mxu1 %v8902_v52 }
 0x598   :  { %7719 = vmatmul.mubr.msk.f32.gmra.mrb[92].mxu1 %vm2753_vm14, %v2658_v56  ;;  %v8921_v56 = vld [vmem:[%s13769_s9 + $0x8c0] ss:$140 sps:$4 sm:$0xff]  }
 0x599   :  { %2973 = vmatprep.mubr.f32.mxu1 %v13841_v63  ;;  %5530 = vmatpush1.bf16.msra.mxu1 %v8900_v39 }
 0x59a   :  { %5531 = vmatprep.subr.bf16.mxu1 %v8908_v32 }
 0x59c   :  { %7720 = vmatmul.mubr.msk.f32.gmra.mrb[94].mxu1 %vm2753_vm14, %v2661_v29  ;;  %v8929_v29 = vld [vmem:[%s13769_s9 + $0x9dc] ss:$140 sps:$4 sm:$0xff]  }
 0x59d   :  { %5532 = vmatpush1.bf16.msra.mxu1 %v8906_v51 }
 0x59e   :  { %5533 = vmatprep.subr.bf16.mxu1 %v8914_v4 }
 0x5a1   :  { %5534 = vmatpush1.bf16.msra.mxu1 %v8912_v16  ;;  %v8939_v16 = vld [vmem:[%s13769_s9 + $0x8] ss:$140 sps:$4 sm:$0xff]  }
 0x5a2   :  { %5535 = vmatprep.subr.bf16.mxu1 %v8920_v59  ;;  %v8942_v59 = vld [vmem:[%s13769_s9 + $0x20] ss:$140 sps:$4 sm:$0xff]  }
 0x5a5   :  { %5536 = vmatpush1.bf16.msra.mxu1 %v8918_v9  ;;  %v8947_v9 = vld [vmem:[%s13769_s9 + $0x124] ss:$140 sps:$4 sm:$0xff]  }
 0x5a6   :  { %5537 = vmatprep.subr.bf16.mxu1 %v8926_v18  ;;  %v8950_v18 = vld [vmem:[%s13769_s9 + $0x13c] ss:$140 sps:$4 sm:$0xff]  }
 0x5a9   :  { %5538 = vmatpush1.bf16.msra.mxu1 %v8924_v2 }
 0x5aa   :  { %5539 = vmatprep.subr.bf16.mxu1 %v8932_v61 }
 0x5ad   :  { %5540 = vmatpush1.bf16.msra.mxu1 %v8930_v17  ;;  %v8945_v17 = vld [vmem:[%s13769_s9 + $0x120] ss:$140 sps:$4 sm:$0xff]  }
 0x5ae   :  { %5541 = vmatprep.subr.bf16.mxu1 %v8938_v30  ;;  %v9016_v30 = vld [vmem:[%s13769_s9 + $0x14c] ss:$140 sps:$4 sm:$0xff]  }
 0x5b1   :  { %5542 = vmatpush1.bf16.msra.mxu1 %v8936_v50  ;;  %v9013_v50 = vld [vmem:[%s13769_s9 + $0x134] ss:$140 sps:$4 sm:$0xff]  }
 0x5b2   :  { %5619 = vmatprep.subr.bf16.mxu1 %v8944_v34  ;;  %v9014_v34 = vld [vmem:[%s13769_s9 + $0x148] ss:$140 sps:$4 sm:$0xff]  }
 0x65b   :  { %v2945_v0 = vpop.f32.mrb[84].mxu1 }
 0x65c   :  { %v2947_v6 = vpop.f32.mrb[85].mxu1 }
 0x65f   :  { %v2951_v45 = vpop.f32.mrb[86].mxu1 }
 0x660   :  { %v8684_v31 = vpack.c.bf16 %v2951_v45, %v2945_v0  ;;  %v2953_v22 = vpop.f32.mrb[87].mxu1  ;;  %v8948_v0 = vld [vmem:[%s13769_s9 + $0x138] ss:$140 sps:$4 sm:$0xff]   ;;  %v8953_v45 = vld [vmem:[%s13769_s9 + $0x23c] ss:$140 sps:$4 sm:$0xff]  }
 0x661   :  { %v8682_v24 = vpack.c.bf16 %v2953_v22, %v2947_v6 }
 0x663   :  { %v2957_v38 = vpop.f32.mrb[88].mxu1  ;;  %8683 = vmatprep.subr.bf16.mxu0 %v8682_v24  ;;  %v8951_v24 = vld [vmem:[%s13769_s9 + $0x238] ss:$140 sps:$4 sm:$0xff]  }
 0x664   :  { %v2959_v58 = vpop.f32.mrb[89].mxu1  ;;  %8685 = vmatpush1.bf16.msra.mxu0 %v8684_v31  ;;  %v8956_v31 = vld [vmem:[%s13769_s9 + $0x254] ss:$140 sps:$4 sm:$0xff]  }
 0x667   :  { %v2963_v5 = vpop.f32.mrb[90].mxu1 }
 0x668   :  { %v8688_v43 = vpack.c.bf16 %v2963_v5, %v2957_v38  ;;  %v2965_v26 = vpop.f32.mrb[91].mxu1  ;;  %v8954_v38 = vld [vmem:[%s13769_s9 + $0x250] ss:$140 sps:$4 sm:$0xff]   ;;  %v8962_v5 = vld [vmem:[%s13769_s9 + $0x36c] ss:$140 sps:$4 sm:$0xff]  }
 0x669   :  { %v8686_v53 = vpack.c.bf16 %v2965_v26, %v2959_v58  ;;  %v8959_v58 = vld [vmem:[%s13769_s9 + $0x354] ss:$140 sps:$4 sm:$0xff]  }
 0x66a   :  { %v8960_v26 = vld [vmem:[%s13769_s9 + $0x368] ss:$140 sps:$4 sm:$0xff]  }
 0x66b   :  { %v2969_v1 = vpop.f32.mrb[92].mxu1  ;;  %8687 = vmatprep.subr.bf16.mxu0 %v8686_v53  ;;  %v8965_v53 = vld [vmem:[%s13769_s9 + $0x46c] ss:$140 sps:$4 sm:$0xff]  }
 0x66c   :  { %v2971_v28 = vpop.f32.mrb[93].mxu1  ;;  %8689 = vmatpush1.bf16.msra.mxu0 %v8688_v43  ;;  %v8957_v43 = vld [vmem:[%s13769_s9 + $0x350] ss:$140 sps:$4 sm:$0xff]  }
 0x66f   :  { %v2975_v36 = vpop.f32.mrb[94].mxu1 }
 0x670   :  { %v8693_v13 = vpack.c.bf16 %v2975_v36, %v2969_v1  ;;  %v2977_v3 = vpop.f32.mrb[95].mxu1  ;;  %v8968_v1 = vld [vmem:[%s13769_s9 + $0x484] ss:$140 sps:$4 sm:$0xff]   ;;  %v8966_v36 = vld [vmem:[%s13769_s9 + $0x480] ss:$140 sps:$4 sm:$0xff]  }
 0x671   :  { %v8690_v35 = vpack.c.bf16 %v2977_v3, %v2971_v28  ;;  %v8963_v28 = vld [vmem:[%s13769_s9 + $0x468] ss:$140 sps:$4 sm:$0xff]  }
 0x672   :  { %v8974_v3 = vld [vmem:[%s13769_s9 + $0x59c] ss:$140 sps:$4 sm:$0xff]  }
 0x673   :  { %8692 = vmatprep.subr.msk.bf16.mxu0 %vm8691_vm0, %v8690_v35  ;;  %v8969_v35 = vld [vmem:[%s13769_s9 + $0x580] ss:$140 sps:$4 sm:$0xff]  }
 0x674   :  { %8695 = vmatpush1.bf16.msk.msra.mxu0 %vm8691_vm0, %v8693_v13  ;;  %v8971_v13 = vld [vmem:[%s13769_s9 + $0x584] ss:$140 sps:$4 sm:$0xff]  }
 0x675   :  { %5423 = vmatprep.subr.bf16.mxu0 %v8875_v48  ;;  %v8972_v48 = vld [vmem:[%s13769_s9 + $0x598] ss:$140 sps:$4 sm:$0xff]  }
 0x677   :  { %7723 = vmatmul.mubr.msk.f32.vlgmr.msra.gmra.mrb[60].mxu0 %vm2980_vm2, %v2662_v49  ;;  %v8977_v49 = vld [vmem:[%s13769_s9 + $0x69c] ss:$140 sps:$4 sm:$0xff]  }
 0x678   :  { %3067 = vmatprep.mubr.f32.mxu0 %v13841_v63  ;;  %5424 = vmatpush1.bf16.msra.mxu0 %v8873_v19  ;;  %v8980_v19 = vld [vmem:[%s13769_s9 + $0x6b4] ss:$140 sps:$4 sm:$0xff]  }
 0x679   :  { %5425 = vmatprep.subr.bf16.mxu0 %v8881_v33  ;;  %v8975_v33 = vld [vmem:[%s13769_s9 + $0x698] ss:$140 sps:$4 sm:$0xff]  }
 0x67b   :  { %7724 = vmatmul.mubr.msk.f32.gmra.mrb[62].mxu0 %vm2980_vm2, %v2663_v46  ;;  %v8978_v46 = vld [vmem:[%s13769_s9 + $0x6b0] ss:$140 sps:$4 sm:$0xff]  }
 0x67c   :  { %3073 = vmatprep.mubr.f32.mxu0 %v13841_v63  ;;  %5426 = vmatpush1.bf16.msra.mxu0 %v8879_v44  ;;  %v8983_v44 = vld [vmem:[%s13769_s9 + $0x7b4] ss:$140 sps:$4 sm:$0xff]  }
 0x67d   :  { %5427 = vmatprep.subr.bf16.mxu0 %v8887_v11  ;;  %v8986_v11 = vld [vmem:[%s13769_s9 + $0x7cc] ss:$140 sps:$4 sm:$0xff]  }
 0x67f   :  { %7725 = vmatmul.mubr.msk.f32.gmra.mrb[64].mxu0 %vm2980_vm2, %v2664_v27  ;;  %v8981_v27 = vld [vmem:[%s13769_s9 + $0x7b0] ss:$140 sps:$4 sm:$0xff]  }
 0x680   :  { %5428 = vmatpush1.bf16.msra.mxu0 %v8885_v21  ;;  %v8984_v21 = vld [vmem:[%s13769_s9 + $0x7c8] ss:$140 sps:$4 sm:$0xff]  }
 0x681   :  { %5429 = vmatprep.subr.bf16.mxu0 %v8893_v57  ;;  %v8989_v57 = vld [vmem:[%s13769_s9 + $0x8cc] ss:$140 sps:$4 sm:$0xff]  }
 0x684   :  { %5430 = vmatpush1.bf16.msra.mxu0 %v8891_v10  ;;  %v8992_v10 = vld [vmem:[%s13769_s9 + $0x8e4] ss:$140 sps:$4 sm:$0xff]  }
 0x685   :  { %5431 = vmatprep.subr.bf16.mxu0 %v8899_v55  ;;  %v8987_v55 = vld [vmem:[%s13769_s9 + $0x8c8] ss:$140 sps:$4 sm:$0xff]  }
 0x688   :  { %5432 = vmatpush1.bf16.msra.mxu0 %v8897_v7  ;;  %v8990_v7 = vld [vmem:[%s13769_s9 + $0x8e0] ss:$140 sps:$4 sm:$0xff]  }
 0x689   :  { %5433 = vmatprep.subr.bf16.mxu0 %v8905_v12  ;;  %v8995_v12 = vld [vmem:[%s13769_s9 + $0x9e4] ss:$140 sps:$4 sm:$0xff]  }
 0x68c   :  { %5434 = vmatpush1.bf16.msra.mxu0 %v8903_v54  ;;  %v8998_v54 = vld [vmem:[%s13769_s9 + $0x9fc] ss:$140 sps:$4 sm:$0xff]  }
 0x68d   :  { %5435 = vmatprep.subr.bf16.mxu0 %v8911_v25  ;;  %v8993_v25 = vld [vmem:[%s13769_s9 + $0x9e0] ss:$140 sps:$4 sm:$0xff]  }
 0x690   :  { %5436 = vmatpush1.bf16.msra.mxu0 %v8909_v23  ;;  %v8996_v23 = vld [vmem:[%s13769_s9 + $0x9f8] ss:$140 sps:$4 sm:$0xff]  }
 0x691   :  { %5437 = vmatprep.subr.bf16.mxu0 %v8917_v14  ;;  %v9001_v14 = vld [vmem:[%s13769_s9 + $0xafc] ss:$140 sps:$4 sm:$0xff]  }
 0x694   :  { %5438 = vmatpush1.bf16.msra.mxu0 %v8915_v15  ;;  %v9004_v15 = vld [vmem:[%s13769_s9 + $0xb14] ss:$140 sps:$4 sm:$0xff]  }
 0x695   :  { %5439 = vmatprep.subr.bf16.mxu0 %v8923_v20  ;;  %v8999_v20 = vld [vmem:[%s13769_s9 + $0xaf8] ss:$140 sps:$4 sm:$0xff]  }
 0x698   :  { %5440 = vmatpush1.bf16.msra.mxu0 %v8921_v56  ;;  %v9002_v56 = vld [vmem:[%s13769_s9 + $0xb10] ss:$140 sps:$4 sm:$0xff]  }
 0x699   :  { %5441 = vmatprep.subr.bf16.mxu0 %v8929_v29  ;;  %v9007_v29 = vld [vmem:[%s13769_s9 + $0x1c] ss:$140 sps:$4 sm:$0xff]  }
 0x69c   :  { %5442 = vmatpush1.bf16.msra.mxu0 %v8927_v37  ;;  %v9010_v37 = vld [vmem:[%s13769_s9 + $0x34] ss:$140 sps:$4 sm:$0xff]  }
 0x69d   :  { %5443 = vmatprep.subr.bf16.mxu0 %v8935_v60  ;;  %v9008_v60 = vld [vmem:[%s13769_s9 + $0x30] ss:$140 sps:$4 sm:$0xff]  }
 0x6a0   :  { %5444 = vmatpush1.bf16.msra.mxu0 %v8933_v62  ;;  %v9005_v62 = vld [vmem:[%s13769_s9 + $0x18] ss:$140 sps:$4 sm:$0xff]  }
 0x6a1   :  { %5472 = vmatprep.subr.bf16.mxu0 %v8941_v40  ;;  %v9011_v40 = vld [vmem:[%s13769_s9 + $0x130] ss:$140 sps:$4 sm:$0xff]  }
 0x74a   :  { %v3063_v8 = vpop.f32.mrb[60].mxu0 }
 0x74b   :  { %v3065_v52 = vpop.f32.mrb[61].mxu0 }
 0x74e   :  { %v3069_v39 = vpop.f32.mrb[62].mxu0 }
 0x74f   :  { %v12186_v32 = vpack.c.bf16 %v3069_v39, %v3063_v8  ;;  %v3071_v51 = vpop.f32.mrb[63].mxu0  ;;  %v9019_v8 = vld [vmem:[%s13769_s9 + $0x24c] ss:$140 sps:$4 sm:$0xff]   ;;  %v9017_v39 = vld [vmem:[%s13769_s9 + $0x248] ss:$140 sps:$4 sm:$0xff]  }
 0x750   :  { %v12188_v4 = vpack.c.bf16 %v3071_v51, %v3065_v52  ;;  %v9022_v52 = vld [vmem:[%s13769_s9 + $0x264] ss:$140 sps:$4 sm:$0xff]   ;;  %v9020_v51 = vld [vmem:[%s13769_s9 + $0x260] ss:$140 sps:$4 sm:$0xff]  }
 0x752   :  { %8111 = vmatprep.mubr.msk.bf16.mxu0 %vm5416_vm4, %v12188_v4  ;;  %8115 = vmatprep.mubr.msk.bf16.mxu1 %vm5416_vm4, %v12188_v4  ;;  %v3075_v2 = vpop.f32.mrb[64].mxu0 }
 0x753   :  { %5456 = vmatmul.mubr.bf16.vlgmr.msra.gmra.mrb[68].mxu0 %v12186_v32  ;;  %5554 = vmatmul.mubr.bf16.vlgmr.msra.gmra.mrb[96].mxu1 %v12186_v32  ;;  %v3077_v61 = vpop.f32.mrb[65].mxu0  ;;  %v12226_v22 = vpack.c.bf16 %v3075_v2, %v3075_v2  ;;  %v9031_v2 = vld [vmem:[%s13769_s9 + $0x47c] ss:$140 sps:$4 sm:$0xff]  }
 0x754   :  { %5473 = vmatpush1.bf16.msra.mxu0 %v8939_v16  ;;  %5620 = vmatpush1.bf16.msra.mxu1 %v8942_v59  ;;  %v12214_v6 = vpack.c.bf16 %v3077_v61, %v3077_v61  ;;  %v9025_v16 = vld [vmem:[%s13769_s9 + $0x364] ss:$140 sps:$4 sm:$0xff]   ;;  %v9028_v59 = vld [vmem:[%s13769_s9 + $0x37c] ss:$140 sps:$4 sm:$0xff]   ;;  %v9034_v61 = vld [vmem:[%s13769_s9 + $0x494] ss:$140 sps:$4 sm:$0xff]  }
 0x755   :  { %5474 = vmatprep.subr.bf16.mxu0 %v8947_v9  ;;  %5621 = vmatprep.subr.bf16.mxu1 %v8950_v18  ;;  %v9023_v9 = vld [vmem:[%s13769_s9 + $0x360] ss:$140 sps:$4 sm:$0xff]   ;;  %v9026_v18 = vld [vmem:[%s13769_s9 + $0x378] ss:$140 sps:$4 sm:$0xff]  }
 0x756   :  { %8112 = vmatprep.mubr.msk.bf16.mxu0 %vm5416_vm4, %v12214_v6  ;;  %8116 = vmatprep.mubr.msk.bf16.mxu1 %vm5416_vm4, %v12214_v6 }
 0x758   :  { %5475 = vmatpush1.bf16.msra.mxu0 %v8945_v17  ;;  %5622 = vmatpush1.bf16.msra.mxu1 %v8948_v0  ;;  %v9029_v17 = vld [vmem:[%s13769_s9 + $0x478] ss:$140 sps:$4 sm:$0xff]   ;;  %v9032_v0 = vld [vmem:[%s13769_s9 + $0x490] ss:$140 sps:$4 sm:$0xff]  }
 0x759   :  { %5476 = vmatprep.subr.bf16.mxu0 %v8953_v45  ;;  %5623 = vmatprep.subr.bf16.mxu1 %v8956_v31  ;;  %v9037_v45 = vld [vmem:[%s13769_s9 + $0x594] ss:$140 sps:$4 sm:$0xff]   ;;  %v9040_v31 = vld [vmem:[%s13769_s9 + $0x5ac] ss:$140 sps:$4 sm:$0xff]  }
 0x75b   :  { %5466 = vmatmul.mubr.bf16.gmra.mrb[72].mxu0 %v12226_v22  ;;  %5564 = vmatmul.mubr.bf16.gmra.mrb[100].mxu1 %v12226_v22 }
 0x75c   :  { %5477 = vmatpush1.bf16.msra.mxu0 %v8951_v24  ;;  %5624 = vmatpush1.bf16.msra.mxu1 %v8954_v38  ;;  %v9035_v24 = vld [vmem:[%s13769_s9 + $0x590] ss:$140 sps:$4 sm:$0xff]   ;;  %v9038_v38 = vld [vmem:[%s13769_s9 + $0x5a8] ss:$140 sps:$4 sm:$0xff]  }
 0x75d   :  { %8113 = vmatprep.mubr.msk.bf16.mxu0 %vm5416_vm4, %v12188_v4  ;;  %8119 = vmatprep.mubr.msk.bf16.mxu1 %vm5416_vm4, %v12188_v4 }
 0x75e   :  { %5478 = vmatprep.subr.bf16.mxu0 %v8959_v58  ;;  %5625 = vmatprep.subr.bf16.mxu1 %v8962_v5  ;;  %v9043_v58 = vld [vmem:[%s13769_s9 + $0x6ac] ss:$140 sps:$4 sm:$0xff]   ;;  %v9046_v5 = vld [vmem:[%s13769_s9 + $0x6c4] ss:$140 sps:$4 sm:$0xff]  }
 0x760   :  { %5479 = vmatpush1.bf16.msra.mxu0 %v8957_v43  ;;  %5626 = vmatpush1.bf16.msra.mxu1 %v8960_v26  ;;  %v9041_v43 = vld [vmem:[%s13769_s9 + $0x6a8] ss:$140 sps:$4 sm:$0xff]   ;;  %v9044_v26 = vld [vmem:[%s13769_s9 + $0x6c0] ss:$140 sps:$4 sm:$0xff]  }
 0x761   :  { %5480 = vmatprep.subr.bf16.mxu0 %v8965_v53  ;;  %5627 = vmatprep.subr.bf16.mxu1 %v8968_v1  ;;  %v9049_v53 = vld [vmem:[%s13769_s9 + $0x7c4] ss:$140 sps:$4 sm:$0xff]   ;;  %v9052_v1 = vld [vmem:[%s13769_s9 + $0x7dc] ss:$140 sps:$4 sm:$0xff]  }
 0x764   :  { %5481 = vmatpush1.bf16.msra.mxu0 %v8963_v28  ;;  %5628 = vmatpush1.bf16.msra.mxu1 %v8966_v36  ;;  %v9047_v28 = vld [vmem:[%s13769_s9 + $0x7c0] ss:$140 sps:$4 sm:$0xff]   ;;  %v9050_v36 = vld [vmem:[%s13769_s9 + $0x7d8] ss:$140 sps:$4 sm:$0xff]  }
 0x765   :  { %5482 = vmatprep.subr.bf16.mxu0 %v8971_v13  ;;  %5629 = vmatprep.subr.bf16.mxu1 %v8974_v3  ;;  %v9055_v13 = vld [vmem:[%s13769_s9 + $0x8dc] ss:$140 sps:$4 sm:$0xff]   ;;  %v9058_v3 = vld [vmem:[%s13769_s9 + $0x8f4] ss:$140 sps:$4 sm:$0xff]  }
 0x768   :  { %5483 = vmatpush1.bf16.msra.mxu0 %v8969_v35  ;;  %5630 = vmatpush1.bf16.msra.mxu1 %v8972_v48  ;;  %v9053_v35 = vld [vmem:[%s13769_s9 + $0x8d8] ss:$140 sps:$4 sm:$0xff]   ;;  %v9056_v48 = vld [vmem:[%s13769_s9 + $0x8f0] ss:$140 sps:$4 sm:$0xff]  }
 0x769   :  { %5484 = vmatprep.subr.bf16.mxu0 %v8977_v49  ;;  %5631 = vmatprep.subr.bf16.mxu1 %v8980_v19  ;;  %v9061_v49 = vld [vmem:[%s13769_s9 + $0x9f4] ss:$140 sps:$4 sm:$0xff]   ;;  %v9064_v19 = vld [vmem:[%s13769_s9 + $0xa0c] ss:$140 sps:$4 sm:$0xff]  }
 0x76c   :  { %5485 = vmatpush1.bf16.msra.mxu0 %v8975_v33  ;;  %5632 = vmatpush1.bf16.msra.mxu1 %v8978_v46  ;;  %v9059_v33 = vld [vmem:[%s13769_s9 + $0x9f0] ss:$140 sps:$4 sm:$0xff]   ;;  %v9062_v46 = vld [vmem:[%s13769_s9 + $0xa08] ss:$140 sps:$4 sm:$0xff]  }
 0x76d   :  { %5486 = vmatprep.subr.bf16.mxu0 %v8983_v44  ;;  %5633 = vmatprep.subr.bf16.mxu1 %v8986_v11  ;;  %v9067_v44 = vld [vmem:[%s13769_s9 + $0xb0c] ss:$140 sps:$4 sm:$0xff]   ;;  %v9070_v11 = vld [vmem:[%s13769_s9 + $0xb24] ss:$140 sps:$4 sm:$0xff]  }
 0x770   :  { %5487 = vmatpush1.bf16.msra.mxu0 %v8981_v27  ;;  %5634 = vmatpush1.bf16.msra.mxu1 %v8984_v21  ;;  %v9065_v27 = vld [vmem:[%s13769_s9 + $0xb08] ss:$140 sps:$4 sm:$0xff]   ;;  %v9068_v21 = vld [vmem:[%s13769_s9 + $0xb20] ss:$140 sps:$4 sm:$0xff]  }
 0x771   :  { %5488 = vmatprep.subr.bf16.mxu0 %v8989_v57  ;;  %5635 = vmatprep.subr.bf16.mxu1 %v8992_v10  ;;  %v9073_v57 = vld [vmem:[%s13769_s9 + $0x2c] ss:$140 sps:$4 sm:$0xff]   ;;  %v9076_v10 = vld [vmem:[%s13769_s9 + $0x44] ss:$140 sps:$4 sm:$0xff]  }
 0x774   :  { %5489 = vmatpush1.bf16.msra.mxu0 %v8987_v55  ;;  %5636 = vmatpush1.bf16.msra.mxu1 %v8990_v7  ;;  %v9071_v55 = vld [vmem:[%s13769_s9 + $0x28] ss:$140 sps:$4 sm:$0xff]   ;;  %v9074_v7 = vld [vmem:[%s13769_s9 + $0x40] ss:$140 sps:$4 sm:$0xff]  }
 0x775   :  { %5490 = vmatprep.subr.bf16.mxu0 %v8995_v12  ;;  %5637 = vmatprep.subr.bf16.mxu1 %v8998_v54  ;;  %v9079_v12 = vld [vmem:[%s13769_s9 + $0x144] ss:$140 sps:$4 sm:$0xff]   ;;  %v9082_v54 = vld [vmem:[%s13769_s9 + $0x15c] ss:$140 sps:$4 sm:$0xff]  }
 0x778   :  { %5491 = vmatpush1.bf16.msra.mxu0 %v8993_v25  ;;  %5638 = vmatpush1.bf16.msra.mxu1 %v8996_v23  ;;  %v9077_v25 = vld [vmem:[%s13769_s9 + $0x140] ss:$140 sps:$4 sm:$0xff]   ;;  %v9080_v23 = vld [vmem:[%s13769_s9 + $0x158] ss:$140 sps:$4 sm:$0xff]  }
 0x779   :  { %5492 = vmatprep.subr.bf16.mxu0 %v9001_v14  ;;  %5639 = vmatprep.subr.bf16.mxu1 %v9004_v15  ;;  %v9085_v14 = vld [vmem:[%s13769_s9 + $0x25c] ss:$140 sps:$4 sm:$0xff]   ;;  %v9088_v15 = vld [vmem:[%s13769_s9 + $0x274] ss:$140 sps:$4 sm:$0xff]  }
 0x77c   :  { %5493 = vmatpush1.bf16.msra.mxu0 %v8999_v20  ;;  %5640 = vmatpush1.bf16.msra.mxu1 %v9002_v56  ;;  %v9083_v20 = vld [vmem:[%s13769_s9 + $0x258] ss:$140 sps:$4 sm:$0xff]   ;;  %v9086_v56 = vld [vmem:[%s13769_s9 + $0x270] ss:$140 sps:$4 sm:$0xff]  }
 0x77d   :  { %5570 = vmatprep.subr.bf16.mxu0 %v9007_v29  ;;  %5717 = vmatprep.subr.bf16.mxu1 %v9010_v37  ;;  %v9091_v29 = vld [vmem:[%s13769_s9 + $0x374] ss:$140 sps:$4 sm:$0xff]   ;;  %v9094_v37 = vld [vmem:[%s13769_s9 + $0x38c] ss:$140 sps:$4 sm:$0xff]  }
 0x77f   :  { %5505 = vmatmul.mubr.bf16.vlgmr.msra.gmra.mrb[76].mxu0 %v12186_v32  ;;  %5652 = vmatmul.mubr.bf16.vlgmr.msra.gmra.mrb[104].mxu1 %v12186_v32 }
 0x780   :  { %8114 = vmatprep.mubr.msk.bf16.mxu0 %vm5416_vm4, %v12214_v6  ;;  %5571 = vmatpush1.bf16.msra.mxu0 %v9005_v62  ;;  %v9089_v62 = vld [vmem:[%s13769_s9 + $0x370] ss:$140 sps:$4 sm:$0xff]  }
 0x781   :  { %8120 = vmatprep.mubr.msk.bf16.mxu1 %vm5416_vm4, %v12214_v6  ;;  %5718 = vmatpush1.bf16.msra.mxu1 %v9008_v60  ;;  %v9092_v60 = vld [vmem:[%s13769_s9 + $0x388] ss:$140 sps:$4 sm:$0xff]  }
 0x782   :  { %5572 = vmatprep.subr.bf16.mxu0 %v9013_v50  ;;  %5719 = vmatprep.subr.bf16.mxu1 %v9016_v30  ;;  %v9097_v50 = vld [vmem:[%s13769_s9 + $0x48c] ss:$140 sps:$4 sm:$0xff]   ;;  %v9100_v30 = vld [vmem:[%s13769_s9 + $0x4a4] ss:$140 sps:$4 sm:$0xff]  }
 0x784   :  { %5573 = vmatpush1.bf16.msra.mxu0 %v9011_v40  ;;  %v9095_v40 = vld [vmem:[%s13769_s9 + $0x488] ss:$140 sps:$4 sm:$0xff]  }
 0x785   :  { %5720 = vmatpush1.bf16.msra.mxu1 %v9014_v34  ;;  %5574 = vmatprep.subr.bf16.mxu0 %v9019_v8  ;;  %v9098_v34 = vld [vmem:[%s13769_s9 + $0x4a0] ss:$140 sps:$4 sm:$0xff]   ;;  %v9103_v8 = vld [vmem:[%s13769_s9 + $0x5a4] ss:$140 sps:$4 sm:$0xff]  }
 0x786   :  { %5721 = vmatprep.subr.bf16.mxu1 %v9022_v52  ;;  %v9106_v52 = vld [vmem:[%s13769_s9 + $0x5bc] ss:$140 sps:$4 sm:$0xff]  }
 0x787   :  { %5515 = vmatmul.mubr.bf16.gmra.mrb[80].mxu0 %v12226_v22  ;;  %5662 = vmatmul.mubr.bf16.gmra.mrb[108].mxu1 %v12226_v22 }
 0x788   :  { %5575 = vmatpush1.bf16.msra.mxu0 %v9017_v39  ;;  %8117 = vmatprep.mubr.msk.bf16.mxu0 %vm5416_vm4, %v12188_v4  ;;  %v9101_v39 = vld [vmem:[%s13769_s9 + $0x5a0] ss:$140 sps:$4 sm:$0xff]  }
 0x789   :  { %5722 = vmatpush1.bf16.msra.mxu1 %v9020_v51  ;;  %8123 = vmatprep.mubr.msk.bf16.mxu1 %vm5416_vm4, %v12188_v4  ;;  %v9104_v51 = vld [vmem:[%s13769_s9 + $0x5b8] ss:$140 sps:$4 sm:$0xff]  }
 0x78a   :  { %5576 = vmatprep.subr.bf16.mxu0 %v9025_v16  ;;  %5723 = vmatprep.subr.bf16.mxu1 %v9028_v59  ;;  %v9109_v16 = vld [vmem:[%s13769_s9 + $0x6bc] ss:$140 sps:$4 sm:$0xff]   ;;  %v9112_v59 = vld [vmem:[%s13769_s9 + $0x6d4] ss:$140 sps:$4 sm:$0xff]  }
 0x78c   :  { %5577 = vmatpush1.bf16.msra.mxu0 %v9023_v9  ;;  %v9107_v9 = vld [vmem:[%s13769_s9 + $0x6b8] ss:$140 sps:$4 sm:$0xff]  }
 0x78d   :  { %5724 = vmatpush1.bf16.msra.mxu1 %v9026_v18  ;;  %5578 = vmatprep.subr.bf16.mxu0 %v9031_v2  ;;  %v9110_v18 = vld [vmem:[%s13769_s9 + $0x6d0] ss:$140 sps:$4 sm:$0xff]   ;;  %v9115_v2 = vld [vmem:[%s13769_s9 + $0x7d4] ss:$140 sps:$4 sm:$0xff]  }
 0x78e   :  { %5725 = vmatprep.subr.bf16.mxu1 %v9034_v61  ;;  %v9118_v61 = vld [vmem:[%s13769_s9 + $0x7ec] ss:$140 sps:$4 sm:$0xff]  }
 0x790   :  { %5579 = vmatpush1.bf16.msra.mxu0 %v9029_v17  ;;  %v9113_v17 = vld [vmem:[%s13769_s9 + $0x7d0] ss:$140 sps:$4 sm:$0xff]  }
 0x791   :  { %5726 = vmatpush1.bf16.msra.mxu1 %v9032_v0  ;;  %5580 = vmatprep.subr.bf16.mxu0 %v9037_v45  ;;  %v9116_v0 = vld [vmem:[%s13769_s9 + $0x7e8] ss:$140 sps:$4 sm:$0xff]   ;;  %v9121_v45 = vld [vmem:[%s13769_s9 + $0x8ec] ss:$140 sps:$4 sm:$0xff]  }
 0x792   :  { %5727 = vmatprep.subr.bf16.mxu1 %v9040_v31  ;;  %v9124_v31 = vld [vmem:[%s13769_s9 + $0x904] ss:$140 sps:$4 sm:$0xff]  }
 0x794   :  { %5581 = vmatpush1.bf16.msra.mxu0 %v9035_v24  ;;  %v9119_v24 = vld [vmem:[%s13769_s9 + $0x8e8] ss:$140 sps:$4 sm:$0xff]  }
 0x795   :  { %5728 = vmatpush1.bf16.msra.mxu1 %v9038_v38  ;;  %5582 = vmatprep.subr.bf16.mxu0 %v9043_v58  ;;  %v9122_v38 = vld [vmem:[%s13769_s9 + $0x900] ss:$140 sps:$4 sm:$0xff]   ;;  %v9127_v58 = vld [vmem:[%s13769_s9 + $0xa04] ss:$140 sps:$4 sm:$0xff]  }
 0x796   :  { %5729 = vmatprep.subr.bf16.mxu1 %v9046_v5  ;;  %v9130_v5 = vld [vmem:[%s13769_s9 + $0xa1c] ss:$140 sps:$4 sm:$0xff]  }
 0x798   :  { %5583 = vmatpush1.bf16.msra.mxu0 %v9041_v43  ;;  %v9125_v43 = vld [vmem:[%s13769_s9 + $0xa00] ss:$140 sps:$4 sm:$0xff]  }
 0x799   :  { %5730 = vmatpush1.bf16.msra.mxu1 %v9044_v26  ;;  %5584 = vmatprep.subr.bf16.mxu0 %v9049_v53  ;;  %v9128_v26 = vld [vmem:[%s13769_s9 + $0xa18] ss:$140 sps:$4 sm:$0xff]   ;;  %v9133_v53 = vld [vmem:[%s13769_s9 + $0xb1c] ss:$140 sps:$4 sm:$0xff]  }
 0x79a   :  { %5731 = vmatprep.subr.bf16.mxu1 %v9052_v1  ;;  %v9136_v1 = vld [vmem:[%s13769_s9 + $0xb34] ss:$140 sps:$4 sm:$0xff]  }
 0x79c   :  { %5585 = vmatpush1.bf16.msra.mxu0 %v9047_v28  ;;  %v9131_v28 = vld [vmem:[%s13769_s9 + $0xb18] ss:$140 sps:$4 sm:$0xff]  }
 0x79d   :  { %5732 = vmatpush1.bf16.msra.mxu1 %v9050_v36  ;;  %5586 = vmatprep.subr.bf16.mxu0 %v9055_v13  ;;  %v9134_v36 = vld [vmem:[%s13769_s9 + $0xb30] ss:$140 sps:$4 sm:$0xff]  }
 0x79e   :  { %5733 = vmatprep.subr.bf16.mxu1 %v9058_v3  ;;  %v9139_v13 = vld [vmem:[%s13769_s9 + $0x3c] ss:$140 sps:$4 sm:$0xff]   ;;  %v9142_v3 = vld [vmem:[%s13769_s9 + $0x54] ss:$140 sps:$4 sm:$0xff]  }
 0x7a0   :  { %5587 = vmatpush1.bf16.msra.mxu0 %v9053_v35  ;;  %v9137_v35 = vld [vmem:[%s13769_s9 + $0x38] ss:$140 sps:$4 sm:$0xff]  }
 0x7a1   :  { %5734 = vmatpush1.bf16.msra.mxu1 %v9056_v48  ;;  %5588 = vmatprep.subr.bf16.mxu0 %v9061_v49  ;;  %v9140_v48 = vld [vmem:[%s13769_s9 + $0x50] ss:$140 sps:$4 sm:$0xff]   ;;  %v9145_v49 = vld [vmem:[%s13769_s9 + $0x154] ss:$140 sps:$4 sm:$0xff]  }
 0x7a2   :  { %5735 = vmatprep.subr.bf16.mxu1 %v9064_v19  ;;  %v9148_v19 = vld [vmem:[%s13769_s9 + $0x16c] ss:$140 sps:$4 sm:$0xff]  }
 0x7a4   :  { %5589 = vmatpush1.bf16.msra.mxu0 %v9059_v33  ;;  %v9143_v33 = vld [vmem:[%s13769_s9 + $0x150] ss:$140 sps:$4 sm:$0xff]  }
 0x7a5   :  { %5736 = vmatpush1.bf16.msra.mxu1 %v9062_v46  ;;  %5590 = vmatprep.subr.bf16.mxu0 %v9067_v44  ;;  %v9146_v46 = vld [vmem:[%s13769_s9 + $0x168] ss:$140 sps:$4 sm:$0xff]   ;;  %v9151_v44 = vld [vmem:[%s13769_s9 + $0x26c] ss:$140 sps:$4 sm:$0xff]  }
 0x7a6   :  { %5737 = vmatprep.subr.bf16.mxu1 %v9070_v11  ;;  %v9154_v11 = vld [vmem:[%s13769_s9 + $0x284] ss:$140 sps:$4 sm:$0xff]  }
 0x7a8   :  { %5591 = vmatpush1.bf16.msra.mxu0 %v9065_v27  ;;  %v9149_v27 = vld [vmem:[%s13769_s9 + $0x268] ss:$140 sps:$4 sm:$0xff]  }
 0x7a9   :  { %5738 = vmatpush1.bf16.msra.mxu1 %v9068_v21  ;;  %5668 = vmatprep.subr.bf16.mxu0 %v9073_v57  ;;  %v9152_v21 = vld [vmem:[%s13769_s9 + $0x280] ss:$140 sps:$4 sm:$0xff]   ;;  %v9157_v57 = vld [vmem:[%s13769_s9 + $0x384] ss:$140 sps:$4 sm:$0xff]  }
 0x7aa   :  { %5816 = vmatprep.subr.bf16.mxu1 %v9076_v10  ;;  %v9160_v10 = vld [vmem:[%s13769_s9 + $0x39c] ss:$140 sps:$4 sm:$0xff]  }
 0x7ab   :  { %5603 = vmatmul.mubr.bf16.vlgmr.msra.gmra.mrb[84].mxu0 %v12186_v32 }
 0x7ac   :  { %5750 = vmatmul.mubr.bf16.vlgmr.msra.gmra.mrb[112].mxu1 %v12186_v32  ;;  %8118 = vmatprep.mubr.msk.bf16.mxu0 %vm5416_vm4, %v12214_v6 }
 0x7ad   :  { %5669 = vmatpush1.bf16.msra.mxu0 %v9071_v55  ;;  %8124 = vmatprep.mubr.msk.bf16.mxu1 %vm5416_vm4, %v12214_v6  ;;  %v9155_v55 = vld [vmem:[%s13769_s9 + $0x380] ss:$140 sps:$4 sm:$0xff]  }
 0x7ae   :  { %5817 = vmatpush1.bf16.msra.mxu1 %v9074_v7  ;;  %5670 = vmatprep.subr.bf16.mxu0 %v9079_v12  ;;  %v9158_v7 = vld [vmem:[%s13769_s9 + $0x398] ss:$140 sps:$4 sm:$0xff]   ;;  %v9163_v12 = vld [vmem:[%s13769_s9 + $0x49c] ss:$140 sps:$4 sm:$0xff]  }
 0x7af   :  { %5818 = vmatprep.subr.bf16.mxu1 %v9082_v54  ;;  %v9166_v54 = vld [vmem:[%s13769_s9 + $0x4b4] ss:$140 sps:$4 sm:$0xff]  }
 0x7b1   :  { %5671 = vmatpush1.bf16.msra.mxu0 %v9077_v25  ;;  %v9161_v25 = vld [vmem:[%s13769_s9 + $0x498] ss:$140 sps:$4 sm:$0xff]  }
 0x7b2   :  { %5819 = vmatpush1.bf16.msra.mxu1 %v9080_v23  ;;  %5672 = vmatprep.subr.bf16.mxu0 %v9085_v14  ;;  %v9164_v23 = vld [vmem:[%s13769_s9 + $0x4b0] ss:$140 sps:$4 sm:$0xff]   ;;  %v9169_v14 = vld [vmem:[%s13769_s9 + $0x5b4] ss:$140 sps:$4 sm:$0xff]  }
 0x7b3   :  { %5613 = vmatmul.mubr.bf16.gmra.mrb[88].mxu0 %v12226_v22  ;;  %5820 = vmatprep.subr.bf16.mxu1 %v9088_v15  ;;  %v9172_v15 = vld [vmem:[%s13769_s9 + $0x5cc] ss:$140 sps:$4 sm:$0xff]  }
 0x7b4   :  { %5760 = vmatmul.mubr.bf16.gmra.mrb[116].mxu1 %v12226_v22  ;;  %8121 = vmatprep.mubr.msk.bf16.mxu0 %vm5416_vm4, %v12188_v4 }
 0x7b5   :  { %5673 = vmatpush1.bf16.msra.mxu0 %v9083_v20  ;;  %8127 = vmatprep.mubr.msk.bf16.mxu1 %vm5416_vm4, %v12188_v4  ;;  %v9167_v20 = vld [vmem:[%s13769_s9 + $0x5b0] ss:$140 sps:$4 sm:$0xff]  }
 0x7b6   :  { %5821 = vmatpush1.bf16.msra.mxu1 %v9086_v56  ;;  %5674 = vmatprep.subr.bf16.mxu0 %v9091_v29  ;;  %v9170_v56 = vld [vmem:[%s13769_s9 + $0x5c8] ss:$140 sps:$4 sm:$0xff]   ;;  %v9175_v29 = vld [vmem:[%s13769_s9 + $0x6cc] ss:$140 sps:$4 sm:$0xff]  }
 0x7b7   :  { %5822 = vmatprep.subr.bf16.mxu1 %v9094_v37  ;;  %v9178_v37 = vld [vmem:[%s13769_s9 + $0x6e4] ss:$140 sps:$4 sm:$0xff]  }
 0x7b9   :  { %5675 = vmatpush1.bf16.msra.mxu0 %v9089_v62  ;;  %v9173_v62 = vld [vmem:[%s13769_s9 + $0x6c8] ss:$140 sps:$4 sm:$0xff]  }
 0x7ba   :  { %5823 = vmatpush1.bf16.msra.mxu1 %v9092_v60  ;;  %5676 = vmatprep.subr.bf16.mxu0 %v9097_v50  ;;  %v9176_v60 = vld [vmem:[%s13769_s9 + $0x6e0] ss:$140 sps:$4 sm:$0xff]   ;;  %v9181_v50 = vld [vmem:[%s13769_s9 + $0x7e4] ss:$140 sps:$4 sm:$0xff]  }
 0x7bb   :  { %5824 = vmatprep.subr.bf16.mxu1 %v9100_v30  ;;  %v9184_v30 = vld [vmem:[%s13769_s9 + $0x7fc] ss:$140 sps:$4 sm:$0xff]  }
 0x7bd   :  { %5677 = vmatpush1.bf16.msra.mxu0 %v9095_v40  ;;  %v9179_v40 = vld [vmem:[%s13769_s9 + $0x7e0] ss:$140 sps:$4 sm:$0xff]  }
 0x7be   :  { %5825 = vmatpush1.bf16.msra.mxu1 %v9098_v34  ;;  %5678 = vmatprep.subr.bf16.mxu0 %v9103_v8  ;;  %v9182_v34 = vld [vmem:[%s13769_s9 + $0x7f8] ss:$140 sps:$4 sm:$0xff]   ;;  %v9187_v8 = vld [vmem:[%s13769_s9 + $0x8fc] ss:$140 sps:$4 sm:$0xff]  }
 0x7bf   :  { %5826 = vmatprep.subr.bf16.mxu1 %v9106_v52  ;;  %v9190_v52 = vld [vmem:[%s13769_s9 + $0x914] ss:$140 sps:$4 sm:$0xff]  }
 0x7c1   :  { %5679 = vmatpush1.bf16.msra.mxu0 %v9101_v39  ;;  %v9185_v39 = vld [vmem:[%s13769_s9 + $0x8f8] ss:$140 sps:$4 sm:$0xff]  }
 0x7c2   :  { %5827 = vmatpush1.bf16.msra.mxu1 %v9104_v51  ;;  %5680 = vmatprep.subr.bf16.mxu0 %v9109_v16  ;;  %v9188_v51 = vld [vmem:[%s13769_s9 + $0x910] ss:$140 sps:$4 sm:$0xff]   ;;  %v9193_v16 = vld [vmem:[%s13769_s9 + $0xa14] ss:$140 sps:$4 sm:$0xff]  }
 0x7c3   :  { %5828 = vmatprep.subr.bf16.mxu1 %v9112_v59  ;;  %v9196_v59 = vld [vmem:[%s13769_s9 + $0xa2c] ss:$140 sps:$4 sm:$0xff]  }
 0x7c5   :  { %5681 = vmatpush1.bf16.msra.mxu0 %v9107_v9  ;;  %v9191_v9 = vld [vmem:[%s13769_s9 + $0xa10] ss:$140 sps:$4 sm:$0xff]  }
 0x7c6   :  { %5829 = vmatpush1.bf16.msra.mxu1 %v9110_v18  ;;  %5682 = vmatprep.subr.bf16.mxu0 %v9115_v2  ;;  %v9194_v18 = vld [vmem:[%s13769_s9 + $0xa28] ss:$140 sps:$4 sm:$0xff]   ;;  %v9199_v2 = vld [vmem:[%s13769_s9 + $0xb2c] ss:$140 sps:$4 sm:$0xff]  }
 0x7c7   :  { %5830 = vmatprep.subr.bf16.mxu1 %v9118_v61  ;;  %v9202_v61 = vld [vmem:[%s13769_s9 + $0xb44] ss:$140 sps:$4 sm:$0xff]  }
 0x7c9   :  { %5683 = vmatpush1.bf16.msra.mxu0 %v9113_v17  ;;  %v9197_v17 = vld [vmem:[%s13769_s9 + $0xb28] ss:$140 sps:$4 sm:$0xff]  }
 0x7ca   :  { %5831 = vmatpush1.bf16.msra.mxu1 %v9116_v0  ;;  %5684 = vmatprep.subr.bf16.mxu0 %v9121_v45  ;;  %v9200_v0 = vld [vmem:[%s13769_s9 + $0xb40] ss:$140 sps:$4 sm:$0xff]  }
 0x7cb   :  { %5832 = vmatprep.subr.bf16.mxu1 %v9124_v31  ;;  %v9205_v45 = vld [vmem:[%s13769_s9 + $0x4c] ss:$140 sps:$4 sm:$0xff]   ;;  %v9208_v31 = vld [vmem:[%s13769_s9 + $0x64] ss:$140 sps:$4 sm:$0xff]  }
 0x7cd   :  { %5685 = vmatpush1.bf16.msra.mxu0 %v9119_v24  ;;  %v9203_v24 = vld [vmem:[%s13769_s9 + $0x48] ss:$140 sps:$4 sm:$0xff]  }
 0x7ce   :  { %5833 = vmatpush1.bf16.msra.mxu1 %v9122_v38  ;;  %5686 = vmatprep.subr.bf16.mxu0 %v9127_v58  ;;  %v9206_v38 = vld [vmem:[%s13769_s9 + $0x60] ss:$140 sps:$4 sm:$0xff]   ;;  %v9211_v58 = vld [vmem:[%s13769_s9 + $0x164] ss:$140 sps:$4 sm:$0xff]  }
 0x7cf   :  { %5834 = vmatprep.subr.bf16.mxu1 %v9130_v5  ;;  %v9214_v5 = vld [vmem:[%s13769_s9 + $0x17c] ss:$140 sps:$4 sm:$0xff]  }
 0x7d1   :  { %5687 = vmatpush1.bf16.msra.mxu0 %v9125_v43  ;;  %v9209_v43 = vld [vmem:[%s13769_s9 + $0x160] ss:$140 sps:$4 sm:$0xff]  }
 0x7d2   :  { %5835 = vmatpush1.bf16.msra.mxu1 %v9128_v26  ;;  %5688 = vmatprep.subr.bf16.mxu0 %v9133_v53  ;;  %v9212_v26 = vld [vmem:[%s13769_s9 + $0x178] ss:$140 sps:$4 sm:$0xff]   ;;  %v9217_v53 = vld [vmem:[%s13769_s9 + $0x27c] ss:$140 sps:$4 sm:$0xff]  }
 0x7d3   :  { %5836 = vmatprep.subr.bf16.mxu1 %v9136_v1  ;;  %v9220_v1 = vld [vmem:[%s13769_s9 + $0x294] ss:$140 sps:$4 sm:$0xff]  }
 0x7d5   :  { %5689 = vmatpush1.bf16.msra.mxu0 %v9131_v28  ;;  %v9215_v28 = vld [vmem:[%s13769_s9 + $0x278] ss:$140 sps:$4 sm:$0xff]  }
 0x7d6   :  { %5837 = vmatpush1.bf16.msra.mxu1 %v9134_v36  ;;  %5766 = vmatprep.subr.bf16.mxu0 %v9139_v13  ;;  %v9218_v36 = vld [vmem:[%s13769_s9 + $0x290] ss:$140 sps:$4 sm:$0xff]   ;;  %v9223_v13 = vld [vmem:[%s13769_s9 + $0x394] ss:$140 sps:$4 sm:$0xff]  }
 0x7d7   :  { %5914 = vmatprep.subr.bf16.mxu1 %v9142_v3  ;;  %v9226_v3 = vld [vmem:[%s13769_s9 + $0x3ac] ss:$140 sps:$4 sm:$0xff]  }
 0x7d8   :  { %5701 = vmatmul.mubr.bf16.vlgmr.msra.gmra.mrb[92].mxu0 %v12186_v32 }
 0x7d9   :  { %5849 = vmatmul.mubr.bf16.vlgmr.msra.gmra.mrb[120].mxu1 %v12186_v32  ;;  %8122 = vmatprep.mubr.msk.bf16.mxu0 %vm5416_vm4, %v12214_v6 }
 0x7da   :  { %5767 = vmatpush1.bf16.msra.mxu0 %v9137_v35  ;;  %8128 = vmatprep.mubr.msk.bf16.mxu1 %vm5416_vm4, %v12214_v6  ;;  %v9221_v35 = vld [vmem:[%s13769_s9 + $0x390] ss:$140 sps:$4 sm:$0xff]  }
 0x7db   :  { %5915 = vmatpush1.bf16.msra.mxu1 %v9140_v48  ;;  %5768 = vmatprep.subr.bf16.mxu0 %v9145_v49  ;;  %v9224_v48 = vld [vmem:[%s13769_s9 + $0x3a8] ss:$140 sps:$4 sm:$0xff]   ;;  %v9229_v49 = vld [vmem:[%s13769_s9 + $0x4ac] ss:$140 sps:$4 sm:$0xff]  }
 0x7dc   :  { %5916 = vmatprep.subr.bf16.mxu1 %v9148_v19  ;;  %v9232_v19 = vld [vmem:[%s13769_s9 + $0x4c4] ss:$140 sps:$4 sm:$0xff]  }
 0x7de   :  { %5769 = vmatpush1.bf16.msra.mxu0 %v9143_v33  ;;  %v9227_v33 = vld [vmem:[%s13769_s9 + $0x4a8] ss:$140 sps:$4 sm:$0xff]  }
 0x7df   :  { %5917 = vmatpush1.bf16.msra.mxu1 %v9146_v46  ;;  %5770 = vmatprep.subr.bf16.mxu0 %v9151_v44  ;;  %v9230_v46 = vld [vmem:[%s13769_s9 + $0x4c0] ss:$140 sps:$4 sm:$0xff]   ;;  %v9235_v44 = vld [vmem:[%s13769_s9 + $0x5c4] ss:$140 sps:$4 sm:$0xff]  }
 0x7e0   :  { %5711 = vmatmul.mubr.bf16.gmra.mrb[96].mxu0 %v12226_v22  ;;  %5918 = vmatprep.subr.bf16.mxu1 %v9154_v11  ;;  %v9238_v11 = vld [vmem:[%s13769_s9 + $0x5dc] ss:$140 sps:$4 sm:$0xff]  }
 0x7e1   :  { %5857 = vmatmul.mubr.bf16.gmra.mrb[124].mxu1 %v12226_v22  ;;  %8125 = vmatprep.mubr.msk.bf16.mxu0 %vm5416_vm4, %v12188_v4 }
 0x7e2   :  { %5771 = vmatpush1.bf16.msra.mxu0 %v9149_v27  ;;  %8131 = vmatprep.mubr.msk.bf16.mxu1 %vm5416_vm4, %v12188_v4  ;;  %v9233_v27 = vld [vmem:[%s13769_s9 + $0x5c0] ss:$140 sps:$4 sm:$0xff]  }
 0x7e3   :  { %5919 = vmatpush1.bf16.msra.mxu1 %v9152_v21  ;;  %5772 = vmatprep.subr.bf16.mxu0 %v9157_v57  ;;  %v9236_v21 = vld [vmem:[%s13769_s9 + $0x5d8] ss:$140 sps:$4 sm:$0xff]   ;;  %v9241_v57 = vld [vmem:[%s13769_s9 + $0x6dc] ss:$140 sps:$4 sm:$0xff]  }
 0x7e4   :  { %5920 = vmatprep.subr.bf16.mxu1 %v9160_v10  ;;  %v9244_v10 = vld [vmem:[%s13769_s9 + $0x6f4] ss:$140 sps:$4 sm:$0xff]  }
 0x7e6   :  { %5773 = vmatpush1.bf16.msra.mxu0 %v9155_v55  ;;  %v9239_v55 = vld [vmem:[%s13769_s9 + $0x6d8] ss:$140 sps:$4 sm:$0xff]  }
 0x7e7   :  { %5921 = vmatpush1.bf16.msra.mxu1 %v9158_v7  ;;  %5774 = vmatprep.subr.bf16.mxu0 %v9163_v12  ;;  %v9242_v7 = vld [vmem:[%s13769_s9 + $0x6f0] ss:$140 sps:$4 sm:$0xff]   ;;  %v9247_v12 = vld [vmem:[%s13769_s9 + $0x7f4] ss:$140 sps:$4 sm:$0xff]  }
 0x7e8   :  { %5922 = vmatprep.subr.bf16.mxu1 %v9166_v54  ;;  %v9250_v54 = vld [vmem:[%s13769_s9 + $0x80c] ss:$140 sps:$4 sm:$0xff]  }
 0x7ea   :  { %5775 = vmatpush1.bf16.msra.mxu0 %v9161_v25  ;;  %v9245_v25 = vld [vmem:[%s13769_s9 + $0x7f0] ss:$140 sps:$4 sm:$0xff]  }
 0x7eb   :  { %5923 = vmatpush1.bf16.msra.mxu1 %v9164_v23  ;;  %5776 = vmatprep.subr.bf16.mxu0 %v9169_v14  ;;  %v9248_v23 = vld [vmem:[%s13769_s9 + $0x808] ss:$140 sps:$4 sm:$0xff]   ;;  %v9253_v14 = vld [vmem:[%s13769_s9 + $0x90c] ss:$140 sps:$4 sm:$0xff]  }
 0x7ec   :  { %5924 = vmatprep.subr.bf16.mxu1 %v9172_v15  ;;  %v9256_v15 = vld [vmem:[%s13769_s9 + $0x924] ss:$140 sps:$4 sm:$0xff]  }
 0x7ee   :  { %5777 = vmatpush1.bf16.msra.mxu0 %v9167_v20  ;;  %v9251_v20 = vld [vmem:[%s13769_s9 + $0x908] ss:$140 sps:$4 sm:$0xff]  }
 0x7ef   :  { %5925 = vmatpush1.bf16.msra.mxu1 %v9170_v56  ;;  %5778 = vmatprep.subr.bf16.mxu0 %v9175_v29  ;;  %v9254_v56 = vld [vmem:[%s13769_s9 + $0x920] ss:$140 sps:$4 sm:$0xff]   ;;  %v9259_v29 = vld [vmem:[%s13769_s9 + $0xa24] ss:$140 sps:$4 sm:$0xff]  }
 0x7f0   :  { %5926 = vmatprep.subr.bf16.mxu1 %v9178_v37  ;;  %v9262_v37 = vld [vmem:[%s13769_s9 + $0xa3c] ss:$140 sps:$4 sm:$0xff]  }
 0x7f2   :  { %5779 = vmatpush1.bf16.msra.mxu0 %v9173_v62 }
 0x7f3   :  { %5927 = vmatpush1.bf16.msra.mxu1 %v9176_v60  ;;  %5780 = vmatprep.subr.bf16.mxu0 %v9181_v50  ;;  %v9257_v50 = vld [vmem:[%s13769_s9 + $0xa20] ss:$140 sps:$4 sm:$0xff]  }
 0x7f4   :  { %5928 = vmatprep.subr.bf16.mxu1 %v9184_v30 }
 0x7f6   :  { %5781 = vmatpush1.bf16.msra.mxu0 %v9179_v40 }
 0x7f7   :  { %5929 = vmatpush1.bf16.msra.mxu1 %v9182_v34  ;;  %5782 = vmatprep.subr.bf16.mxu0 %v9187_v8  ;;  %v9260_v34 = vld [vmem:[%s13769_s9 + $0xa38] ss:$140 sps:$4 sm:$0xff]  }
 0x7f8   :  { %5930 = vmatprep.subr.bf16.mxu1 %v9190_v52 }
 0x7fa   :  { %5783 = vmatpush1.bf16.msra.mxu0 %v9185_v39 }
 0x7fb   :  { %5931 = vmatpush1.bf16.msra.mxu1 %v9188_v51  ;;  %5784 = vmatprep.subr.bf16.mxu0 %v9193_v16  ;;  %v9265_v51 = vld [vmem:[%s13769_s9 + $0xb3c] ss:$140 sps:$4 sm:$0xff]  }
 0x7fc   :  { %5932 = vmatprep.subr.bf16.mxu1 %v9196_v59 }
 0x7fe   :  { %5785 = vmatpush1.bf16.msra.mxu0 %v9191_v9  ;;  %v9268_v9 = vld [vmem:[%s13769_s9 + $0xb54] ss:$140 sps:$4 sm:$0xff]  }
 0x7ff   :  { %5933 = vmatpush1.bf16.msra.mxu1 %v9194_v18  ;;  %5786 = vmatprep.subr.bf16.mxu0 %v9199_v2  ;;  %v9263_v2 = vld [vmem:[%s13769_s9 + $0xb38] ss:$140 sps:$4 sm:$0xff]  }
 0x800   :  { %5934 = vmatprep.subr.bf16.mxu1 %v9202_v61  ;;  %v9266_v61 = vld [vmem:[%s13769_s9 + $0xb50] ss:$140 sps:$4 sm:$0xff]  }
 0x802   :  { %5787 = vmatpush1.bf16.msra.mxu0 %v9197_v17  ;;  %v9271_v17 = vld [vmem:[%s13769_s9 + $0x5c] ss:$140 sps:$4 sm:$0xff]  }
 0x803   :  { %5935 = vmatpush1.bf16.msra.mxu1 %v9200_v0  ;;  %5865 = vmatprep.subr.bf16.mxu0 %v9205_v45  ;;  %v9274_v0 = vld [vmem:[%s13769_s9 + $0x74] ss:$140 sps:$4 sm:$0xff]  }
 0x804   :  { %6012 = vmatprep.subr.bf16.mxu1 %v9208_v31 }
 0x805   :  { %5799 = vmatmul.mubr.bf16.vlgmr.msra.gmra.mrb[100].mxu0 %v12186_v32 }
 0x806   :  { %5947 = vmatmul.mubr.bf16.vlgmr.msra.gmra.mrb[128].mxu1 %v12186_v32  ;;  %8126 = vmatprep.mubr.msk.bf16.mxu0 %vm5416_vm4, %v12214_v6 }
 0x807   :  { %5866 = vmatpush1.bf16.msra.mxu0 %v9203_v24  ;;  %8132 = vmatprep.mubr.msk.bf16.mxu1 %vm5416_vm4, %v12214_v6 }
 0x808   :  { %6013 = vmatpush1.bf16.msra.mxu1 %v9206_v38  ;;  %5867 = vmatprep.subr.bf16.mxu0 %v9211_v58  ;;  %v9269_v58 = vld [vmem:[%s13769_s9 + $0x58] ss:$140 sps:$4 sm:$0xff]  }
 0x809   :  { %6014 = vmatprep.subr.bf16.mxu1 %v9214_v5 }
 0x80b   :  { %5868 = vmatpush1.bf16.msra.mxu0 %v9209_v43 }
 0x80c   :  { %6015 = vmatpush1.bf16.msra.mxu1 %v9212_v26  ;;  %5869 = vmatprep.subr.bf16.mxu0 %v9217_v53  ;;  %v9272_v26 = vld [vmem:[%s13769_s9 + $0x70] ss:$140 sps:$4 sm:$0xff]   ;;  %v9277_v53 = vld [vmem:[%s13769_s9 + $0x174] ss:$140 sps:$4 sm:$0xff]  }
 0x80d   :  { %5809 = vmatmul.mubr.bf16.gmra.mrb[104].mxu0 %v12226_v22  ;;  %6016 = vmatprep.subr.bf16.mxu1 %v9220_v1 }
 0x80e   :  { %5955 = vmatmul.mubr.bf16.gmra.mrb[132].mxu1 %v12226_v22  ;;  %8129 = vmatprep.mubr.msk.bf16.mxu0 %vm5416_vm4, %v12188_v4 }
 0x80f   :  { %5870 = vmatpush1.bf16.msra.mxu0 %v9215_v28  ;;  %8135 = vmatprep.mubr.msk.bf16.mxu1 %vm5416_vm4, %v12188_v4 }
 0x810   :  { %6017 = vmatpush1.bf16.msra.mxu1 %v9218_v36  ;;  %5871 = vmatprep.subr.bf16.mxu0 %v9223_v13  ;;  %v9280_v36 = vld [vmem:[%s13769_s9 + $0x18c] ss:$140 sps:$4 sm:$0xff]   ;;  %v9275_v13 = vld [vmem:[%s13769_s9 + $0x170] ss:$140 sps:$4 sm:$0xff]  }
 0x811   :  { %6018 = vmatprep.subr.bf16.mxu1 %v9226_v3  ;;  %v9278_v3 = vld [vmem:[%s13769_s9 + $0x188] ss:$140 sps:$4 sm:$0xff]  }
 0x813   :  { %5872 = vmatpush1.bf16.msra.mxu0 %v9221_v35  ;;  %v9283_v35 = vld [vmem:[%s13769_s9 + $0x28c] ss:$140 sps:$4 sm:$0xff]  }
 0x814   :  { %6019 = vmatpush1.bf16.msra.mxu1 %v9224_v48  ;;  %5873 = vmatprep.subr.bf16.mxu0 %v9229_v49  ;;  %v9286_v48 = vld [vmem:[%s13769_s9 + $0x2a4] ss:$140 sps:$4 sm:$0xff]   ;;  %v9281_v49 = vld [vmem:[%s13769_s9 + $0x288] ss:$140 sps:$4 sm:$0xff]  }
 0x815   :  { %6020 = vmatprep.subr.bf16.mxu1 %v9232_v19  ;;  %v9284_v19 = vld [vmem:[%s13769_s9 + $0x2a0] ss:$140 sps:$4 sm:$0xff]  }
 0x817   :  { %5874 = vmatpush1.bf16.msra.mxu0 %v9227_v33  ;;  %v9289_v33 = vld [vmem:[%s13769_s9 + $0x3a4] ss:$140 sps:$4 sm:$0xff]  }
 0x818   :  { %6021 = vmatpush1.bf16.msra.mxu1 %v9230_v46  ;;  %5875 = vmatprep.subr.bf16.mxu0 %v9235_v44  ;;  %v9292_v46 = vld [vmem:[%s13769_s9 + $0x3bc] ss:$140 sps:$4 sm:$0xff]   ;;  %v9287_v44 = vld [vmem:[%s13769_s9 + $0x3a0] ss:$140 sps:$4 sm:$0xff]  }
 0x819   :  { %6022 = vmatprep.subr.bf16.mxu1 %v9238_v11  ;;  %v9290_v11 = vld [vmem:[%s13769_s9 + $0x3b8] ss:$140 sps:$4 sm:$0xff]  }
 0x81b   :  { %5876 = vmatpush1.bf16.msra.mxu0 %v9233_v27  ;;  %v9295_v27 = vld [vmem:[%s13769_s9 + $0x4bc] ss:$140 sps:$4 sm:$0xff]  }
 0x81c   :  { %6023 = vmatpush1.bf16.msra.mxu1 %v9236_v21  ;;  %5877 = vmatprep.subr.bf16.mxu0 %v9241_v57  ;;  %v9298_v21 = vld [vmem:[%s13769_s9 + $0x4d4] ss:$140 sps:$4 sm:$0xff]   ;;  %v9293_v57 = vld [vmem:[%s13769_s9 + $0x4b8] ss:$140 sps:$4 sm:$0xff]  }
 0x81d   :  { %6024 = vmatprep.subr.bf16.mxu1 %v9244_v10  ;;  %v9296_v10 = vld [vmem:[%s13769_s9 + $0x4d0] ss:$140 sps:$4 sm:$0xff]  }
 0x81f   :  { %5878 = vmatpush1.bf16.msra.mxu0 %v9239_v55  ;;  %v9301_v55 = vld [vmem:[%s13769_s9 + $0x5d4] ss:$140 sps:$4 sm:$0xff]  }
 0x820   :  { %6025 = vmatpush1.bf16.msra.mxu1 %v9242_v7  ;;  %5879 = vmatprep.subr.bf16.mxu0 %v9247_v12  ;;  %v9304_v7 = vld [vmem:[%s13769_s9 + $0x5ec] ss:$140 sps:$4 sm:$0xff]   ;;  %v9299_v12 = vld [vmem:[%s13769_s9 + $0x5d0] ss:$140 sps:$4 sm:$0xff]  }
 0x821   :  { %6026 = vmatprep.subr.bf16.mxu1 %v9250_v54  ;;  %v9302_v54 = vld [vmem:[%s13769_s9 + $0x5e8] ss:$140 sps:$4 sm:$0xff]  }
 0x823   :  { %5880 = vmatpush1.bf16.msra.mxu0 %v9245_v25  ;;  %v9307_v25 = vld [vmem:[%s13769_s9 + $0x6ec] ss:$140 sps:$4 sm:$0xff]  }
 0x824   :  { %6027 = vmatpush1.bf16.msra.mxu1 %v9248_v23  ;;  %5881 = vmatprep.subr.bf16.mxu0 %v9253_v14  ;;  %v9310_v23 = vld [vmem:[%s13769_s9 + $0x704] ss:$140 sps:$4 sm:$0xff]   ;;  %v9305_v14 = vld [vmem:[%s13769_s9 + $0x6e8] ss:$140 sps:$4 sm:$0xff]  }
 0x825   :  { %6028 = vmatprep.subr.bf16.mxu1 %v9256_v15  ;;  %v9308_v15 = vld [vmem:[%s13769_s9 + $0x700] ss:$140 sps:$4 sm:$0xff]  }
 0x826   :  { %v12894_v62 = vpop.f32.mrb[68].mxu0  ;;  %v12896_v60 = vpop.f32.mrb[96].mxu1 }
 0x827   :  { %5882 = vmatpush1.bf16.msra.mxu0 %v9251_v20  ;;  %v12901_v30 = vpop.f32.mrb[69].mxu0  ;;  %v12903_v40 = vpop.f32.mrb[97].mxu1  ;;  %v9313_v20 = vld [vmem:[%s13769_s9 + $0x804] ss:$140 sps:$4 sm:$0xff]  }
 0x828   :  { %6029 = vmatpush1.bf16.msra.mxu1 %v9254_v56  ;;  %5883 = vmatprep.subr.bf16.mxu0 %v9259_v29  ;;  %v6309_v8 = vcombine.low %v12894_v62, %v12901_v30  ;;  %v12910_v52 = vpop.f32.mrb[70].mxu0  ;;  %v12912_v39 = vpop.f32.mrb[98].mxu1  ;;  %v9506_v56 = vmov 1966171168  }
 0x829   :  { %6030 = vmatprep.subr.bf16.mxu1 %v9262_v37  ;;  %v12917_v16 = vpop.f32.mrb[71].mxu0  ;;  %v12919_v59 = vpop.f32.mrb[99].mxu1  ;;  %v6312_v29 = vunpack.c.l.s4 %v9506_v56  ;;  %v9316_v37 = vld [vmem:[%s13769_s9 + $0x81c] ss:$140 sps:$4 sm:$0xff]   ;;  %v9343_v56 = vld [vmem:[%s13769_s9 + $0x184] ss:$140 sps:$4 sm:$0xff]  }
 0x82a   :  { %v6677_v18 = vcombine.low %v12910_v52, %v12917_v16  ;;  %v9337_v52 = vld [vmem:[%s13769_s9 + $0x6c] ss:$140 sps:$4 sm:$0xff]  }
 0x82b   :  { %5884 = vmatpush1.bf16.msra.mxu0 %v9257_v50  ;;  %v9311_v50 = vld [vmem:[%s13769_s9 + $0x800] ss:$140 sps:$4 sm:$0xff]  }
 0x82c   :  { %6031 = vmatpush1.bf16.msra.mxu1 %v9260_v34  ;;  %5885 = vmatprep.subr.bf16.mxu0 %v9265_v51  ;;  %v9314_v34 = vld [vmem:[%s13769_s9 + $0x818] ss:$140 sps:$4 sm:$0xff]   ;;  %v9319_v51 = vld [vmem:[%s13769_s9 + $0x91c] ss:$140 sps:$4 sm:$0xff]  }
 0x82d   :  { %6032 = vmatprep.subr.bf16.mxu1 %v9268_v9  ;;  %v6313_v9 = vunpack.c.0.s8 %v6312_v29  ;;  %v9346_v29 = vld [vmem:[%s13769_s9 + $0x19c] ss:$140 sps:$4 sm:$0xff]  }
 0x82e   :  { %v5467_v45 = vpop.f32.mrb[72].mxu0  ;;  %v5565_v31 = vpop.f32.mrb[100].mxu1 }
 0x82f   :  { %5886 = vmatpush1.bf16.msra.mxu0 %v9263_v2  ;;  %v5468_v24 = vpop.f32.mrb[73].mxu0  ;;  %v5566_v38 = vpop.f32.mrb[101].mxu1  ;;  %v9322_v2 = vld [vmem:[%s13769_s9 + $0x934] ss:$140 sps:$4 sm:$0xff]  }
 0x830   :  { %6033 = vmatpush1.bf16.msra.mxu1 %v9266_v61  ;;  %5963 = vmatprep.subr.bf16.mxu0 %v9271_v17  ;;  %v5469_v5 = vpop.f32.mrb[74].mxu0  ;;  %v5567_v43 = vpop.f32.mrb[102].mxu1  ;;  %v9317_v61 = vld [vmem:[%s13769_s9 + $0x918] ss:$140 sps:$4 sm:$0xff]   ;;  %v9320_v17 = vld [vmem:[%s13769_s9 + $0x930] ss:$140 sps:$4 sm:$0xff]  }
 0x831   :  { %6110 = vmatprep.subr.bf16.mxu1 %v9274_v0  ;;  %v5470_v1 = vpop.f32.mrb[75].mxu0  ;;  %v5568_v28 = vpop.f32.mrb[103].mxu1  ;;  %v9325_v0 = vld [vmem:[%s13769_s9 + $0xa34] ss:$140 sps:$4 sm:$0xff]  }
 0x832   :  { %5898 = vmatmul.mubr.bf16.vlgmr.msra.gmra.mrb[108].mxu0 %v12186_v32  ;;  %v13853_v45 = vld [vmem:[#allocation5_spill] sm:$0xff] }
 0x833   :  { %6045 = vmatmul.mubr.bf16.vlgmr.msra.gmra.mrb[136].mxu1 %v12186_v32  ;;  %8130 = vmatprep.mubr.msk.bf16.mxu0 %vm5416_vm4, %v12214_v6  ;;  %v13056_v31 = vsub.s32 %v6313_v9, %v13853_v45  ;;  %v9323_v28 = vld [vmem:[%s13769_s9 + $0xa30] ss:$140 sps:$4 sm:$0xff]   ;;  %v9347_v9 = vld [vmem:[%s13769_s9 + $0x298] ss:$140 sps:$4 sm:$0xff]  }
 0x834   :  { %5964 = vmatpush1.bf16.msra.mxu0 %v9269_v58  ;;  %8136 = vmatprep.mubr.msk.bf16.mxu1 %vm5416_vm4, %v12214_v6  ;;  %v9328_v58 = vld [vmem:[%s13769_s9 + $0xa4c] ss:$140 sps:$4 sm:$0xff]  }
 0x835   :  { %6111 = vmatpush1.bf16.msra.mxu1 %v9272_v26  ;;  %5965 = vmatprep.subr.bf16.mxu0 %v9277_v53  ;;  %v13108_v62 = vrot.slane %v6677_v18, %v13056_v31 }
 0x836   :  { %6112 = vmatprep.subr.bf16.mxu1 %v9280_v36 }
 0x838   :  { %5966 = vmatpush1.bf16.msra.mxu0 %v9275_v13 }
 0x839   :  { %6113 = vmatpush1.bf16.msra.mxu1 %v9278_v3  ;;  %5967 = vmatprep.subr.bf16.mxu0 %v9283_v35  ;;  %v9326_v3 = vld [vmem:[%s13769_s9 + $0xa48] ss:$140 sps:$4 sm:$0xff]  }
 0x83a   :  { %5906 = vmatmul.mubr.bf16.gmra.mrb[112].mxu0 %v12226_v22  ;;  %6114 = vmatprep.subr.bf16.mxu1 %v9286_v48 }
 0x83b   :  { %6053 = vmatmul.mubr.bf16.gmra.mrb[140].mxu1 %v12226_v22  ;;  %8133 = vmatprep.mubr.msk.bf16.mxu0 %vm5416_vm4, %v12188_v4 }
 0x83c   :  { %5968 = vmatpush1.bf16.msra.mxu0 %v9281_v49  ;;  %8139 = vmatprep.mubr.msk.bf16.mxu1 %vm5416_vm4, %v12188_v4  ;;  %v9331_v49 = vld [vmem:[%s13769_s9 + $0xb4c] ss:$140 sps:$4 sm:$0xff]  }
 0x83d   :  { %6115 = vmatpush1.bf16.msra.mxu1 %v9284_v19  ;;  %5969 = vmatprep.subr.bf16.mxu0 %v9289_v33  ;;  %v13091_v19 = vrot.slane %v6309_v8, %v13056_v31 }
 0x83e   :  { %6116 = vmatprep.subr.bf16.mxu1 %v9292_v46 }
 0x840   :  { %5970 = vmatpush1.bf16.msra.mxu0 %v9287_v44  ;;  %v9334_v44 = vld [vmem:[%s13769_s9 + $0xb64] ss:$140 sps:$4 sm:$0xff]  }
 0x841   :  { %6117 = vmatpush1.bf16.msra.mxu1 %v9290_v11  ;;  %5971 = vmatprep.subr.bf16.mxu0 %v9295_v27 }
 0x842   :  { %6118 = vmatprep.subr.bf16.mxu1 %v9298_v21  ;;  %v9329_v21 = vld [vmem:[%s13769_s9 + $0xb48] ss:$140 sps:$4 sm:$0xff]  }
 0x844   :  { %5972 = vmatpush1.bf16.msra.mxu0 %v9293_v57  ;;  %v9332_v57 = vld [vmem:[%s13769_s9 + $0xb60] ss:$140 sps:$4 sm:$0xff]  }
 0x845   :  { %6119 = vmatpush1.bf16.msra.mxu1 %v9296_v10  ;;  %5973 = vmatprep.subr.bf16.mxu0 %v9301_v55  ;;  %v9340_v55 = vld [vmem:[%s13769_s9 + $0x84] ss:$140 sps:$4 sm:$0xff]  }
 0x846   :  { %6120 = vmatprep.subr.bf16.mxu1 %v9304_v7 }
 0x848   :  { %5974 = vmatpush1.bf16.msra.mxu0 %v9299_v12 }
 0x849   :  { %6121 = vmatpush1.bf16.msra.mxu1 %v9302_v54  ;;  %5975 = vmatprep.subr.bf16.mxu0 %v9307_v25 }
 0x84a   :  { %6122 = vmatprep.subr.bf16.mxu1 %v9310_v23  ;;  %v9335_v23 = vld [vmem:[%s13769_s9 + $0x68] ss:$140 sps:$4 sm:$0xff]  }
 0x84c   :  { %5976 = vmatpush1.bf16.msra.mxu0 %v9305_v14 }
 0x84d   :  { %6123 = vmatpush1.bf16.msra.mxu1 %v9308_v15  ;;  %5977 = vmatprep.subr.bf16.mxu0 %v9313_v20  ;;  %v9338_v20 = vld [vmem:[%s13769_s9 + $0x80] ss:$140 sps:$4 sm:$0xff]  }
 0x84e   :  { %6124 = vmatprep.subr.bf16.mxu1 %v9316_v37  ;;  %v9341_v37 = vld [vmem:[%s13769_s9 + $0x180] ss:$140 sps:$4 sm:$0xff]  }
 0x850   :  { %5978 = vmatpush1.bf16.msra.mxu0 %v9311_v50  ;;  %v9344_v50 = vld [vmem:[%s13769_s9 + $0x198] ss:$140 sps:$4 sm:$0xff]  }
 0x851   :  { %6125 = vmatpush1.bf16.msra.mxu1 %v9314_v34  ;;  %5979 = vmatprep.subr.bf16.mxu0 %v9319_v51  ;;  %v9349_v34 = vld [vmem:[%s13769_s9 + $0x29c] ss:$140 sps:$4 sm:$0xff]   ;;  %v9352_v51 = vld [vmem:[%s13769_s9 + $0x2b4] ss:$140 sps:$4 sm:$0xff]  }
 0x852   :  { %6126 = vmatprep.subr.bf16.mxu1 %v9322_v2  ;;  %v5506_v24 = vpop.f32.mrb[76].mxu0  ;;  %v13058_v38 = vpop.f32.mrb[104].mxu1  ;;  %v9350_v2 = vld [vmem:[%s13769_s9 + $0x2b0] ss:$140 sps:$4 sm:$0xff]  }
 0x853   :  { %v13063_v5 = vpop.f32.mrb[77].mxu0  ;;  %v13065_v43 = vpop.f32.mrb[105].mxu1 }
 0x854   :  { %5980 = vmatpush1.bf16.msra.mxu0 %v9317_v61  ;;  %v6310_v26 = vcombine.low %v5506_v24, %v13063_v5  ;;  %v6338_v53 = vcombine.low %v13063_v5, %v12896_v60  ;;  %v6373_v1 = vcombine.low %v13058_v38, %v13065_v43  ;;  %v5510_v36 = vpop.f32.mrb[78].mxu0  ;;  %v13075_v13 = vpop.f32.mrb[106].mxu1  ;;  %v9355_v61 = vld [vmem:[%s13769_s9 + $0x3b4] ss:$140 sps:$4 sm:$0xff]  }
 0x855   :  { %6127 = vmatpush1.bf16.msra.mxu1 %v9320_v17  ;;  %5981 = vmatprep.subr.bf16.mxu0 %v9325_v0  ;;  %v13080_v35 = vpop.f32.mrb[79].mxu0  ;;  %v13082_v48 = vpop.f32.mrb[107].mxu1  ;;  %v9358_v17 = vld [vmem:[%s13769_s9 + $0x3cc] ss:$140 sps:$4 sm:$0xff]   ;;  %v9353_v0 = vld [vmem:[%s13769_s9 + $0x3b0] ss:$140 sps:$4 sm:$0xff]  }
 0x856   :  { %v13094_v33 = vrot.slane %v6310_v26, %v13056_v31  ;;  %6128 = vmatprep.subr.bf16.mxu1 %v9328_v58  ;;  %v6678_v46 = vcombine.low %v5510_v36, %v13080_v35  ;;  %v6707_v11 = vcombine.high %v13080_v35, %v12912_v39  ;;  %v6741_v27 = vcombine.high %v13075_v13, %v13082_v48  ;;  %v9356_v24 = vld [vmem:[%s13769_s9 + $0x3c8] ss:$140 sps:$4 sm:$0xff]   ;;  %v9361_v58 = vld [vmem:[%s13769_s9 + $0x4cc] ss:$140 sps:$4 sm:$0xff]   ;;  %v9364_v26 = vld [vmem:[%s13769_s9 + $0x4e4] ss:$140 sps:$4 sm:$0xff]  }
 0x857   :  { %v9362_v36 = vld [vmem:[%s13769_s9 + $0x4e0] ss:$140 sps:$4 sm:$0xff]   ;;  %v6387_v60 = vrot.slane %v6373_v1, %v13056_v31 }
 0x858   :  { %v6325_v30 = vcombine.low %v13091_v19, %v13094_v33  ;;  %5982 = vmatpush1.bf16.msra.mxu0 %v9323_v28  ;;  %v13113_v8 = vrot.slane %v6678_v46, %v13056_v31  ;;  %v9359_v28 = vld [vmem:[%s13769_s9 + $0x4c8] ss:$140 sps:$4 sm:$0xff]   ;;  %v9365_v46 = vld [vmem:[%s13769_s9 + $0x5e0] ss:$140 sps:$4 sm:$0xff]   ;;  %v6715_v38 = vrot.slane %v6707_v11, %v13056_v31  ;;  %v9395_v11 = vld [vmem:[%s13769_s9 + $0xb58] ss:$140 sps:$4 sm:$0xff]  }
 0x859   :  { %6129 = vmatpush1.bf16.msra.mxu1 %v9326_v3  ;;  %5983 = vmatprep.subr.bf16.mxu0 %v9331_v49  ;;  %v9367_v3 = vld [vmem:[%s13769_s9 + $0x5e4] ss:$140 sps:$4 sm:$0xff]   ;;  %v9370_v49 = vld [vmem:[%s13769_s9 + $0x5fc] ss:$140 sps:$4 sm:$0xff]  }
 0x85a   :  { %v6693_v16 = vcombine.high %v13108_v62, %v13113_v8  ;;  %6130 = vmatprep.subr.bf16.mxu1 %v9334_v44  ;;  %v5516_v18 = vpop.f32.mrb[80].mxu0  ;;  %v5663_v10 = vpop.f32.mrb[108].mxu1  ;;  %v9368_v44 = vld [vmem:[%s13769_s9 + $0x5f8] ss:$140 sps:$4 sm:$0xff]  }
 0x85b   :  { %v5517_v7 = vpop.f32.mrb[81].mxu0  ;;  %v5664_v12 = vpop.f32.mrb[109].mxu1  ;;  %v9374_v18 = vld [vmem:[%s13769_s9 + $0x710] ss:$140 sps:$4 sm:$0xff]   ;;  %v9379_v10 = vld [vmem:[%s13769_s9 + $0x814] ss:$140 sps:$4 sm:$0xff]  }
 0x85c   :  { %5984 = vmatpush1.bf16.msra.mxu0 %v9329_v21  ;;  %v5518_v54 = vpop.f32.mrb[82].mxu0  ;;  %v5665_v25 = vpop.f32.mrb[110].mxu1  ;;  %v9373_v21 = vld [vmem:[%s13769_s9 + $0x6fc] ss:$140 sps:$4 sm:$0xff]  }
 0x85d   :  { %6131 = vmatpush1.bf16.msra.mxu1 %v9332_v57  ;;  %6061 = vmatprep.subr.bf16.mxu0 %v9337_v52  ;;  %v5519_v14 = vpop.f32.mrb[83].mxu0  ;;  %v5666_v15 = vpop.f32.mrb[111].mxu1  ;;  %v9376_v57 = vld [vmem:[%s13769_s9 + $0x714] ss:$140 sps:$4 sm:$0xff]   ;;  %v9371_v52 = vld [vmem:[%s13769_s9 + $0x6f8] ss:$140 sps:$4 sm:$0xff]  }
 0x85e   :  { %6208 = vmatprep.subr.bf16.mxu1 %v9340_v55  ;;  %v9382_v55 = vld [vmem:[%s13769_s9 + $0x82c] ss:$140 sps:$4 sm:$0xff]   ;;  %v9377_v7 = vld [vmem:[%s13769_s9 + $0x810] ss:$140 sps:$4 sm:$0xff]   ;;  %v9380_v12 = vld [vmem:[%s13769_s9 + $0x828] ss:$140 sps:$4 sm:$0xff]  }
 0x85f   :  { %5996 = vmatmul.mubr.bf16.vlgmr.msra.gmra.mrb[116].mxu0 %v12186_v32  ;;  %v9385_v54 = vld [vmem:[%s13769_s9 + $0x92c] ss:$140 sps:$4 sm:$0xff]   ;;  %v9388_v25 = vld [vmem:[%s13769_s9 + $0x944] ss:$140 sps:$4 sm:$0xff]  }
 0x860   :  { %6143 = vmatmul.mubr.bf16.vlgmr.msra.gmra.mrb[144].mxu1 %v12186_v32  ;;  %8134 = vmatprep.mubr.msk.bf16.mxu0 %vm5416_vm4, %v12214_v6  ;;  %v9386_v14 = vld [vmem:[%s13769_s9 + $0x940] ss:$140 sps:$4 sm:$0xff]  }
 0x861   :  { %6062 = vmatpush1.bf16.msra.mxu0 %v9335_v23  ;;  %8140 = vmatprep.mubr.msk.bf16.mxu1 %vm5416_vm4, %v12214_v6  ;;  %v9383_v23 = vld [vmem:[%s13769_s9 + $0x928] ss:$140 sps:$4 sm:$0xff]  }
 0x862   :  { %6209 = vmatpush1.bf16.msra.mxu1 %v9338_v20  ;;  %6063 = vmatprep.subr.bf16.mxu0 %v9343_v56  ;;  %v9391_v20 = vld [vmem:[%s13769_s9 + $0xa44] ss:$140 sps:$4 sm:$0xff]  }
 0x863   :  { %6210 = vmatprep.subr.bf16.mxu1 %v9346_v29 }
 0x865   :  { %6064 = vmatpush1.bf16.msra.mxu0 %v9341_v37 }
 0x866   :  { %6211 = vmatpush1.bf16.msra.mxu1 %v9344_v50  ;;  %6065 = vmatprep.subr.bf16.mxu0 %v9349_v34  ;;  %v9394_v50 = vld [vmem:[%s13769_s9 + $0xa5c] ss:$140 sps:$4 sm:$0xff]  }
 0x867   :  { %6004 = vmatmul.mubr.bf16.gmra.mrb[120].mxu0 %v12226_v22  ;;  %6212 = vmatprep.subr.bf16.mxu1 %v9352_v51 }
 0x868   :  { %6151 = vmatmul.mubr.bf16.gmra.mrb[148].mxu1 %v12226_v22  ;;  %8137 = vmatprep.mubr.msk.bf16.mxu0 %vm5416_vm4, %v12188_v4 }
 0x869   :  { %6066 = vmatpush1.bf16.msra.mxu0 %v9347_v9  ;;  %8143 = vmatprep.mubr.msk.bf16.mxu1 %vm5416_vm4, %v12188_v4 }
 0x86a   :  { %6213 = vmatpush1.bf16.msra.mxu1 %v9350_v2  ;;  %6067 = vmatprep.subr.bf16.mxu0 %v9355_v61  ;;  %v6346_v2 = vrot.slane %v6338_v53, %v13056_v31  ;;  %v9392_v53 = vld [vmem:[%s13769_s9 + $0xa58] ss:$140 sps:$4 sm:$0xff]  }
 0x86b   :  { %6214 = vmatprep.subr.bf16.mxu1 %v9358_v17  ;;  %v9389_v17 = vld [vmem:[%s13769_s9 + $0xa40] ss:$140 sps:$4 sm:$0xff]  }
 0x86d   :  { %6068 = vmatpush1.bf16.msra.mxu0 %v9353_v0 }
 0x86e   :  { %6215 = vmatpush1.bf16.msra.mxu1 %v9356_v24  ;;  %6069 = vmatprep.subr.bf16.mxu0 %v9361_v58 }
 0x86f   :  { %6216 = vmatprep.subr.bf16.mxu1 %v9364_v26 }
 0x871   :  { %6070 = vmatpush1.bf16.msra.mxu0 %v9359_v28 }
 0x872   :  { %6217 = vmatpush1.bf16.msra.mxu1 %v9362_v36  ;;  %6071 = vmatprep.subr.bf16.mxu0 %v9367_v3 }
 0x873   :  { %6218 = vmatprep.subr.bf16.mxu1 %v9370_v49  ;;  %v9400_v49 = vld [vmem:[%s13769_s9 + $0xb74] ss:$140 sps:$4 sm:$0xff]  }
 0x875   :  { %6072 = vmatpush1.bf16.msra.mxu0 %v9365_v46  ;;  %v6755_v46 = vrot.slane %v6741_v27, %v13056_v31  ;;  %v9403_v27 = vld [vmem:[%s13769_s9 + $0x7c] ss:$140 sps:$4 sm:$0xff]  }
 0x876   :  { %6219 = vmatpush1.bf16.msra.mxu1 %v9368_v44  ;;  %6073 = vmatprep.subr.bf16.mxu0 %v9373_v21 }
 0x877   :  { %6220 = vmatprep.subr.bf16.mxu1 %v9376_v57 }
 0x879   :  { %6074 = vmatpush1.bf16.msra.mxu0 %v9371_v52  ;;  %v9398_v52 = vld [vmem:[%s13769_s9 + $0xb70] ss:$140 sps:$4 sm:$0xff]  }
 0x87a   :  { %6221 = vmatpush1.bf16.msra.mxu1 %v9374_v18  ;;  %6075 = vmatprep.subr.bf16.mxu0 %v9379_v10 }
 0x87b   :  { %6222 = vmatprep.subr.bf16.mxu1 %v9382_v55 }
 0x87d   :  { %6076 = vmatpush1.bf16.msra.mxu0 %v9377_v7 }
 0x87e   :  { %6223 = vmatpush1.bf16.msra.mxu1 %v9380_v12  ;;  %6077 = vmatprep.subr.bf16.mxu0 %v9385_v54  ;;  %v5604_v15 = vpop.f32.mrb[84].mxu0 }
 0x87f   :  { %6224 = vmatprep.subr.bf16.mxu1 %v9388_v25  ;;  %v6339_v56 = vcombine.low %v12903_v40, %v5604_v15  ;;  %v13247_v29 = vpop.f32.mrb[112].mxu1  ;;  %v5606_v37 = vpop.f32.mrb[85].mxu0 }
 0x880   :  { %v6372_v34 = vcombine.low %v5604_v15, %v5606_v37  ;;  %v13252_v51 = vpop.f32.mrb[113].mxu1  ;;  %v5608_v9 = vpop.f32.mrb[86].mxu0  ;;  %v9401_v15 = vld [vmem:[%s13769_s9 + $0x78] ss:$140 sps:$4 sm:$0xff]  }
 0x881   :  { %6078 = vmatpush1.bf16.msra.mxu0 %v9383_v23  ;;  %v6353_v61 = vrot.slane %v6339_v56, %v13056_v31  ;;  %v6442_v40 = vcombine.high %v13247_v29, %v13252_v51  ;;  %v6708_v0 = vcombine.high %v12919_v59, %v5608_v9  ;;  %v13265_v24 = vpop.f32.mrb[114].mxu1  ;;  %v5610_v58 = vpop.f32.mrb[87].mxu0  ;;  %v9397_v59 = vld [vmem:[%s13769_s9 + $0xb5c] ss:$140 sps:$4 sm:$0xff]   ;;  %v9406_v56 = vld [vmem:[%s13769_s9 + $0x194] ss:$140 sps:$4 sm:$0xff]  }
 0x882   :  { %6225 = vmatpush1.bf16.msra.mxu1 %v9386_v14  ;;  %v6380_v5 = vrot.slane %v6372_v34, %v13056_v31  ;;  %6079 = vmatprep.subr.bf16.mxu0 %v9391_v20  ;;  %v6740_v26 = vcombine.high %v5608_v9, %v5610_v58  ;;  %v13275_v28 = vpop.f32.mrb[115].mxu1  ;;  %v9409_v34 = vld [vmem:[%s13769_s9 + $0x2ac] ss:$140 sps:$4 sm:$0xff]   ;;  %v9407_v9 = vld [vmem:[%s13769_s9 + $0x2a8] ss:$140 sps:$4 sm:$0xff]  }
 0x883   :  { %v6354_v1 = vcombine.high %v6346_v2, %v6353_v61  ;;  %6226 = vmatprep.subr.bf16.mxu1 %v9394_v50  ;;  %v6722_v36 = vrot.slane %v6708_v0, %v13056_v31  ;;  %v6807_v3 = vcombine.high %v13265_v24, %v13275_v28  ;;  %v9404_v50 = vld [vmem:[%s13769_s9 + $0x190] ss:$140 sps:$4 sm:$0xff]   ;;  %v9410_v61 = vld [vmem:[%s13769_s9 + $0x3c0] ss:$140 sps:$4 sm:$0xff]   ;;  %v9413_v0 = vld [vmem:[%s13769_s9 + $0x4d8] ss:$140 sps:$4 sm:$0xff]  }
 0x884   :  { %v6388_v44 = vcombine.low %v6380_v5, %v6387_v60  ;;  %v6748_v39 = vrot.slane %v6740_v26, %v13056_v31  ;;  %v9412_v2 = vld [vmem:[%s13769_s9 + $0x3c4] ss:$140 sps:$4 sm:$0xff]   ;;  %v9418_v58 = vld [vmem:[%s13769_s9 + $0x5f4] ss:$140 sps:$4 sm:$0xff]   ;;  %v9421_v5 = vld [vmem:[%s13769_s9 + $0x70c] ss:$140 sps:$4 sm:$0xff]  }
 0x885   :  { %v6723_v35 = vcombine.low %v6715_v38, %v6722_v36  ;;  %6080 = vmatpush1.bf16.msra.mxu0 %v9389_v17  ;;  %v6361_v21 = vrot.slane %v6354_v1, %v13056_v31  ;;  %v9415_v17 = vld [vmem:[%s13769_s9 + $0x4dc] ss:$140 sps:$4 sm:$0xff]   ;;  %v9424_v26 = vld [vmem:[%s13769_s9 + $0x824] ss:$140 sps:$4 sm:$0xff]  }
 0x886   :  { %6227 = vmatpush1.bf16.msra.mxu1 %v9392_v53  ;;  %v6756_v57 = vcombine.high %v6748_v39, %v6755_v46  ;;  %6081 = vmatprep.subr.bf16.mxu0 %v9397_v59  ;;  %v5614_v13 = vpop.f32.mrb[88].mxu0  ;;  %v6395_v18 = vrot.slane %v6388_v44, %v13056_v31  ;;  %v9416_v60 = vld [vmem:[%s13769_s9 + $0x5f0] ss:$140 sps:$4 sm:$0xff]   ;;  %v9419_v53 = vld [vmem:[%s13769_s9 + $0x708] ss:$140 sps:$4 sm:$0xff]  }
 0x887   :  { %6228 = vmatprep.subr.bf16.mxu1 %v9400_v49  ;;  %v5761_v10 = vpop.f32.mrb[116].mxu1  ;;  %6362 = vrot.lane.b32.xlu0 %v6361_v21, %s9507_s25  ;;  %v5615_v55 = vpop.f32.mrb[89].mxu0  ;;  %v6730_v7 = vrot.slane %v6723_v35, %v13056_v31  ;;  %v9422_v59 = vld [vmem:[%s13769_s9 + $0x820] ss:$140 sps:$4 sm:$0xff]   ;;  %v9427_v38 = vld [vmem:[%s13769_s9 + $0x93c] ss:$140 sps:$4 sm:$0xff]  }
 0x888   :  { %v5762_v12 = vpop.f32.mrb[117].mxu1  ;;  %v5616_v54 = vpop.f32.mrb[90].mxu0  ;;  %v6396_v25 = vcombine.high %v6395_v18, %v6395_v18  ;;  %v6763_v37 = vrot.slane %v6756_v57, %v13056_v31  ;;  %v9425_v1 = vld [vmem:[%s13769_s9 + $0x938] ss:$140 sps:$4 sm:$0xff]   ;;  %v9430_v49 = vld [vmem:[%s13769_s9 + $0xa54] ss:$140 sps:$4 sm:$0xff]  }
 0x889   :  { %6082 = vmatpush1.bf16.msra.mxu0 %v9395_v11  ;;  %v5763_v23 = vpop.f32.mrb[118].mxu1  ;;  %6731 = vrot.lane.b32.xlu1 %v6730_v7, %s9507_s25  ;;  %v5617_v14 = vpop.f32.mrb[91].mxu0  ;;  %v9433_v7 = vld [vmem:[%s13769_s9 + $0xb6c] ss:$140 sps:$4 sm:$0xff]  }
 0x88a   :  { %6229 = vmatpush1.bf16.msra.mxu1 %v9398_v52  ;;  %6159 = vmatprep.subr.bf16.mxu0 %v9403_v27  ;;  %v5764_v20 = vpop.f32.mrb[119].mxu1  ;;  %v9428_v52 = vld [vmem:[%s13769_s9 + $0xa50] ss:$140 sps:$4 sm:$0xff]  }
 0x88b   :  { %6397 = vrot.lane.b32.xlu0 %v6396_v25, %s9508_s27 }
 0x88c   :  { %6094 = vmatmul.mubr.bf16.vlgmr.msra.gmra.mrb[124].mxu0 %v12186_v32 }
 0x88d   :  { %6241 = vmatmul.mubr.bf16.vlgmr.msra.gmra.mrb[152].mxu1 %v12186_v32  ;;  %8138 = vmatprep.mubr.msk.bf16.mxu0 %vm5416_vm4, %v12214_v6 }
 0x88e   :  { %6160 = vmatpush1.bf16.msra.mxu0 %v9401_v15  ;;  %8144 = vmatprep.mubr.msk.bf16.mxu1 %vm5416_vm4, %v12214_v6 }
 0x88f   :  { %6161 = vmatprep.subr.bf16.mxu0 %v9406_v56  ;;  %6764 = vrot.lane.b32.xlu1 %v6763_v37, %s9508_s27 }
 0x892   :  { %6162 = vmatpush1.bf16.msra.mxu0 %v9404_v50 }
 0x893   :  { %6163 = vmatprep.subr.bf16.mxu0 %v9409_v34 }
 0x894   :  { %6102 = vmatmul.mubr.bf16.gmra.mrb[128].mxu0 %v12226_v22 }
 0x895   :  { %6249 = vmatmul.mubr.bf16.gmra.mrb[156].mxu1 %v12226_v22  ;;  %8141 = vmatprep.mubr.msk.bf16.mxu0 %vm5416_vm4, %v12188_v4 }
 0x896   :  { %6164 = vmatpush1.bf16.msra.mxu0 %v9407_v9 }
 0x897   :  { %6165 = vmatprep.subr.bf16.mxu0 %v9412_v2 }
 0x89a   :  { %6166 = vmatpush1.bf16.msra.mxu0 %v9410_v61  ;;  %v9434_v61 = vld [vmem:[%s13769_s9 + $0x88] ss:$140 sps:$4 sm:$0xff]  }
 0x89b   :  { %6167 = vmatprep.subr.bf16.mxu0 %v9415_v17 }
 0x89e   :  { %6168 = vmatpush1.bf16.msra.mxu0 %v9413_v0  ;;  %v9509_v0 = vmov 0  }
 0x89f   :  { %6169 = vmatprep.subr.bf16.mxu0 %v9418_v58 }
 0x8a2   :  { %6170 = vmatpush1.bf16.msra.mxu0 %v9416_v60 }
 0x8a3   :  { %6171 = vmatprep.subr.bf16.mxu0 %v9421_v5  ;;  %v9435_v5 = vld [vmem:[%s13769_s9 + $0x1a0] ss:$140 sps:$4 sm:$0xff]  }
 0x8a6   :  { %6172 = vmatpush1.bf16.msra.mxu0 %v9419_v53  ;;  %v9436_v53 = vld [vmem:[%s13769_s9 + $0x2b8] ss:$140 sps:$4 sm:$0xff]  }
 0x8a7   :  { %6173 = vmatprep.subr.bf16.mxu0 %v9424_v26  ;;  %v9437_v26 = vld [vmem:[%s13769_s9 + $0x3d0] ss:$140 sps:$4 sm:$0xff]  }
 0x8aa   :  { %6174 = vmatpush1.bf16.msra.mxu0 %v9422_v59  ;;  %v9438_v59 = vld [vmem:[%s13769_s9 + $0x4e8] ss:$140 sps:$4 sm:$0xff]  }
 0x8ab   :  { %6175 = vmatprep.subr.bf16.mxu0 %v9427_v38  ;;  %v5702_v36 = vpop.f32.mrb[92].mxu0  ;;  %v9439_v38 = vld [vmem:[%s13769_s9 + $0x600] ss:$140 sps:$4 sm:$0xff]  }
 0x8ac   :  { %v6407_v46 = vcombine.low %v13065_v43, %v5702_v36  ;;  %v13377_v44 = vpop.f32.mrb[120].mxu1  ;;  %v5704_v39 = vpop.f32.mrb[93].mxu0  ;;  %v9442_v36 = vld [vmem:[%s13769_s9 + $0x948] ss:$140 sps:$4 sm:$0xff]  }
 0x8ad   :  { %v6408_v35 = vcombine.low %v5704_v39, %v13247_v29  ;;  %v13380_v11 = vpop.f32.mrb[121].mxu1  ;;  %v5706_v21 = vpop.f32.mrb[94].mxu0 }
 0x8ae   :  { %6176 = vmatpush1.bf16.msra.mxu0 %v9425_v1  ;;  %v6415_v57 = vrot.slane %v6407_v46, %v13056_v31  ;;  %v6773_v13 = vcombine.high %v13082_v48, %v5706_v21  ;;  %v5854_v27 = vpop.f32.mrb[122].mxu1  ;;  %v5708_v18 = vpop.f32.mrb[95].mxu0  ;;  %v9431_v48 = vld [vmem:[%s13769_s9 + $0xb68] ss:$140 sps:$4 sm:$0xff]   ;;  %v9441_v1 = vld [vmem:[%s13769_s9 + $0x830] ss:$140 sps:$4 sm:$0xff]  }
 0x8af   :  { %v6422_v43 = vrot.slane %v6408_v35, %v13056_v31  ;;  %6177 = vmatprep.subr.bf16.mxu0 %v9430_v49  ;;  %v6774_v10 = vcombine.high %v5708_v18, %v13265_v24  ;;  %v5855_v55 = vpop.f32.mrb[123].mxu1 }
 0x8b0   :  { %v6781_v12 = vrot.slane %v6773_v13, %v13056_v31  ;;  %v9443_v13 = vld [vmem:[%s13769_s9 + $0xa60] ss:$140 sps:$4 sm:$0xff]  }
 0x8b1   :  { %v6423_v54 = vcombine.high %v6415_v57, %v6422_v43  ;;  %v6788_v25 = vrot.slane %v6774_v10, %v13056_v31  ;;  %v6450_v10 = vrot.slane %v6442_v40, %v13056_v31 }
 0x8b2   :  { %6178 = vmatpush1.bf16.msra.mxu0 %v9428_v52 }
 0x8b3   :  { %v6789_v23 = vcombine.low %v6781_v12, %v6788_v25  ;;  %6179 = vmatprep.subr.bf16.mxu0 %v9433_v7  ;;  %v5712_v14 = vpop.f32.mrb[96].mxu0  ;;  %v6430_v15 = vrot.slane %v6423_v54, %v13056_v31  ;;  %v6815_v12 = vrot.slane %v6807_v3, %v13056_v31 }
 0x8b4   :  { %v13398_v20 = vpop.f32.mrb[124].mxu1  ;;  %v5713_v56 = vpop.f32.mrb[97].mxu0 }
 0x8b5   :  { %v13400_v37 = vpop.f32.mrb[125].mxu1  ;;  %v5714_v50 = vpop.f32.mrb[98].mxu0  ;;  %v6431_v34 = vcombine.high %v6430_v15, %v6430_v15  ;;  %v6796_v9 = vrot.slane %v6789_v23, %v13056_v31 }
 0x8b6   :  { %6180 = vmatpush1.bf16.msra.mxu0 %v9431_v48  ;;  %v5862_v2 = vpop.f32.mrb[126].mxu1  ;;  %v5715_v17 = vpop.f32.mrb[99].mxu0  ;;  %v9444_v48 = vld [vmem:[%s13769_s9 + $0xb78] ss:$140 sps:$4 sm:$0xff]  }
 0x8b7   :  { %6257 = vmatprep.subr.bf16.mxu0 %v9509_v0  ;;  %v5863_v58 = vpop.f32.mrb[127].mxu1  ;;  %6432 = vrot.lane.b32.xlu0 %v6431_v34, %s9510_s26  ;;  %v6797_v60 = vcombine.high %v6796_v9, %v6796_v9 }
 0x8b9   :  { %6192 = vmatmul.mubr.bf16.vlgmr.msra.gmra.mrb[132].mxu0 %v12186_v32  ;;  %6798 = vrot.lane.b32.xlu1 %v6797_v60, %s9510_s26  ;;  %s9513_s26 = smov 32  }
 0x8ba   :  { %8142 = vmatprep.mubr.msk.bf16.mxu0 %vm5416_vm4, %v12214_v6  ;;  %6258 = vmatpush1.bf16.msra.mxu0 %v9434_v61 }
 0x8bb   :  { %6259 = vmatprep.subr.bf16.mxu0 %v9509_v0 }
 0x8be   :  { %6260 = vmatpush1.bf16.msra.mxu0 %v9435_v5 }
 0x8bf   :  { %6261 = vmatprep.subr.bf16.mxu0 %v9509_v0 }
 0x8c1   :  { %6200 = vmatmul.mubr.bf16.gmra.mrb[136].mxu0 %v12226_v22 }
 0x8c2   :  { %6262 = vmatpush1.bf16.msra.mxu0 %v9436_v53  ;;  %8145 = vmatprep.mubr.msk.bf16.mxu0 %vm5416_vm4, %v12188_v4  ;;  %v9440_v4 = vld [vmem:[%s13769_s9 + $0x718] ss:$140 sps:$4 sm:$0xff]   ;;  %s9512_s9 = smov 48  }
 0x8c3   :  { %6263 = vmatprep.subr.bf16.mxu0 %v9509_v0 }
 0x8c6   :  { %6264 = vmatpush1.bf16.msra.mxu0 %v9437_v26 }
 0x8c7   :  { %6265 = vmatprep.subr.bf16.mxu0 %v9509_v0 }
 0x8ca   :  { %6266 = vmatpush1.bf16.msra.mxu0 %v9438_v59 }
 0x8cb   :  { %6267 = vmatprep.subr.bf16.mxu0 %v9509_v0 }
 0x8ce   :  { %6268 = vmatpush1.bf16.msra.mxu0 %v9439_v38 }
 0x8cf   :  { %6269 = vmatprep.subr.bf16.mxu0 %v9509_v0 }
 0x8d2   :  { %6270 = vmatpush1.bf16.msra.mxu0 %v9440_v4 }
 0x8d3   :  { %6271 = vmatprep.subr.bf16.mxu0 %v9509_v0 }
 0x8d6   :  { %6272 = vmatpush1.bf16.msra.mxu0 %v9441_v1 }
 0x8d7   :  { %6273 = vmatprep.subr.bf16.mxu0 %v9509_v0 }
 0x8d8   :  { %v5800_v49 = vpop.f32.mrb[100].mxu0 }
 0x8d9   :  { %v5948_v46 = vpop.f32.mrb[128].mxu1  ;;  %v5802_v39 = vpop.f32.mrb[101].mxu0 }
 0x8da   :  { %6274 = vmatpush1.bf16.msra.mxu0 %v9442_v36  ;;  %v6443_v35 = vcombine.high %v5800_v49, %v5802_v39  ;;  %v6476_v21 = vcombine.high %v5802_v39, %v13377_v44  ;;  %v13446_v57 = vpop.f32.mrb[129].mxu1  ;;  %v5804_v52 = vpop.f32.mrb[102].mxu0 }
 0x8db   :  { %v6510_v27 = vcombine.high %v5948_v46, %v13446_v57  ;;  %6275 = vmatprep.subr.bf16.mxu0 %v9509_v0  ;;  %v5952_v18 = vpop.f32.mrb[130].mxu1  ;;  %v5806_v43 = vpop.f32.mrb[103].mxu0 }
 0x8dc   :  { %v6457_v44 = vrot.slane %v6443_v35, %v13056_v31  ;;  %v6808_v55 = vcombine.high %v5804_v52, %v5806_v43  ;;  %v5953_v7 = vpop.f32.mrb[131].mxu1  ;;  %v6484_v26 = vrot.slane %v6476_v21, %v13056_v31 }
 0x8dd   :  { %v6524_v4 = vrot.slane %v6510_v27, %v13056_v31 }
 0x8de   :  { %v6458_v54 = vcombine.low %v6450_v10, %v6457_v44  ;;  %6276 = vmatpush1.bf16.msra.mxu0 %v9443_v13  ;;  %v6822_v25 = vrot.slane %v6808_v55, %v13056_v31 }
 0x8df   :  { %6277 = vmatprep.subr.bf16.mxu0 %v9509_v0 }
 0x8e0   :  { %v6823_v29 = vcombine.high %v6815_v12, %v6822_v25  ;;  %v5810_v51 = vpop.f32.mrb[104].mxu0  ;;  %v6465_v40 = vrot.slane %v6458_v54, %v13056_v31 }
 0x8e1   :  { %v5956_v23 = vpop.f32.mrb[132].mxu1  ;;  %v5811_v14 = vpop.f32.mrb[105].mxu0 }
 0x8e2   :  { %6278 = vmatpush1.bf16.msra.mxu0 %v9444_v48  ;;  %v6842_v24 = vcombine.low %v5811_v14, %v13398_v20  ;;  %v13469_v28 = vpop.f32.mrb[133].mxu1  ;;  %6466 = vrot.lane.b32.xlu0 %v6465_v40, %s9511_s7  ;;  %v5813_v3 = vpop.f32.mrb[106].mxu0  ;;  %v6830_v15 = vrot.slane %v6823_v29, %v13056_v31 }
 0x8e3   :  { %v6876_v56 = vcombine.low %v5956_v23, %v13469_v28  ;;  %v5960_v50 = vpop.f32.mrb[134].mxu1  ;;  %v5814_v34 = vpop.f32.mrb[107].mxu0  ;;  %7337 = vmatprep.subr.bf16.mxu0 %v9509_v0 }
 0x8e4   :  { %v5961_v9 = vpop.f32.mrb[135].mxu1  ;;  %v6831_v2 = vcombine.high %v6830_v15, %v6830_v15  ;;  %v6850_v43 = vrot.slane %v6842_v24, %v13056_v31 }
 0x8e5   :  { %6290 = vmatmul.mubr.bf16.vlgmr.msra.gmra.mrb[140].mxu0 %v12186_v32  ;;  %v6890_v7 = vrot.slane %v6876_v56, %v13056_v31 }
 0x8e6   :  { %8146 = vmatprep.mubr.msk.bf16.mxu0 %vm5416_vm4, %v12214_v6  ;;  %6832 = vrot.lane.b32.xlu1 %v6831_v2, %s9511_s7  ;;  %s9516_s7 = smov [#allocation2]  }
 0x8ed   :  { %6297 = vmatmul.mubr.bf16.gmra.mrb[144].mxu0 %v12226_v22 }
 0x905   :  { %v5899_v20 = vpop.f32.mrb[108].mxu0 }
 0x906   :  { %v6477_v61 = vcombine.high %v13380_v11, %v5899_v20  ;;  %v6046_v17 = vpop.f32.mrb[136].mxu1  ;;  %v5901_v58 = vpop.f32.mrb[109].mxu0 }
 0x907   :  { %v6509_v60 = vcombine.high %v5899_v20, %v5901_v58  ;;  %v6048_v5 = vpop.f32.mrb[137].mxu1  ;;  %v5903_v53 = vpop.f32.mrb[110].mxu0 }
 0x908   :  { %v6491_v59 = vrot.slane %v6477_v61, %v13056_v31  ;;  %v6049_v38 = vpop.f32.mrb[138].mxu1  ;;  %v5904_v32 = vpop.f32.mrb[111].mxu0 }
 0x909   :  { %v6517_v6 = vrot.slane %v6509_v60, %v13056_v31  ;;  %v13483_v1 = vpop.f32.mrb[139].mxu1 }
 0x90a   :  { %v6492_v22 = vcombine.high %v6484_v26, %v6491_v59 }
 0x90b   :  { %v6525_v36 = vcombine.low %v6517_v6, %v6524_v4 }
 0x90c   :  { %v6499_v11 = vrot.slane %v6492_v22, %v13056_v31 }
 0x90d   :  { %v5907_v49 = vpop.f32.mrb[112].mxu0  ;;  %v6532_v46 = vrot.slane %v6525_v36, %v13056_v31 }
 0x90e   :  { %v6843_v39 = vcombine.low %v13400_v37, %v5907_v49  ;;  %v6054_v35 = vpop.f32.mrb[140].mxu1  ;;  %6500 = vrot.lane.b32.xlu0 %v6499_v11, %s9512_s9  ;;  %v5909_v21 = vpop.f32.mrb[113].mxu0 }
 0x90f   :  { %v13488_v52 = vpop.f32.mrb[141].mxu1  ;;  %v6875_v13 = vcombine.low %v5907_v49, %v5909_v21  ;;  %v5911_v27 = vpop.f32.mrb[114].mxu0  ;;  %v6533_v18 = vcombine.high %v6532_v46, %v6532_v46 }
 0x910   :  { %v6857_v10 = vrot.slane %v6843_v39, %v13056_v31  ;;  %v6058_v44 = vpop.f32.mrb[142].mxu1  ;;  %v5912_v55 = vpop.f32.mrb[115].mxu0 }
 0x911   :  { %v6883_v12 = vrot.slane %v6875_v13, %v13056_v31  ;;  %v6059_v37 = vpop.f32.mrb[143].mxu1 }
 0x912   :  { %v6858_v54 = vcombine.low %v6850_v43, %v6857_v10  ;;  %6534 = vrot.lane.b32.xlu0 %v6533_v18, %s9513_s26 }
 0x913   :  { %v6891_v25 = vcombine.high %v6883_v12, %v6890_v7 }
 0x914   :  { %v6865_v48 = vrot.slane %v6858_v54, %v13056_v31 }
 0x915   :  { %v6898_v29 = vrot.slane %v6891_v25, %v13056_v31 }
 0x916   :  { %6866 = vrot.lane.b32.xlu1 %v6865_v48, %s9512_s9  ;;  %s7497_s9 = sshll.u32 %s9516_s7, 4  ;;  %s7498_s9 = int_to_ptr.vmem [resolvable:$true] %s7497_s9 }
 0x917   :  { %p9483_p1 = scmp.lt.s32.totalorder %s7498_s9, %s7498_s9 }
 0x91a   :  { %6899 = vrot.lane.b32.xlu1 %v6898_v29, %s9513_s26 }
 0x932   :  { %v5997_v51 = vpop.f32.mrb[116].mxu0 }
 0x933   :  { %v6544_v40 = vcombine.high %v13446_v57, %v5997_v51  ;;  %v6144_v23 = vpop.f32.mrb[144].mxu1  ;;  %v5999_v14 = vpop.f32.mrb[117].mxu0 }
 0x934   :  { %v6545_v24 = vcombine.high %v5999_v14, %v6046_v17  ;;  %v6145_v3 = vpop.f32.mrb[145].mxu1  ;;  %v6001_v15 = vpop.f32.mrb[118].mxu0 }
 0x935   :  { %v6552_v56 = vrot.slane %v6544_v40, %v13056_v31  ;;  %v6146_v50 = vpop.f32.mrb[146].mxu1  ;;  %v6002_v34 = vpop.f32.mrb[119].mxu0 }
 0x936   :  { %v6559_v9 = vrot.slane %v6545_v24, %v13056_v31  ;;  %v6148_v2 = vpop.f32.mrb[147].mxu1 }
 0x937   :  { %v6608_v20 = vcombine.low %v6146_v50, %v6148_v2  ;;  %v6363_v2 = vpop.permute.xlu0 %6362 }
 0x938   :  { %v6560_v61 = vcombine.high %v6552_v56, %v6559_v9 }
 0x93a   :  { %v6005_v58 = vpop.f32.mrb[120].mxu0  ;;  %v6567_v60 = vrot.slane %v6560_v61, %v13056_v31 }
 0x93b   :  { %v6908_v5 = vcombine.low %v13469_v28, %v6005_v58  ;;  %v13501_v57 = vpop.f32.mrb[148].mxu1  ;;  %v6007_v53 = vpop.f32.mrb[121].mxu0 }
 0x93c   :  { %v6909_v17 = vcombine.low %v6007_v53, %v6054_v35  ;;  %v13503_v26 = vpop.f32.mrb[149].mxu1  ;;  %v6009_v59 = vpop.f32.mrb[122].mxu0  ;;  %v6568_v38 = vcombine.high %v6567_v60, %v6567_v60  ;;  %v6616_v60 = vrot.slane %v6608_v20, %v13056_v31  ;;  %v9449_v20 = vld [vmem:[%s13771_s11 + $0x48] sm:$0xff]  }
 0x93d   :  { %v6916_v32 = vrot.slane %v6908_v5, %v13056_v31  ;;  %v6973_v4 = vcombine.high %v13501_v57, %v13503_v26  ;;  %v6156_v6 = vpop.f32.mrb[150].mxu1  ;;  %v6010_v22 = vpop.f32.mrb[123].mxu0  ;;  %v9445_v59 = vld [vmem:[%s13771_s11 + $0x80] sm:$0xff]  }
 0x93e   :  { %v6923_v36 = vrot.slane %v6909_v17, %v13056_v31  ;;  %v6157_v11 = vpop.f32.mrb[151].mxu1  ;;  %6569 = vrot.lane.b32.xlu0 %v6568_v38, %s9514_s0  ;;  %v9446_v38 = vld [vmem:[%s13771_s11 + $0x40] sm:$0xff]   ;;  %v6398_v22 = vpop.permute.xlu0 %6397  ;;  %7338 = vmatpush1.bf16.msra.mxu0 %v9445_v59 }
 0x93f   :  { %8183 = vmatprep.subr.bf16.mxu1 %v9446_v38  ;;  %7339 = vmatprep.subr.bf16.mxu0 %v9509_v0 }
 0x940   :  { %v6924_v28 = vcombine.low %v6916_v32, %v6923_v36  ;;  %v9447_v32 = vld [vmem:[%s13771_s11] sm:$0xff]  }
 0x941   :  { %8184 = vmatpush3.bf16.msra.mxu1 %v9447_v32 }
 0x942   :  { %v6931_v49 = vrot.slane %v6924_v28, %v13056_v31  ;;  %8185 = vmatprep.subr.bf16.mxu1 %v9449_v20 }
 0x944   :  { %v6932_v46 = vcombine.high %v6931_v49, %v6931_v49 }
 0x946   :  { %6933 = vrot.lane.b32.xlu1 %v6932_v46, %s9514_s0  ;;  %v9448_v46 = vld [vmem:[%s13771_s11 + $0x88] sm:$0xff]  }
 0x947   :  { %7340 = vmatpush1.bf16.msra.mxu0 %v9448_v46 }
 0x948   :  { %7341 = vmatprep.subr.bf16.mxu0 %v9509_v0 }
 0x95f   :  { %v6095_v39 = vpop.f32.mrb[124].mxu0 }
 0x960   :  { %v6242_v35 = vpop.f32.mrb[152].mxu1  ;;  %v6096_v21 = vpop.f32.mrb[125].mxu0 }
 0x961   :  { %v6243_v13 = vpop.f32.mrb[153].mxu1  ;;  %v6097_v27 = vpop.f32.mrb[126].mxu0  ;;  %v9450_v35 = vld [vmem:[%s13771_s11 + $0x8] sm:$0xff]  }
 0x962   :  { %v6579_v18 = vcombine.low %v13483_v1, %v6097_v27  ;;  %v13511_v43 = vpop.f32.mrb[154].mxu1  ;;  %v6099_v10 = vpop.f32.mrb[127].mxu0  ;;  %v6981_v13 = vrot.slane %v6973_v4, %v13056_v31  ;;  %8186 = vmatpush3.bf16.msra.mxu1 %v9450_v35  ;;  %v9455_v4 = vld [vmem:[%s13771_s11 + $0x58] sm:$0xff]  }
 0x963   :  { %v6580_v44 = vcombine.low %v6099_v10, %v6146_v50  ;;  %v13513_v55 = vpop.f32.mrb[155].mxu1  ;;  %v6732_v21 = vpop.permute.xlu1 %6731 }
 0x964   :  { %v13516_v7 = vrot.slane %v6579_v18, %v13056_v31  ;;  %v9452_v18 = vld [vmem:[%s13771_s11 + $0x50] sm:$0xff]   ;;  %v6433_v10 = vpop.permute.xlu0 %6432  ;;  %v6733_v32 = vrot.slane %v6732_v21, 1 }
 0x965   :  { %v13519_v12 = vrot.slane %v6580_v44, %v13056_v31  ;;  %8187 = vmatprep.subr.bf16.mxu1 %v9452_v18  ;;  %v6434_v33 = vrot.slane %v6433_v10, 1 }
 0x967   :  { %v6595_v37 = vcombine.low %v13516_v7, %v13519_v12  ;;  %v6103_v54 = vpop.f32.mrb[128].mxu0 }
 0x968   :  { %v6943_v25 = vcombine.low %v13488_v52, %v6103_v54  ;;  %v13524_v48 = vpop.f32.mrb[156].mxu1  ;;  %v6105_v1 = vpop.f32.mrb[129].mxu0  ;;  %v9451_v54 = vld [vmem:[%s13771_s11 + $0x90] sm:$0xff]  }
 0x969   :  { %v6944_v29 = vcombine.low %v6105_v1, %v13501_v57  ;;  %v13527_v51 = vpop.f32.mrb[157].mxu1  ;;  %v6107_v40 = vpop.f32.mrb[130].mxu0  ;;  %v9453_v57 = vld [vmem:[%s13771_s11 + $0x10] sm:$0xff]   ;;  %7342 = vmatpush1.bf16.msra.mxu0 %v9451_v54 }
 0x96a   :  { %v13530_v23 = vrot.slane %v6943_v25, %v13056_v31  ;;  %v6254_v14 = vpop.f32.mrb[158].mxu1  ;;  %v6108_v24 = vpop.f32.mrb[131].mxu0  ;;  %7343 = vmatprep.subr.bf16.mxu0 %v9509_v0  ;;  %8188 = vmatpush3.bf16.msra.mxu1 %v9453_v57  ;;  %v9456_v40 = vld [vmem:[%s13771_s11 + $0x18] sm:$0xff]  }
 0x96b   :  { %v13533_v3 = vrot.slane %v6944_v29, %v13056_v31  ;;  %v6255_v15 = vpop.f32.mrb[159].mxu1  ;;  %v6765_v25 = vpop.permute.xlu1 %6764  ;;  %v9454_v29 = vld [vmem:[%s13771_s11 + $0x98] sm:$0xff]   ;;  %8189 = vmatprep.subr.bf16.mxu1 %v9455_v4  ;;  %v6364_v14 = vrot.slane %v6363_v2, 1  ;;  %v6332_v24 = vrot.slane %v6325_v30, %v13056_v31 }
 0x96c   :  { %v6467_v1 = vpop.permute.xlu0 %6466  ;;  %v6766_v62 = vrot.slane %v6765_v25, 1 }
 0x96d   :  { %v6959_v52 = vcombine.high %v13530_v23, %v13533_v3  ;;  %7344 = vmatpush1.bf16.msra.mxu0 %v9454_v29  ;;  %v6366_v19 = vsel %vm6365_vm5, %v6363_v2, %v6364_v14  ;;  %v6436_v2 = vsel %vm6435_vm7, %v6433_v10, %v6434_v33 }
 0x96e   :  { %7345 = vmatprep.subr.bf16.mxu0 %v9509_v0  ;;  %8190 = vmatpush3.bf16.msra.mxu1 %v9456_v40  ;;  %v6767_v18 = vsel %vm6400_vm6, %v6765_v25, %v6766_v62  ;;  %v6602_v25 = vrot.slane %v6595_v37, %v13056_v31  ;;  %v9459_v37 = vld [vmem:[%s13771_s11 + $0x20] sm:$0xff]   ;;  %v9463_v62 = vld [vmem:[%s13771_s11 + $0xb0] sm:$0xff]  }
 0x96f   :  { %v6799_v15 = vpop.permute.xlu1 %6798 }
 0x98c   :  { %v6193_v56 = vpop.f32.mrb[132].mxu0 }
 0x98d   :  { %v6194_v50 = vpop.f32.mrb[133].mxu0  ;;  %v6501_v56 = vpop.permute.xlu0 %6500 }
 0x98e   :  { %v6195_v34 = vpop.f32.mrb[134].mxu0  ;;  %v9457_v50 = vld [vmem:[%s13771_s11 + $0xa0] sm:$0xff]   ;;  %v6502_v20 = vrot.slane %v6501_v56, 1 }
 0x98f   :  { %v13537_v9 = vpop.f32.mrb[135].mxu0  ;;  %7346 = vmatpush1.bf16.msra.mxu0 %v9457_v50 }
 0x990   :  { %v6609_v61 = vcombine.low %v6195_v34, %v13537_v9  ;;  %v6641_v58 = vcombine.low %v13537_v9, %v13511_v43  ;;  %v6304_v34 = vld [vmem:[%s13770_s10] sm:$0xf]  ;;  %7347 = vmatprep.subr.bf16.mxu0 %v9509_v0  ;;  %v6503_v35 = vsel %vm5416_vm4, %v6501_v56, %v6502_v20  ;;  %v9461_v20 = vld [vmem:[%s13771_s11 + $0x68] sm:$0xff]   ;;  %v9466_v43 = vld [vmem:[%s13771_s11 + $0xb8] sm:$0xff]  }
 0x991   :  { %v6334_v30 = vadd.f32 %v6332_v24, %v6304_v34  ;;  %v6535_v38 = vpop.permute.xlu0 %6534 }
 0x992   :  { %v6623_v5 = vrot.slane %v6609_v61, %v13056_v31  ;;  %v6399_v61 = vrot.slane %v6398_v22, 1 }
 0x993   :  { %v6368_v59 = vadd.f32 %v6366_v19, %v6334_v30 }
 0x994   :  { %v6624_v53 = vcombine.high %v6616_v60, %v6623_v5  ;;  %v6201_v17 = vpop.f32.mrb[136].mxu0  ;;  %v6700_v60 = vrot.slane %v6693_v16, %v13056_v31  ;;  %v6833_v5 = vpop.permute.xlu1 %6832  ;;  %v6536_v16 = vrot.slane %v6535_v38, 1 }
 0x995   :  { %v13553_v6 = vpop.f32.mrb[137].mxu0  ;;  %v6834_v10 = vrot.slane %v6833_v5, 1 }
 0x996   :  { %v6974_v36 = vcombine.high %v6201_v17, %v13553_v6  ;;  %v7006_v11 = vcombine.high %v13553_v6, %v13524_v48  ;;  %v6205_v28 = vpop.f32.mrb[138].mxu0  ;;  %v6631_v49 = vrot.slane %v6624_v53, %v13056_v31  ;;  %v6401_v53 = vsel %vm6400_vm6, %v6398_v22, %v6399_v61 }
 0x997   :  { %v6206_v39 = vpop.f32.mrb[139].mxu0  ;;  %v6468_v17 = vrot.slane %v6467_v1, 1  ;;  %v6403_v28 = vadd.f32 %v6401_v53, %v6368_v59  ;;  %v6734_v22 = vsel %vm6365_vm5, %v6732_v21, %v6733_v32  ;;  %v6835_v24 = vsel %vm6469_vm8, %v6833_v5, %v6834_v10 }
 0x998   :  { %v6988_v27 = vrot.slane %v6974_v36, %v13056_v31  ;;  %6632 = vrot.lane.b32.xlu0 %v6631_v49, %s9507_s25  ;;  %v6701_v36 = vcombine.high %v6700_v60, %v6700_v60  ;;  %v6867_v49 = vpop.permute.xlu1 %6866  ;;  %v6800_v39 = vrot.slane %v6799_v15, 1  ;;  %v9458_v60 = vld [vmem:[%s13771_s11 + $0x60] sm:$0xff]   ;;  %v6966_v5 = vrot.slane %v6959_v52, %v13056_v31 }
 0x999   :  { %v6470_v8 = vsel %vm6469_vm8, %v6467_v1, %v6468_v17  ;;  %v6438_v46 = vadd.f32 %v6436_v2, %v6403_v28  ;;  %v6868_v29 = vrot.slane %v6867_v49, 1  ;;  %v9460_v17 = vld [vmem:[%s13771_s11 + $0xa8] sm:$0xff]   ;;  %8191 = vmatprep.subr.bf16.mxu1 %v9458_v60 }
 0x99a   :  { %v6989_v44 = vcombine.low %v6981_v13, %v6988_v27  ;;  %v6703_v13 = vadd.f32 %v6701_v36, %v6304_v34  ;;  %v6801_v1 = vsel %vm6435_vm7, %v6799_v15, %v6800_v39  ;;  %8192 = vmatpush3.bf16.msra.mxu1 %v9459_v37  ;;  %7348 = vmatpush1.bf16.msra.mxu0 %v9460_v17 }
 0x99b   :  { %v6472_v27 = vadd.f32 %v6470_v8, %v6438_v46  ;;  %v6869_v19 = vsel %vm5416_vm4, %v6867_v49, %v6868_v29  ;;  %7349 = vmatprep.subr.bf16.mxu0 %v9509_v0  ;;  %v6967_v28 = vcombine.high %v6966_v5, %v6966_v5  ;;  %v9462_v49 = vld [vmem:[%s13771_s11 + $0x28] sm:$0xff]   ;;  %8193 = vmatprep.subr.bf16.mxu1 %v9461_v20 }
 0x99c   :  { %v6996_v26 = vrot.slane %v6989_v44, %v13056_v31  ;;  %v6538_v44 = vsel %vm6537_vm9, %v6535_v38, %v6536_v16  ;;  %v6736_v54 = vadd.f32 %v6734_v22, %v6703_v13  ;;  %v9464_v22 = vld [vmem:[%s13771_s11 + $0x70] sm:$0xff]  }
 0x99d   :  { %v6505_v57 = vadd.f32 %v6503_v35, %v6472_v27  ;;  %v9465_v35 = vld [vmem:[%s13771_s11 + $0x30] sm:$0xff]  }
 0x99e   :  { %6997 = vrot.lane.b32.xlu1 %v6996_v26, %s9507_s25  ;;  %v6900_v26 = vpop.permute.xlu1 %6899  ;;  %v6769_v14 = vadd.f32 %v6767_v18, %v6736_v54  ;;  %8194 = vmatpush3.bf16.msra.mxu1 %v9462_v49  ;;  %v7014_v18 = vrot.slane %v7006_v11, %v13056_v31  ;;  %v9475_v49 = vld [vmem:[%s13773_s13 + $0x28] sm:$0xff]  }
 0x99f   :  { %v6540_v21 = vadd.f32 %v6538_v44, %v6505_v57  ;;  %v6901_v56 = vrot.slane %v6900_v26, 1  ;;  %7350 = vmatpush1.bf16.msra.mxu0 %v9463_v62  ;;  %8195 = vmatprep.subr.bf16.mxu1 %v9464_v22  ;;  %v9468_v57 = vld [vmem:[%s13771_s11 + $0x38] sm:$0xff]   ;;  %v9476_v62 = vld [vmem:[%s13773_s13 + $0x30] sm:$0xff]  }
 0x9a0   :  { %v6803_v34 = vadd.f32 %v6801_v1, %v6769_v14  ;;  %7351 = vmatprep.subr.bf16.mxu0 %v9509_v0 }
 0x9a1   :  { %v6902_v30 = vsel %vm6537_vm9, %v6900_v26, %v6901_v56  ;;  %v9469_v26 = vld [vmem:[%s13771_s11 + $0xc0] sm:$0xff]  }
 0x9a2   :  { %v6837_v33 = vadd.f32 %v6835_v24, %v6803_v34  ;;  %8196 = vmatpush3.bf16.msra.mxu1 %v9465_v35 }
 0x9a3   :  { %7352 = vmatpush1.bf16.msra.mxu0 %v9466_v43 }
 0x9a4   :  { %v6871_v53 = vadd.f32 %v6869_v19, %v6837_v33  ;;  %7353 = vmatprep.subr.bf16.mxu0 %v9509_v0 }
 0x9a6   :  { %v6904_v32 = vadd.f32 %v6902_v30, %v6871_v53 }
 0x9a7   :  { %7354 = vmatpush1.bf16.msra.mxu0 %v9469_v26 }
 0x9b0   :  { %v6570_v4 = vpop.permute.xlu0 %6569 }
 0x9b1   :  { %v6571_v40 = vrot.slane %v6570_v4, 1 }
 0x9b3   :  { %v6572_v50 = vsel %vm268_vm1, %v6570_v4, %v6571_v40 }
 0x9b4   :  { %v6574_v61 = vadd.f32 %v6572_v50, %v6540_v21 }
 0x9b6   :  { %v13629_v15 = vadd.f32 %v6602_v25, %v6574_v61  ;;  %v7052_v61 = vsub.s32 3, %v13853_v45 }
 0x9b8   :  { %v6291_v7 = vpop.f32.mrb[140].mxu0  ;;  %v6934_v12 = vpop.permute.xlu1 %6933 }
 0x9b9   :  { %v6292_v59 = vpop.f32.mrb[141].mxu0  ;;  %v6935_v38 = vrot.slane %v6934_v12, 1 }
 0x9ba   :  { %v6293_v2 = vpop.f32.mrb[142].mxu0 }
 0x9bb   :  { %v6936_v23 = vsel %vm268_vm1, %v6934_v12, %v6935_v38  ;;  %v6642_v3 = vcombine.low %v13513_v55, %v6293_v2  ;;  %v6295_v52 = vpop.f32.mrb[143].mxu0  ;;  %v6649_v55 = vrot.slane %v6641_v58, %v13056_v31 }
 0x9bc   :  { %v6938_v36 = vadd.f32 %v6936_v23, %v6904_v32 }
 0x9bd   :  { %v6656_v8 = vrot.slane %v6642_v3, %v13056_v31 }
 0x9be   :  { %v6969_v16 = vadd.f32 %v6967_v28, %v6938_v36  ;;  %v9473_v36 = vld [vmem:[%s13773_s13 + $0x18] sm:$0xff]   ;;  %v9474_v28 = vld [vmem:[%s13773_s13 + $0x20] sm:$0xff]  }
 0x9bf   :  { %v6657_v46 = vcombine.low %v6649_v55, %v6656_v8  ;;  %v9477_v55 = vld [vmem:[%s13773_s13 + $0x38] sm:$0xff]  }
 0x9c0   :  { %v6298_v39 = vpop.f32.mrb[144].mxu0 }
 0x9c1   :  { %v7007_v9 = vcombine.high %v13527_v51, %v6298_v39  ;;  %v6300_v58 = vpop.f32.mrb[145].mxu0  ;;  %v6664_v13 = vrot.slane %v6657_v46, %v13056_v31  ;;  %v9467_v51 = vld [vmem:[%s13771_s11 + $0x78] sm:$0xff]   ;;  %v8147_v46 = vld [vmem:[%s13772_s12] ss:$0 sm:$0xff]  ;;  %s9478_s12 = scalar_lea.vmem %s7498_s9, 32 }
 0x9c2   :  { %v6301_v27 = vpop.f32.mrb[146].mxu0  ;;  %8197 = vmatprep.subr.bf16.mxu1 %v9467_v51  ;;  %p9479_p0 = scmp.ne.s32.totalorder %s7498_s9, %s9478_s12  ;;  %p9484_p2 = scmp.lt.s32.totalorder %s9478_s12, %s9478_s12 }
 0x9c3   :  { %v7021_v10 = vrot.slane %v7007_v9, %v13056_v31  ;;  %v6302_v44 = vpop.f32.mrb[147].mxu0  ;;  %v6665_v54 = vcombine.high %v6664_v13, %v6664_v13  ;;  %8198 = vmatpush3.bf16.msra.mxu1 %v9468_v57 }
 0x9c4   :  { %8214 = vmatprep.subr.bf16.mxu1 %v13841_v63  ;;  %p9485_p3 = por %p9484_p2, %p9483_p1 }
 0x9c5   :  { %v7022_v48 = vcombine.high %v7014_v18, %v7021_v10  ;;  %6666 = vrot.lane.b32.xlu0 %v6665_v54, %s9508_s27 }
 0x9c6   :  { %p9486_p4 = pnand %p9485_p3, %p9479_p0 }
 0x9c7   :  { %v7029_v6 = vrot.slane %v7022_v48, %v13056_v31 }
 0x9c9   :  { %7030 = vrot.lane.b32.xlu1 %v7029_v6, %s9508_s27 }
 0xa0a   :  { %v6633_v0 = vpop.permute.xlu0 %6632 }
 0xa0b   :  { %v6634_v11 = vrot.slane %v6633_v0, 1 }
 0xa0d   :  { %v6635_v1 = vsel %vm6365_vm5, %v6633_v0, %v6634_v11 }
 0xa0e   :  { %v6637_v21 = vadd.f32 %v6635_v1, %v13629_v15 }
 0xa10   :  { %v6998_v4 = vpop.permute.xlu1 %6997 }
 0xa11   :  { %v6999_v29 = vrot.slane %v6998_v4, 1 }
 0xa13   :  { %v7000_v24 = vsel %vm6365_vm5, %v6998_v4, %v6999_v29 }
 0xa14   :  { %v7002_v25 = vadd.f32 %v7000_v24, %v6969_v16 }
 0xa37   :  { %v6667_v40 = vpop.permute.xlu0 %6666 }
 0xa38   :  { %v6668_v14 = vrot.slane %v6667_v40, 1 }
 0xa3a   :  { %v6669_v56 = vsel %vm6400_vm6, %v6667_v40, %v6668_v14 }
 0xa3b   :  { %v6671_v50 = vadd.f32 %v6669_v56, %v6637_v21  ;;  %v7031_v31 = vpop.permute.xlu1 %7030 }
 0xa3c   :  { %v7032_v34 = vrot.slane %v7031_v31, 1 }
 0xa3d   :  { %v6672_v19 = vmax.f32 %v6671_v50, 0.0 }
 0xa3e   :  { %v7033_v33 = vsel %vm6400_vm6, %v7031_v31, %v7032_v34 }
 0xa3f   :  { %v7035_v30 = vadd.f32 %v7033_v33, %v7002_v25  ;;  %v7041_v5 = vrot.slane %v6672_v19, %v10386_v41  ;;  %v7049_v53 = vrot.slane %v6672_v19, %v10389_v42  ;;  %v7053_v15 = vrot.slane %v6672_v19, %v7052_v61 }
 0xa40   :  { %v7045_v7 = vrot.slane %v6672_v19, %v13852_v47 }
 0xa41   :  { %v7036_v60 = vmax.f32 %v7035_v30, 0.0 }
 0xa43   :  { %v7062_v12 = vrot.slane %v7036_v60, %v10386_v41  ;;  %v7070_v37 = vrot.slane %v7036_v60, %v10389_v42  ;;  %v7074_v17 = vrot.slane %v7036_v60, %v7052_v61  ;;  %v7066_v59 = vrot.slane %v7036_v60, %v13852_v47  ;;  %v9470_v41 = vld [vmem:[%s13773_s13] sm:$0xff]   ;;  %v9471_v42 = vld [vmem:[%s13773_s13 + $0x8] sm:$0xff]   ;;  %v9472_v47 = vld [vmem:[%s13773_s13 + $0x10] sm:$0xff]  }
 0xa45   :  { %v7080_v45 = vsel %vm1427_vm3, %v7045_v7, %v7066_v59  ;;  %v7082_v38 = vsel %vm1427_vm3, %v7053_v15, %v7074_v17  ;;  %v7079_v32 = vsel %vm1427_vm3, %v7041_v5, %v7062_v12  ;;  %v7081_v2 = vsel %vm1427_vm3, %v7049_v53, %v7070_v37 }
 0xa46   :  { %v7084_v23 = vpack.c.bf16 %v7080_v45, %v7080_v45  ;;  %v7086_v3 = vpack.c.bf16 %v7082_v38, %v7082_v38  ;;  %v7083_v52 = vpack.c.bf16 %v7079_v32, %v7079_v32  ;;  %v7085_v20 = vpack.c.bf16 %v7081_v2, %v7081_v2 }
 0xa48   :  { %7329 = vmatprep.mubr.bf16.mxu1 %v7084_v23  ;;  %8173 = vmatprep.mubr.msk.bf16.mxu0 %vm268_vm1, %v7086_v3  ;;  %vm9515_vm1 = vmmov 0  }
 0xa49   :  { %7330 = vmatmul.mubr.bf16.vlgmr.msra.gmra.mrb[160].mxu1 %v7083_v52  ;;  %7370 = vmatmul.mubr.bf16.vlgmr.msra.gmra.mrb[148].mxu0 %v7085_v20 }
 0xa4a   :  { %8215 = vmatpush3.bf16.msra.mxu1 %v9470_v41  ;;  %8230 = vmatprep.mubr.msk.bf16.mxu1 %vm9515_vm1, %v13841_v63 }
 0xa4b   :  { %8216 = vmatprep.subr.bf16.mxu1 %v13841_v63 }
 0xa4e   :  { %8217 = vmatpush3.bf16.msra.mxu1 %v9471_v42 }
 0xa4f   :  { %8218 = vmatprep.subr.bf16.mxu1 %v13841_v63 }
 0xa52   :  { %8219 = vmatpush3.bf16.msra.mxu1 %v9472_v47 }
 0xa53   :  { %8220 = vmatprep.subr.bf16.mxu1 %v13841_v63 }
 0xa56   :  { %8221 = vmatpush3.bf16.msra.mxu1 %v9473_v36 }
 0xa57   :  { %8222 = vmatprep.subr.bf16.mxu1 %v13841_v63 }
 0xa5a   :  { %8223 = vmatpush3.bf16.msra.mxu1 %v9474_v28 }
 0xa5b   :  { %8224 = vmatprep.subr.bf16.mxu1 %v13841_v63 }
 0xa5e   :  { %8225 = vmatpush3.bf16.msra.mxu1 %v9475_v49 }
 0xa5f   :  { %8226 = vmatprep.subr.bf16.mxu1 %v13841_v63 }
 0xa62   :  { %8227 = vmatpush3.bf16.msra.mxu1 %v9476_v62 }
 0xa63   :  { %8228 = vmatprep.subr.bf16.mxu1 %v13841_v63  ;;  %v8174_v63 = vld [vmem:[%s13774_s14] ss:$0 sm:$0xff] }
 0xa66   :  { %8229 = vmatpush3.bf16.msra.mxu1 %v9477_v55 }
 0xb1c   :  { %v8199_v8 = vpop.f32.mrb[160].mxu1  ;;  %v7371_v16 = vpop.f32.mrb[148].mxu0 }
 0xb1d   :  { %v8200_v22 = vpop.f32.mrb[161].mxu1  ;;  %v7373_v39 = vpop.f32.mrb[149].mxu0 }
 0xb1e   :  { %v8201_v35 = vadd.f32 %v8200_v22, %v8199_v8  ;;  %v8202_v43 = vpop.f32.mrb[162].mxu1  ;;  %v7374_v9 = vpop.f32.mrb[150].mxu0 }
 0xb1f   :  { %v8203_v58 = vpop.f32.mrb[163].mxu1  ;;  %v7375_v13 = vpop.f32.mrb[151].mxu0 }
 0xb20   :  { %v7332_v27 = vadd.f32 %v8201_v35, %v8147_v46 }
 0xb22   :  { %v7372_v18 = vadd.f32 %v7371_v16, %v7332_v27 }
 0xb24   :  { %v7377_v10 = vmax.f32 %v7372_v18, 0.0 }
 0xb26   :  { %v7378_v44 = vpack.c.bf16 %v7377_v10, %v7377_v10 }
 0xb28   :  { %8231 = vmatmul.mubr.bf16.vlgmr.msra.gmra.mrb[164].mxu1 %v7378_v44 }
 0xbfb   :  { %v7484_v54 = vpop.f32.mrb[164].mxu1 }
 0xbfc   :  { %v7485_v51 = vadd.f32 %v8174_v63, %v7484_v54  ;;  %v8232_v57 = vpop.f32.mrb[165].mxu1 }
 0xbfd   :  { %v7487_v26 = vpop.f32.mrb[166].mxu1 }
 0xbfe   :  { %7490 = vst [vmem:[#allocation2] sm:$0x3] %v7485_v51  ;;  %v8233_v48 = vpop.f32.mrb[167].mxu1 }
 0xbff   :  { %9489 = shalt.err (!%p9486_p4)
}
 0xc00   :  { %s9490_s14 = scalar_lea.hbm %s13775_s15, 32 }
 0xc01   :  { %p9491_p5 = scmp.ne.s32.totalorder %s13775_s15, %s9490_s14  ;;  %p9494_p6 = scmp.lt.u32.totalorder %s9490_s14, %s13775_s15 }
 0xc03   :  { %p9496_p7 = pnand %p9494_p6, %p9491_p5 }
 0xc05   :  { %9499 = shalt.err (!%p9496_p7)
}
 0xc06   :  { %7500 = dma.vmem_to_hbm [thread:$0]  %s7498_s9, 32, %s13775_s15, [#allocation3]  }
 0xc07   :  { %9500 = dma.done.wait [#allocation3], 32  }
 0xc08   :  { %9501 = vsyncadd [#allocation3], 4294967264 }
 0xc09   :  { %7504 = vsyncpa [#allocation3], 1 }

</bundles_post_ra>
